<compile_context>
chip_gen: v5e
topology: v5e:2x2
jax: 0.10.0
libtpu: 0.0.40
codegen_flags: <defaults>
</compile_context>

<pallas_src>
import functools
import numpy as np
import jax
import jax.numpy as jnp
from jax.experimental import pallas as pl
from jax.experimental.pallas import tpu as pltpu


# -----------------------------------------------------------------------------
# helpers
# -----------------------------------------------------------------------------
def _round_up(x, m):
    return (x + m - 1) // m * m


def _choose_tile(total, candidates):
    for c in candidates:
        if total % c == 0:
            return c
    return candidates[-1]


def _pad2d(x, rows, cols):
    r, c = x.shape
    if r == rows and c == cols:            # skip pads when already aligned
        return x
    return jnp.pad(x, ((0, rows - r), (0, cols - c)))


# -----------------------------------------------------------------------------
# Fused conv-as-matmul kernel:  out = (sum_t shift(A, s_t) @ W_t) + bias
#                                     [+ residual] [ReLU]
# A is the flattened (rows = n*Hin*Win, cols = Cin) padded activation; the taps
# are applied in-kernel by slicing across two consecutive row-blocks, so no
# im2col matrix is ever materialised in HBM.
# -----------------------------------------------------------------------------
def _make_conv_kernel(taps, relu, has_res):
    multi = len(taps) > 1

    def kernel(*refs):
        idx = 0
        a0_ref = refs[idx]; idx += 1
        a1_ref = None
        if multi:
            a1_ref = refs[idx]; idx += 1
        w_ref = refs[idx]; idx += 1
        b_ref = refs[idx]; idx += 1
        r_ref = None
        if has_res:
            r_ref = refs[idx]; idx += 1
        o_ref = refs[idx]; idx += 1
        acc_ref = refs[idx]

        k = pl.program_id(2)

        @pl.when(k == 0)
        def _():
            acc_ref[...] = jnp.zeros_like(acc_ref)

        for t, s in enumerate(taps):
            if s == 0:
                a_t = a0_ref[...]
            else:
                # rows [s, s+tm) of the virtual 2*tm window over [block_i ; block_i+1]
                a_t = jnp.concatenate([a0_ref[s:, :], a1_ref[:s, :]], axis=0)
            acc_ref[...] += jnp.dot(a_t, w_ref[t],
                                    preferred_element_type=jnp.float32)

        @pl.when(k == pl.num_programs(2) - 1)
        def _():
            out = acc_ref[...] + b_ref[...]
            if r_ref is not None:
                out = out + r_ref[...].astype(jnp.float32)
            if relu:
                out = jnp.maximum(out, 0.0)
            o_ref[...] = out.astype(o_ref.dtype)

    return kernel


def _conv_matmul(a, w_mat, bias, res, taps, relu):
    """a: (M, K) bf16 flattened activation; w_mat: (T, Kp, Np) bf16; bias: (Cout,)."""
    M, K = a.shape
    T, Kp, Np = w_mat.shape
    S = max(taps)
    multi = T > 1

    # small-M aware tiles; K/N tiles are multiples of 128 dividing the padded dims
    tm = min(256, _round_up(M, 16))
    if S > 0:
        tm = max(tm, _round_up(S + 1, 16))     # window of two blocks must cover max shift
    tn = _choose_tile(Np, (256, 128))
    tk = _choose_tile(Kp, (512, 256, 128))

    Mp = _round_up(M, tm)
    extra = tm if multi else 0                 # one extra row-block for the shifted reads
    a_p = _pad2d(a, Mp + extra, Kp).astype(jnp.bfloat16)
    bias_p = _pad2d(bias.reshape(1, -1).astype(jnp.float32), 1, Np)

    inputs = [a_p]
    in_specs = [pl.BlockSpec((tm, tk), lambda i, j, k: (i, k))]
    if multi:
        inputs.append(a_p)
        in_specs.append(pl.BlockSpec((tm, tk), lambda i, j, k: (i + 1, k)))
    inputs += [w_mat, bias_p]
    in_specs += [
        pl.BlockSpec((T, tk, tn), lambda i, j, k: (0, k, j)),
        pl.BlockSpec((1, tn), lambda i, j, k: (0, j)),
    ]
    has_res = res is not None
    if has_res:
        inputs.append(_pad2d(res, Mp, Np))
        in_specs.append(pl.BlockSpec((tm, tn), lambda i, j, k: (i, j)))

    flops = 2 * Mp * Np * Kp * T
    bytes_acc = int(a_p.size) * 2 * (2 if multi else 1) \
        + (Mp // tm) * T * Kp * Np * 2 + Mp * Np * 2

    out = pl.pallas_call(
        _make_conv_kernel(taps, relu, has_res),
        out_shape=jax.ShapeDtypeStruct((Mp, Np), jnp.bfloat16),
        grid_spec=pltpu.PrefetchScalarGridSpec(
            num_scalar_prefetch=0,
            grid=(Mp // tm, Np // tn, Kp // tk),
            in_specs=in_specs,
            out_specs=pl.BlockSpec((tm, tn), lambda i, j, k: (i, j)),
            scratch_shapes=[pltpu.VMEM((tm, tn), jnp.float32)],
        ),
        compiler_params=pltpu.CompilerParams(
            dimension_semantics=("parallel", "parallel", "arbitrary")),
        cost_estimate=pl.CostEstimate(
            flops=flops, transcendentals=0, bytes_accessed=bytes_acc),
    )(*inputs)
    return out


@functools.partial(jax.jit, static_argnames=("kh", "kw", "stride", "pad", "relu"))
def conv2d(x, w_mat, bias, residual=None, *, kh, kw, stride, pad, relu):
    """x: (N,H,W,Cin) bf16; w_mat: prepared (T,Kp,Np) bf16; bias: (Cout,) f32."""
    N, H, W, Cin = x.shape
    cout = bias.shape[0]
    Ho = (H + 2 * pad - kh) // stride + 1
    Wo = (W + 2 * pad - kw) // stride + 1

    if kh == 1 and kw == 1 and stride == 2:
        # 1x1/s2 ResNet downsample: plain subsample, then it's a 1x1/s1 matmul.
        xs = x[:, ::2, ::2, :]
        khe, kwe = 1, 1
        Hin, Win = Ho, Wo
    elif stride == 2:
        # space-to-depth: stride-2 conv -> stride-1 conv over 4*Cin channels.
        Hp, Wp = H + 2 * pad, W + 2 * pad
        eh, ew = Hp % 2, Wp % 2
        xp = jnp.pad(x, ((0, 0), (pad, pad + eh), (pad, pad + ew), (0, 0)))
        Hp += eh
        Wp += ew
        xs = xp.reshape(N, Hp // 2, 2, Wp // 2, 2, Cin)
        xs = xs.transpose(0, 1, 3, 2, 4, 5).reshape(N, Hp // 2, Wp // 2, 4 * Cin)
        khe, kwe = (kh + 1) // 2, (kw + 1) // 2
        Hin, Win = Hp // 2, Wp // 2
    else:
        khe, kwe = kh, kw
        xs = jnp.pad(x, ((0, 0), (pad, pad), (pad, pad), (0, 0))) if pad else x
        Hin, Win = H + 2 * pad, W + 2 * pad

    Ck = xs.shape[-1]
    taps = tuple(di * Win + dj for di in range(khe) for dj in range(kwe))
    a = xs.reshape(N * Hin * Win, Ck)

    res_flat = None
    if residual is not None:
        assert khe == 1 and kwe == 1
        res_flat = residual.reshape(N * Ho * Wo, cout)

    out = _conv_matmul(a, w_mat, bias, res_flat, taps, relu)
    out = out[:N * Hin * Win, :cout].reshape(N, Hin, Win, cout)
    if khe > 1 or kwe > 1:
        out = out[:, :Ho, :Wo, :]          # drop rows/cols mixed across image edges
    return out


# -----------------------------------------------------------------------------
# MaxPool2d(kernel_size=3, stride=2, padding=1): 4-phase (space-to-depth) kernel
# -----------------------------------------------------------------------------
def _maxpool_kernel(p_ref, o_ref):
    Ho, Wo = o_ref.shape[1], o_ref.shape[2]
    ee, eo, oe, oo = p_ref[0], p_ref[1], p_ref[2], p_ref[3]
    cands = (
        ee[:Ho, :Wo], eo[:Ho, :Wo], ee[:Ho, 1:Wo + 1],
        oe[:Ho, :Wo], oo[:Ho, :Wo], oe[:Ho, 1:Wo + 1],
        ee[1:Ho + 1, :Wo], eo[1:Ho + 1, :Wo], ee[1:Ho + 1, 1:Wo + 1],
    )
    out = cands[0]
    for c in cands[1:]:
        out = jnp.maximum(out, c)
    o_ref[0] = out


@jax.jit
def maxpool_3x3_s2_p1(x):
    N, H, W, C = x.shape
    Ho = (H + 2 - 3) // 2 + 1
    Wo = (W + 2 - 3) // 2 + 1
    Hp, Wp = H + 2, W + 2
    eh, ew = Hp % 2, Wp % 2
    xp = jnp.pad(x, ((0, 0), (1, 1 + eh), (1, 1 + ew), (0, 0)),
                 constant_values=-jnp.inf)
    Hp += eh
    Wp += ew
    Hh, Wh = Hp // 2, Wp // 2
    ph = xp.reshape(N, Hh, 2, Wh, 2, C).transpose(0, 2, 4, 1, 3, 5)
    ph = ph.reshape(N * 4, Hh, Wh, C)
    return pl.pallas_call(
        _maxpool_kernel,
        out_shape=jax.ShapeDtypeStruct((N, Ho, Wo, C), x.dtype),
        grid_spec=pltpu.PrefetchScalarGridSpec(
            num_scalar_prefetch=0,
            grid=(N,),
            in_specs=[pl.BlockSpec((4, Hh, Wh, C), lambda n: (n, 0, 0, 0))],
            out_specs=pl.BlockSpec((1, Ho, Wo, C), lambda n: (n, 0, 0, 0)),
        ),
        compiler_params=pltpu.CompilerParams(dimension_semantics=("parallel",)),
    )(ph)


# -----------------------------------------------------------------------------
# InstanceNorm2d (affine=False, eps=1e-5, biased var) fused with ReLU.
# Layout: (N, H*W, C) -> channels stay on lanes, stats reduce over rows.
# -----------------------------------------------------------------------------
def _in_stats_kernel(x_ref, s_ref, q_ref):
    t = pl.program_id(1)

    @pl.when(t == 0)
    def _():
        s_ref[...] = jnp.zeros_like(s_ref)
        q_ref[...] = jnp.zeros_like(q_ref)

    x = x_ref[0].astype(jnp.float32)
    s_ref[0] += jnp.sum(x, axis=0, keepdims=True)
    q_ref[0] += jnp.sum(x * x, axis=0, keepdims=True)


def _make_in_norm_kernel(count, eps):
    inv = 1.0 / float(count)

    def kernel(x_ref, s_ref, q_ref, o_ref):
        x = x_ref[0].astype(jnp.float32)
        mean = s_ref[0] * inv
        var = q_ref[0] * inv - mean * mean
        y = (x - mean) * jax.lax.rsqrt(var + eps)
        o_ref[0] = jnp.maximum(y, 0.0).astype(o_ref.dtype)

    return kernel


@jax.jit
def instance_norm_relu(x):
    N, H, W, C = x.shape
    HW = H * W
    xr = x.reshape(N, HW, C)
    thw = min(512, _round_up(HW, 8))
    HWp = _round_up(HW, thw)
    Cp = _round_up(C, 128)
    if HWp != HW or Cp != C:
        xr = jnp.pad(xr, ((0, 0), (0, HWp - HW), (0, Cp - C)))
    nt = HWp // thw

    stat_shape = jax.ShapeDtypeStruct((N, 1, Cp), jnp.float32)
    s, q = pl.pallas_call(
        _in_stats_kernel,
        out_shape=(stat_shape, stat_shape),
        grid_spec=pltpu.PrefetchScalarGridSpec(
            num_scalar_prefetch=0,
            grid=(N, nt),
            in_specs=[pl.BlockSpec((1, thw, Cp), lambda n, t: (n, t, 0))],
            out_specs=(pl.BlockSpec((1, 1, Cp), lambda n, t: (n, 0, 0)),
                       pl.BlockSpec((1, 1, Cp), lambda n, t: (n, 0, 0))),
        ),
        compiler_params=pltpu.CompilerParams(
            dimension_semantics=("parallel", "arbitrary")),
    )(xr)

    out = pl.pallas_call(
        _make_in_norm_kernel(HW, 1e-5),
        out_shape=jax.ShapeDtypeStruct((N, HWp, Cp), x.dtype),
        grid_spec=pltpu.PrefetchScalarGridSpec(
            num_scalar_prefetch=0,
            grid=(N, nt),
            in_specs=[pl.BlockSpec((1, thw, Cp), lambda n, t: (n, t, 0)),
                      pl.BlockSpec((1, 1, Cp), lambda n, t: (n, 0, 0)),
                      pl.BlockSpec((1, 1, Cp), lambda n, t: (n, 0, 0))],
            out_specs=pl.BlockSpec((1, thw, Cp), lambda n, t: (n, t, 0)),
        ),
        compiler_params=pltpu.CompilerParams(
            dimension_semantics=("parallel", "parallel")),
    )(xr, s, q)

    if HWp != HW or Cp != C:
        out = out[:, :HW, :C]
    return out.reshape(N, H, W, C)


# -----------------------------------------------------------------------------
# nn.Upsample(scale_factor=2, mode='bilinear', align_corners=False).
# The x2 weights are a fixed 0.25/0.75 phase pattern computed in-kernel; the
# kernel emits the four output phases, interleaved afterwards by one reshape.
# -----------------------------------------------------------------------------
def _upsample_kernel(x_ref, ee_ref, eo_ref, oe_ref, oo_ref):
    x = x_ref[0].astype(jnp.float32)                       # (H, W, tc)
    x_up = jnp.concatenate([x[:1], x[:-1]], axis=0)        # row i-1 (clamped)
    x_dn = jnp.concatenate([x[1:], x[-1:]], axis=0)        # row i+1 (clamped)
    re = 0.25 * x_up + 0.75 * x                            # even output rows
    ro = 0.75 * x + 0.25 * x_dn                            # odd output rows

    def cols(v):
        v_l = jnp.concatenate([v[:, :1, :], v[:, :-1, :]], axis=1)
        v_r = jnp.concatenate([v[:, 1:, :], v[:, -1:, :]], axis=1)
        return 0.25 * v_l + 0.75 * v, 0.75 * v + 0.25 * v_r

    ee, eo = cols(re)
    oe, oo = cols(ro)
    dt = ee_ref.dtype
    ee_ref[0] = ee.astype(dt)
    eo_ref[0] = eo.astype(dt)
    oe_ref[0] = oe.astype(dt)
    oo_ref[0] = oo.astype(dt)


@jax.jit
def bilinear_upsample_x2(x):
    N, H, W, C = x.shape
    Cp = _round_up(C, 128)
    tc = _choose_tile(Cp, (512, 256, 128))
    xp = x if Cp == C else jnp.pad(x, ((0, 0), (0, 0), (0, 0), (0, Cp - C)))
    nc = Cp // tc

    phase_shape = jax.ShapeDtypeStruct((N, H, W, Cp), x.dtype)
    ee, eo, oe, oo = pl.pallas_call(
        _upsample_kernel,
        out_shape=(phase_shape,) * 4,
        grid_spec=pltpu.PrefetchScalarGridSpec(
            num_scalar_prefetch=0,
            grid=(N, nc),
            in_specs=[pl.BlockSpec((1, H, W, tc), lambda n, c: (n, 0, 0, c))],
            out_specs=tuple(pl.BlockSpec((1, H, W, tc), lambda n, c: (n, 0, 0, c))
                            for _ in range(4)),
        ),
        compiler_params=pltpu.CompilerParams(
            dimension_semantics=("parallel", "parallel")),
    )(xp)

    ph = jnp.stack([ee, eo, oe, oo], axis=0).reshape(2, 2, N, H, W, Cp)
    up = ph.transpose(2, 3, 0, 4, 1, 5).reshape(N, 2 * H, 2 * W, Cp)
    return up if Cp == C else up[..., :C]


# -----------------------------------------------------------------------------
# Deterministic parameter construction. BatchNorm is folded into the conv
# scale/bias; weights are pre-rearranged (space-to-depth for stride-2 convs),
# padded to K/N multiples of 128 and cast to bf16 ONCE here.
# -----------------------------------------------------------------------------
class _KeyGen:
    def __init__(self, key):
        self._key = key
        self._i = 0

    def __call__(self):
        self._i += 1
        return jax.random.fold_in(self._key, self._i)


def _prep_conv(kg, kh, kw, cin, cout, stride, bias=None):
    # TODO(synk): torchvision pretrained=True weights cannot be loaded here;
    #             weights are synthesized deterministically with matching shapes.
    w = jax.random.normal(kg(), (kh, kw, cin, cout), jnp.float32)
    w = w * (0.5 / np.sqrt(kh * kw * cin))
    # folded BN in eval mode with gamma=1, beta=0, running_mean=0, running_var=1
    scale = jnp.ones((cout,), jnp.float32)
    w = w * scale
    b = jnp.zeros((cout,), jnp.float32) if bias is None else bias

    if stride == 2 and kh * kw > 1:
        khe, kwe = (kh + 1) // 2, (kw + 1) // 2
        wp = jnp.pad(w, ((0, 2 * khe - kh), (0, 2 * kwe - kw), (0, 0), (0, 0)))
        wt = wp.reshape(khe, 2, kwe, 2, cin, cout).transpose(0, 2, 1, 3, 4, 5)
        wt = wt.reshape(khe * kwe, 4 * cin, cout)
    else:
        wt = w.reshape(kh * kw, cin, cout)

    t, k, n = wt.shape
    kp, npad = _round_up(k, 128), _round_up(n, 128)
    wt = jnp.pad(wt, ((0, 0), (0, kp - k), (0, npad - n))).astype(jnp.bfloat16)
    return dict(w=wt, b=b)


def _bottleneck_params(kg, inplanes, planes, stride, downsample):
    p = dict(conv1=_prep_conv(kg, 1, 1, inplanes, planes, 1),
             conv2=_prep_conv(kg, 3, 3, planes, planes, stride),
             conv3=_prep_conv(kg, 1, 1, planes, planes * 4, 1))
    if downsample:
        p['ds'] = _prep_conv(kg, 1, 1, inplanes, planes * 4, stride)
    return p


def _layer_params(kg, inplanes, planes, blocks, stride):
    params = [_bottleneck_params(kg, inplanes, planes, stride, True)]
    for _ in range(blocks - 1):
        params.append(_bottleneck_params(kg, planes * 4, planes, 1, False))
    return params


def init_encoder_params(key, C):
    kg = _KeyGen(key)
    p = dict()
    p['conv1'] = _prep_conv(kg, 7, 7, 3, 64, 2)            # resnet conv1 7x7/s2
    p['layer1'] = _layer_params(kg, 64, 64, 3, 1)          # -> 256 ch
    p['layer2'] = _layer_params(kg, 256, 128, 4, 2)        # -> 512 ch
    p['layer3'] = _layer_params(kg, 512, 256, 23, 2)       # -> 1024 ch
    p['uc_conv1'] = _prep_conv(kg, 3, 3, 1536, 512, 1)     # UpsamplingConcat conv[0]
    p['uc_conv2'] = _prep_conv(kg, 3, 3, 512, 512, 1)      # UpsamplingConcat conv[3]
    p['depth'] = _prep_conv(kg, 1, 1, 512, C, 1,
                            bias=0.1 * jax.random.normal(kg(), (C,), jnp.float32))
    return p


# -----------------------------------------------------------------------------
# Forward
# -----------------------------------------------------------------------------
def run_bottleneck(x, p, stride):
    identity = x
    out = conv2d(x, p['conv1']['w'], p['conv1']['b'],
                 kh=1, kw=1, stride=1, pad=0, relu=True)
    out = conv2d(out, p['conv2']['w'], p['conv2']['b'],
                 kh=3, kw=3, stride=stride, pad=1, relu=True)
    if 'ds' in p:
        identity = conv2d(x, p['ds']['w'], p['ds']['b'],
                          kh=1, kw=1, stride=stride, pad=0, relu=False)
    # final 1x1 conv fuses folded-BN bias + residual add + ReLU
    out = conv2d(out, p['conv3']['w'], p['conv3']['b'], identity,
                 kh=1, kw=1, stride=1, pad=0, relu=True)
    return out


def run_layer(x, layer_p, stride):
    x = run_bottleneck(x, layer_p[0], stride)
    for p in layer_p[1:]:
        x = run_bottleneck(x, p, 1)
    return x


def encoder_res101_forward(params, x_nchw):
    x = jnp.transpose(x_nchw, (0, 2, 3, 1)).astype(jnp.bfloat16)   # NCHW -> NHWC
    c = params['conv1']
    x = conv2d(x, c['w'], c['b'], kh=7, kw=7, stride=2, pad=3, relu=True)
    x = maxpool_3x3_s2_p1(x)
    x = run_layer(x, params['layer1'], stride=1)
    x1 = run_layer(x, params['layer2'], stride=2)      # 512 ch, stride 8
    x2 = run_layer(x1, params['layer3'], stride=2)     # 1024 ch, stride 16
    # UpsamplingConcat(1536, 512): upsample x2, cat([x1, up]), 2x (conv+IN+ReLU)
    up = bilinear_upsample_x2(x2)
    cat = jnp.concatenate([x1, up], axis=-1)
    c = params['uc_conv1']
    y = conv2d(cat, c['w'], c['b'], kh=3, kw=3, stride=1, pad=1, relu=False)
    y = instance_norm_relu(y)
    c = params['uc_conv2']
    y = conv2d(y, c['w'], c['b'], kh=3, kw=3, stride=1, pad=1, relu=False)
    y = instance_norm_relu(y)
    c = params['depth']
    y = conv2d(y, c['w'], c['b'], kh=1, kw=1, stride=1, pad=0, relu=False)
    return jnp.transpose(y, (0, 3, 1, 2)).astype(jnp.float32)       # back to NCHW


if __name__ == "__main__":
    C = 32
    key = jax.random.PRNGKey(0)
    params = init_encoder_params(key, C)
    x = jax.random.normal(jax.random.fold_in(key, 12345), (2, 3, 64, 64),
                          jnp.float32)
    out = encoder_res101_forward(params, x)
    out = jax.block_until_ready(out)
    assert out.shape == (2, C, 8, 8), out.shape
    assert bool(jnp.all(jnp.isfinite(out)))
    print("KERNEL_OK")
</pallas_src>

<mosaic_0001>
module attributes {stable_mosaic.version = 11 : i64} {
  func.func @kernel(%arg0: i32, %arg1: i32, %arg2: i32, %arg3: memref<256x128xbf16, #tpu.memory_space<vmem>>, %arg4: memref<256x128xbf16, #tpu.memory_space<vmem>>, %arg5: memref<16x128x128xbf16, #tpu.memory_space<vmem>>, %arg6: memref<1x128xf32, #tpu.memory_space<vmem>>, %arg7: memref<256x128xbf16, #tpu.memory_space<vmem>>, %arg8: memref<256x128xf32, #tpu.memory_space<vmem>>) attributes {dimension_semantics = [#tpu.dimension_semantics<parallel>, #tpu.dimension_semantics<parallel>, #tpu.dimension_semantics<arbitrary>], iteration_bounds = array<i64: 10, 1, 1>, scalar_prefetch = 0 : i64, scratch_operands = 1 : i64, tpu.core_type = #tpu.core_type<tc>, window_params = [{transform_indices = @transform_0, window_bounds = array<i64: 256, 128>}, {transform_indices = @transform_1, window_bounds = array<i64: 256, 128>}, {transform_indices = @transform_2, window_bounds = array<i64: 16, 128, 128>}, {transform_indices = @transform_3, window_bounds = array<i64: 1, 128>}, {transform_indices = @transform_4, window_bounds = array<i64: 256, 128>}]} {
    %c0_i32 = arith.constant 0 : i32
    %0 = arith.cmpi eq, %arg2, %c0_i32 : i32
    %1 = arith.extui %0 : i1 to i32
    %c0_i32_0 = arith.constant 0 : i32
    %2 = arith.cmpi ne, %1, %c0_i32_0 : i32
    scf.if %2 {
      %cst_164 = arith.constant 0.000000e+00 : f32
      %148 = vector.broadcast %cst_164 : f32 to vector<256x128xf32>
      %c0_165 = arith.constant 0 : index
      %c0_166 = arith.constant 0 : index
      %149 = vector.load %arg8[%c0_165, %c0_166] : memref<256x128xf32, #tpu.memory_space<vmem>>, vector<256x128xf32>
      tpu.vector_store %arg8[%c0_165, %c0_166], %148 {strides = array<i32>} : memref<256x128xf32, #tpu.memory_space<vmem>>, vector<256x128xf32>,
    } else {
    }
    %c0 = arith.constant 0 : index
    %c0_1 = arith.constant 0 : index
    %3 = vector.load %arg3[%c0, %c0_1] : memref<256x128xbf16, #tpu.memory_space<vmem>>, vector<256x128xbf16>
    %c0_2 = arith.constant 0 : index
    %c0_3 = arith.constant 0 : index
    %4 = vector.load %arg8[%c0_2, %c0_3] : memref<256x128xf32, #tpu.memory_space<vmem>>, vector<256x128xf32>
    %c0_4 = arith.constant 0 : index
    %c0_5 = arith.constant 0 : index
    %c0_6 = arith.constant 0 : index
    %5 = vector.load %arg5[%c0_4, %c0_5, %c0_6] : memref<16x128x128xbf16, #tpu.memory_space<vmem>>, vector<1x128x128xbf16>
    %6 = vector.shape_cast %5 : vector<1x128x128xbf16> to vector<128x128xbf16>
    %cst = arith.constant dense<0.000000e+00> : vector<256x128xf32>
    %7 = tpu.matmul %3, %6, %cst {dimension_numbers = #tpu.dot_dimension_numbers<[1], [0], [0], [1], [0, 0, 1, 1], [], []>} : vector<256x128xbf16>, vector<128x128xbf16>, vector<256x128xf32> -> vector<256x128xf32>
    %8 = arith.addf %4, %7 : vector<256x128xf32>
    %c0_7 = arith.constant 0 : index
    %c0_8 = arith.constant 0 : index
    %9 = vector.load %arg8[%c0_7, %c0_8] : memref<256x128xf32, #tpu.memory_space<vmem>>, vector<256x128xf32>
    tpu.vector_store %arg8[%c0_7, %c0_8], %8 {strides = array<i32>} : memref<256x128xf32, #tpu.memory_space<vmem>>, vector<256x128xf32>,
    %c1 = arith.constant 1 : index
    %c0_9 = arith.constant 0 : index
    %10 = vector.load %arg3[%c1, %c0_9] : memref<256x128xbf16, #tpu.memory_space<vmem>>, vector<255x128xbf16>
    %c0_10 = arith.constant 0 : index
    %c0_11 = arith.constant 0 : index
    %11 = vector.load %arg4[%c0_10, %c0_11] : memref<256x128xbf16, #tpu.memory_space<vmem>>, vector<1x128xbf16>
    %12 = tpu.concatenate %10, %11 in 0 : vector<255x128xbf16>, vector<1x128xbf16> -> vector<256x128xbf16>
    %c0_12 = arith.constant 0 : index
    %c0_13 = arith.constant 0 : index
    %13 = vector.load %arg8[%c0_12, %c0_13] : memref<256x128xf32, #tpu.memory_space<vmem>>, vector<256x128xf32>
    %c1_14 = arith.constant 1 : index
    %c0_15 = arith.constant 0 : index
    %c0_16 = arith.constant 0 : index
    %14 = vector.load %arg5[%c1_14, %c0_15, %c0_16] : memref<16x128x128xbf16, #tpu.memory_space<vmem>>, vector<1x128x128xbf16>
    %15 = vector.shape_cast %14 : vector<1x128x128xbf16> to vector<128x128xbf16>
    %cst_17 = arith.constant dense<0.000000e+00> : vector<256x128xf32>
    %16 = tpu.matmul %12, %15, %cst_17 {dimension_numbers = #tpu.dot_dimension_numbers<[1], [0], [0], [1], [0, 0, 1, 1], [], []>} : vector<256x128xbf16>, vector<128x128xbf16>, vector<256x128xf32> -> vector<256x128xf32>
    %17 = arith.addf %13, %16 : vector<256x128xf32>
    %c0_18 = arith.constant 0 : index
    %c0_19 = arith.constant 0 : index
    %18 = vector.load %arg8[%c0_18, %c0_19] : memref<256x128xf32, #tpu.memory_space<vmem>>, vector<256x128xf32>
    tpu.vector_store %arg8[%c0_18, %c0_19], %17 {strides = array<i32>} : memref<256x128xf32, #tpu.memory_space<vmem>>, vector<256x128xf32>,
    %c2 = arith.constant 2 : index
    %c0_20 = arith.constant 0 : index
    %19 = vector.load %arg3[%c2, %c0_20] : memref<256x128xbf16, #tpu.memory_space<vmem>>, vector<254x128xbf16>
    %c0_21 = arith.constant 0 : index
    %c0_22 = arith.constant 0 : index
    %20 = vector.load %arg4[%c0_21, %c0_22] : memref<256x128xbf16, #tpu.memory_space<vmem>>, vector<2x128xbf16>
    %21 = tpu.concatenate %19, %20 in 0 : vector<254x128xbf16>, vector<2x128xbf16> -> vector<256x128xbf16>
    %c0_23 = arith.constant 0 : index
    %c0_24 = arith.constant 0 : index
    %22 = vector.load %arg8[%c0_23, %c0_24] : memref<256x128xf32, #tpu.memory_space<vmem>>, vector<256x128xf32>
    %c2_25 = arith.constant 2 : index
    %c0_26 = arith.constant 0 : index
    %c0_27 = arith.constant 0 : index
    %23 = vector.load %arg5[%c2_25, %c0_26, %c0_27] : memref<16x128x128xbf16, #tpu.memory_space<vmem>>, vector<1x128x128xbf16>
    %24 = vector.shape_cast %23 : vector<1x128x128xbf16> to vector<128x128xbf16>
    %cst_28 = arith.constant dense<0.000000e+00> : vector<256x128xf32>
    %25 = tpu.matmul %21, %24, %cst_28 {dimension_numbers = #tpu.dot_dimension_numbers<[1], [0], [0], [1], [0, 0, 1, 1], [], []>} : vector<256x128xbf16>, vector<128x128xbf16>, vector<256x128xf32> -> vector<256x128xf32>
    %26 = arith.addf %22, %25 : vector<256x128xf32>
    %c0_29 = arith.constant 0 : index
    %c0_30 = arith.constant 0 : index
    %27 = vector.load %arg8[%c0_29, %c0_30] : memref<256x128xf32, #tpu.memory_space<vmem>>, vector<256x128xf32>
    tpu.vector_store %arg8[%c0_29, %c0_30], %26 {strides = array<i32>} : memref<256x128xf32, #tpu.memory_space<vmem>>, vector<256x128xf32>,
    %c3 = arith.constant 3 : index
    %c0_31 = arith.constant 0 : index
    %28 = vector.load %arg3[%c3, %c0_31] : memref<256x128xbf16, #tpu.memory_space<vmem>>, vector<253x128xbf16>
    %c0_32 = arith.constant 0 : index
    %c0_33 = arith.constant 0 : index
    %29 = vector.load %arg4[%c0_32, %c0_33] : memref<256x128xbf16, #tpu.memory_space<vmem>>, vector<3x128xbf16>
    %30 = tpu.concatenate %28, %29 in 0 : vector<253x128xbf16>, vector<3x128xbf16> -> vector<256x128xbf16>
    %c0_34 = arith.constant 0 : index
    %c0_35 = arith.constant 0 : index
    %31 = vector.load %arg8[%c0_34, %c0_35] : memref<256x128xf32, #tpu.memory_space<vmem>>, vector<256x128xf32>
    %c3_36 = arith.constant 3 : index
    %c0_37 = arith.constant 0 : index
    %c0_38 = arith.constant 0 : index
    %32 = vector.load %arg5[%c3_36, %c0_37, %c0_38] : memref<16x128x128xbf16, #tpu.memory_space<vmem>>, vector<1x128x128xbf16>
    %33 = vector.shape_cast %32 : vector<1x128x128xbf16> to vector<128x128xbf16>
    %cst_39 = arith.constant dense<0.000000e+00> : vector<256x128xf32>
    %34 = tpu.matmul %30, %33, %cst_39 {dimension_numbers = #tpu.dot_dimension_numbers<[1], [0], [0], [1], [0, 0, 1, 1], [], []>} : vector<256x128xbf16>, vector<128x128xbf16>, vector<256x128xf32> -> vector<256x128xf32>
    %35 = arith.addf %31, %34 : vector<256x128xf32>
    %c0_40 = arith.constant 0 : index
    %c0_41 = arith.constant 0 : index
    %36 = vector.load %arg8[%c0_40, %c0_41] : memref<256x128xf32, #tpu.memory_space<vmem>>, vector<256x128xf32>
    tpu.vector_store %arg8[%c0_40, %c0_41], %35 {strides = array<i32>} : memref<256x128xf32, #tpu.memory_space<vmem>>, vector<256x128xf32>,
    %c35 = arith.constant 35 : index
    %c0_42 = arith.constant 0 : index
    %37 = vector.load %arg3[%c35, %c0_42] : memref<256x128xbf16, #tpu.memory_space<vmem>>, vector<221x128xbf16>
    %c0_43 = arith.constant 0 : index
    %c0_44 = arith.constant 0 : index
    %38 = vector.load %arg4[%c0_43, %c0_44] : memref<256x128xbf16, #tpu.memory_space<vmem>>, vector<35x128xbf16>
    %39 = tpu.concatenate %37, %38 in 0 : vector<221x128xbf16>, vector<35x128xbf16> -> vector<256x128xbf16>
    %c0_45 = arith.constant 0 : index
    %c0_46 = arith.constant 0 : index
    %40 = vector.load %arg8[%c0_45, %c0_46] : memref<256x128xf32, #tpu.memory_space<vmem>>, vector<256x128xf32>
    %c4 = arith.constant 4 : index
    %c0_47 = arith.constant 0 : index
    %c0_48 = arith.constant 0 : index
    %41 = vector.load %arg5[%c4, %c0_47, %c0_48] : memref<16x128x128xbf16, #tpu.memory_space<vmem>>, vector<1x128x128xbf16>
    %42 = vector.shape_cast %41 : vector<1x128x128xbf16> to vector<128x128xbf16>
    %cst_49 = arith.constant dense<0.000000e+00> : vector<256x128xf32>
    %43 = tpu.matmul %39, %42, %cst_49 {dimension_numbers = #tpu.dot_dimension_numbers<[1], [0], [0], [1], [0, 0, 1, 1], [], []>} : vector<256x128xbf16>, vector<128x128xbf16>, vector<256x128xf32> -> vector<256x128xf32>
    %44 = arith.addf %40, %43 : vector<256x128xf32>
    %c0_50 = arith.constant 0 : index
    %c0_51 = arith.constant 0 : index
    %45 = vector.load %arg8[%c0_50, %c0_51] : memref<256x128xf32, #tpu.memory_space<vmem>>, vector<256x128xf32>
    tpu.vector_store %arg8[%c0_50, %c0_51], %44 {strides = array<i32>} : memref<256x128xf32, #tpu.memory_space<vmem>>, vector<256x128xf32>,
    %c36 = arith.constant 36 : index
    %c0_52 = arith.constant 0 : index
    %46 = vector.load %arg3[%c36, %c0_52] : memref<256x128xbf16, #tpu.memory_space<vmem>>, vector<220x128xbf16>
    %c0_53 = arith.constant 0 : index
    %c0_54 = arith.constant 0 : index
    %47 = vector.load %arg4[%c0_53, %c0_54] : memref<256x128xbf16, #tpu.memory_space<vmem>>, vector<36x128xbf16>
    %48 = tpu.concatenate %46, %47 in 0 : vector<220x128xbf16>, vector<36x128xbf16> -> vector<256x128xbf16>
    %c0_55 = arith.constant 0 : index
    %c0_56 = arith.constant 0 : index
    %49 = vector.load %arg8[%c0_55, %c0_56] : memref<256x128xf32, #tpu.memory_space<vmem>>, vector<256x128xf32>
    %c5 = arith.constant 5 : index
    %c0_57 = arith.constant 0 : index
    %c0_58 = arith.constant 0 : index
    %50 = vector.load %arg5[%c5, %c0_57, %c0_58] : memref<16x128x128xbf16, #tpu.memory_space<vmem>>, vector<1x128x128xbf16>
    %51 = vector.shape_cast %50 : vector<1x128x128xbf16> to vector<128x128xbf16>
    %cst_59 = arith.constant dense<0.000000e+00> : vector<256x128xf32>
    %52 = tpu.matmul %48, %51, %cst_59 {dimension_numbers = #tpu.dot_dimension_numbers<[1], [0], [0], [1], [0, 0, 1, 1], [], []>} : vector<256x128xbf16>, vector<128x128xbf16>, vector<256x128xf32> -> vector<256x128xf32>
    %53 = arith.addf %49, %52 : vector<256x128xf32>
    %c0_60 = arith.constant 0 : index
    %c0_61 = arith.constant 0 : index
    %54 = vector.load %arg8[%c0_60, %c0_61] : memref<256x128xf32, #tpu.memory_space<vmem>>, vector<256x128xf32>
    tpu.vector_store %arg8[%c0_60, %c0_61], %53 {strides = array<i32>} : memref<256x128xf32, #tpu.memory_space<vmem>>, vector<256x128xf32>,
    %c37 = arith.constant 37 : index
    %c0_62 = arith.constant 0 : index
    %55 = vector.load %arg3[%c37, %c0_62] : memref<256x128xbf16, #tpu.memory_space<vmem>>, vector<219x128xbf16>
    %c0_63 = arith.constant 0 : index
    %c0_64 = arith.constant 0 : index
    %56 = vector.load %arg4[%c0_63, %c0_64] : memref<256x128xbf16, #tpu.memory_space<vmem>>, vector<37x128xbf16>
    %57 = tpu.concatenate %55, %56 in 0 : vector<219x128xbf16>, vector<37x128xbf16> -> vector<256x128xbf16>
    %c0_65 = arith.constant 0 : index
    %c0_66 = arith.constant 0 : index
    %58 = vector.load %arg8[%c0_65, %c0_66] : memref<256x128xf32, #tpu.memory_space<vmem>>, vector<256x128xf32>
    %c6 = arith.constant 6 : index
    %c0_67 = arith.constant 0 : index
    %c0_68 = arith.constant 0 : index
    %59 = vector.load %arg5[%c6, %c0_67, %c0_68] : memref<16x128x128xbf16, #tpu.memory_space<vmem>>, vector<1x128x128xbf16>
    %60 = vector.shape_cast %59 : vector<1x128x128xbf16> to vector<128x128xbf16>
    %cst_69 = arith.constant dense<0.000000e+00> : vector<256x128xf32>
    %61 = tpu.matmul %57, %60, %cst_69 {dimension_numbers = #tpu.dot_dimension_numbers<[1], [0], [0], [1], [0, 0, 1, 1], [], []>} : vector<256x128xbf16>, vector<128x128xbf16>, vector<256x128xf32> -> vector<256x128xf32>
    %62 = arith.addf %58, %61 : vector<256x128xf32>
    %c0_70 = arith.constant 0 : index
    %c0_71 = arith.constant 0 : index
    %63 = vector.load %arg8[%c0_70, %c0_71] : memref<256x128xf32, #tpu.memory_space<vmem>>, vector<256x128xf32>
    tpu.vector_store %arg8[%c0_70, %c0_71], %62 {strides = array<i32>} : memref<256x128xf32, #tpu.memory_space<vmem>>, vector<256x128xf32>,
    %c38 = arith.constant 38 : index
    %c0_72 = arith.constant 0 : index
    %64 = vector.load %arg3[%c38, %c0_72] : memref<256x128xbf16, #tpu.memory_space<vmem>>, vector<218x128xbf16>
    %c0_73 = arith.constant 0 : index
    %c0_74 = arith.constant 0 : index
    %65 = vector.load %arg4[%c0_73, %c0_74] : memref<256x128xbf16, #tpu.memory_space<vmem>>, vector<38x128xbf16>
    %66 = tpu.concatenate %64, %65 in 0 : vector<218x128xbf16>, vector<38x128xbf16> -> vector<256x128xbf16>
    %c0_75 = arith.constant 0 : index
    %c0_76 = arith.constant 0 : index
    %67 = vector.load %arg8[%c0_75, %c0_76] : memref<256x128xf32, #tpu.memory_space<vmem>>, vector<256x128xf32>
    %c7 = arith.constant 7 : index
    %c0_77 = arith.constant 0 : index
    %c0_78 = arith.constant 0 : index
    %68 = vector.load %arg5[%c7, %c0_77, %c0_78] : memref<16x128x128xbf16, #tpu.memory_space<vmem>>, vector<1x128x128xbf16>
    %69 = vector.shape_cast %68 : vector<1x128x128xbf16> to vector<128x128xbf16>
    %cst_79 = arith.constant dense<0.000000e+00> : vector<256x128xf32>
    %70 = tpu.matmul %66, %69, %cst_79 {dimension_numbers = #tpu.dot_dimension_numbers<[1], [0], [0], [1], [0, 0, 1, 1], [], []>} : vector<256x128xbf16>, vector<128x128xbf16>, vector<256x128xf32> -> vector<256x128xf32>
    %71 = arith.addf %67, %70 : vector<256x128xf32>
    %c0_80 = arith.constant 0 : index
    %c0_81 = arith.constant 0 : index
    %72 = vector.load %arg8[%c0_80, %c0_81] : memref<256x128xf32, #tpu.memory_space<vmem>>, vector<256x128xf32>
    tpu.vector_store %arg8[%c0_80, %c0_81], %71 {strides = array<i32>} : memref<256x128xf32, #tpu.memory_space<vmem>>, vector<256x128xf32>,
    %c70 = arith.constant 70 : index
    %c0_82 = arith.constant 0 : index
    %73 = vector.load %arg3[%c70, %c0_82] : memref<256x128xbf16, #tpu.memory_space<vmem>>, vector<186x128xbf16>
    %c0_83 = arith.constant 0 : index
    %c0_84 = arith.constant 0 : index
    %74 = vector.load %arg4[%c0_83, %c0_84] : memref<256x128xbf16, #tpu.memory_space<vmem>>, vector<70x128xbf16>
    %75 = tpu.concatenate %73, %74 in 0 : vector<186x128xbf16>, vector<70x128xbf16> -> vector<256x128xbf16>
    %c0_85 = arith.constant 0 : index
    %c0_86 = arith.constant 0 : index
    %76 = vector.load %arg8[%c0_85, %c0_86] : memref<256x128xf32, #tpu.memory_space<vmem>>, vector<256x128xf32>
    %c8 = arith.constant 8 : index
    %c0_87 = arith.constant 0 : index
    %c0_88 = arith.constant 0 : index
    %77 = vector.load %arg5[%c8, %c0_87, %c0_88] : memref<16x128x128xbf16, #tpu.memory_space<vmem>>, vector<1x128x128xbf16>
    %78 = vector.shape_cast %77 : vector<1x128x128xbf16> to vector<128x128xbf16>
    %cst_89 = arith.constant dense<0.000000e+00> : vector<256x128xf32>
    %79 = tpu.matmul %75, %78, %cst_89 {dimension_numbers = #tpu.dot_dimension_numbers<[1], [0], [0], [1], [0, 0, 1, 1], [], []>} : vector<256x128xbf16>, vector<128x128xbf16>, vector<256x128xf32> -> vector<256x128xf32>
    %80 = arith.addf %76, %79 : vector<256x128xf32>
    %c0_90 = arith.constant 0 : index
    %c0_91 = arith.constant 0 : index
    %81 = vector.load %arg8[%c0_90, %c0_91] : memref<256x128xf32, #tpu.memory_space<vmem>>, vector<256x128xf32>
    tpu.vector_store %arg8[%c0_90, %c0_91], %80 {strides = array<i32>} : memref<256x128xf32, #tpu.memory_space<vmem>>, vector<256x128xf32>,
    %c71 = arith.constant 71 : index
    %c0_92 = arith.constant 0 : index
    %82 = vector.load %arg3[%c71, %c0_92] : memref<256x128xbf16, #tpu.memory_space<vmem>>, vector<185x128xbf16>
    %c0_93 = arith.constant 0 : index
    %c0_94 = arith.constant 0 : index
    %83 = vector.load %arg4[%c0_93, %c0_94] : memref<256x128xbf16, #tpu.memory_space<vmem>>, vector<71x128xbf16>
    %84 = tpu.concatenate %82, %83 in 0 : vector<185x128xbf16>, vector<71x128xbf16> -> vector<256x128xbf16>
    %c0_95 = arith.constant 0 : index
    %c0_96 = arith.constant 0 : index
    %85 = vector.load %arg8[%c0_95, %c0_96] : memref<256x128xf32, #tpu.memory_space<vmem>>, vector<256x128xf32>
    %c9 = arith.constant 9 : index
    %c0_97 = arith.constant 0 : index
    %c0_98 = arith.constant 0 : index
    %86 = vector.load %arg5[%c9, %c0_97, %c0_98] : memref<16x128x128xbf16, #tpu.memory_space<vmem>>, vector<1x128x128xbf16>
    %87 = vector.shape_cast %86 : vector<1x128x128xbf16> to vector<128x128xbf16>
    %cst_99 = arith.constant dense<0.000000e+00> : vector<256x128xf32>
    %88 = tpu.matmul %84, %87, %cst_99 {dimension_numbers = #tpu.dot_dimension_numbers<[1], [0], [0], [1], [0, 0, 1, 1], [], []>} : vector<256x128xbf16>, vector<128x128xbf16>, vector<256x128xf32> -> vector<256x128xf32>
    %89 = arith.addf %85, %88 : vector<256x128xf32>
    %c0_100 = arith.constant 0 : index
    %c0_101 = arith.constant 0 : index
    %90 = vector.load %arg8[%c0_100, %c0_101] : memref<256x128xf32, #tpu.memory_space<vmem>>, vector<256x128xf32>
    tpu.vector_store %arg8[%c0_100, %c0_101], %89 {strides = array<i32>} : memref<256x128xf32, #tpu.memory_space<vmem>>, vector<256x128xf32>,
    %c72 = arith.constant 72 : index
    %c0_102 = arith.constant 0 : index
    %91 = vector.load %arg3[%c72, %c0_102] : memref<256x128xbf16, #tpu.memory_space<vmem>>, vector<184x128xbf16>
    %c0_103 = arith.constant 0 : index
    %c0_104 = arith.constant 0 : index
    %92 = vector.load %arg4[%c0_103, %c0_104] : memref<256x128xbf16, #tpu.memory_space<vmem>>, vector<72x128xbf16>
    %93 = tpu.concatenate %91, %92 in 0 : vector<184x128xbf16>, vector<72x128xbf16> -> vector<256x128xbf16>
    %c0_105 = arith.constant 0 : index
    %c0_106 = arith.constant 0 : index
    %94 = vector.load %arg8[%c0_105, %c0_106] : memref<256x128xf32, #tpu.memory_space<vmem>>, vector<256x128xf32>
    %c10 = arith.constant 10 : index
    %c0_107 = arith.constant 0 : index
    %c0_108 = arith.constant 0 : index
    %95 = vector.load %arg5[%c10, %c0_107, %c0_108] : memref<16x128x128xbf16, #tpu.memory_space<vmem>>, vector<1x128x128xbf16>
    %96 = vector.shape_cast %95 : vector<1x128x128xbf16> to vector<128x128xbf16>
    %cst_109 = arith.constant dense<0.000000e+00> : vector<256x128xf32>
    %97 = tpu.matmul %93, %96, %cst_109 {dimension_numbers = #tpu.dot_dimension_numbers<[1], [0], [0], [1], [0, 0, 1, 1], [], []>} : vector<256x128xbf16>, vector<128x128xbf16>, vector<256x128xf32> -> vector<256x128xf32>
    %98 = arith.addf %94, %97 : vector<256x128xf32>
    %c0_110 = arith.constant 0 : index
    %c0_111 = arith.constant 0 : index
    %99 = vector.load %arg8[%c0_110, %c0_111] : memref<256x128xf32, #tpu.memory_space<vmem>>, vector<256x128xf32>
    tpu.vector_store %arg8[%c0_110, %c0_111], %98 {strides = array<i32>} : memref<256x128xf32, #tpu.memory_space<vmem>>, vector<256x128xf32>,
    %c73 = arith.constant 73 : index
    %c0_112 = arith.constant 0 : index
    %100 = vector.load %arg3[%c73, %c0_112] : memref<256x128xbf16, #tpu.memory_space<vmem>>, vector<183x128xbf16>
    %c0_113 = arith.constant 0 : index
    %c0_114 = arith.constant 0 : index
    %101 = vector.load %arg4[%c0_113, %c0_114] : memref<256x128xbf16, #tpu.memory_space<vmem>>, vector<73x128xbf16>
    %102 = tpu.concatenate %100, %101 in 0 : vector<183x128xbf16>, vector<73x128xbf16> -> vector<256x128xbf16>
    %c0_115 = arith.constant 0 : index
    %c0_116 = arith.constant 0 : index
    %103 = vector.load %arg8[%c0_115, %c0_116] : memref<256x128xf32, #tpu.memory_space<vmem>>, vector<256x128xf32>
    %c11 = arith.constant 11 : index
    %c0_117 = arith.constant 0 : index
    %c0_118 = arith.constant 0 : index
    %104 = vector.load %arg5[%c11, %c0_117, %c0_118] : memref<16x128x128xbf16, #tpu.memory_space<vmem>>, vector<1x128x128xbf16>
    %105 = vector.shape_cast %104 : vector<1x128x128xbf16> to vector<128x128xbf16>
    %cst_119 = arith.constant dense<0.000000e+00> : vector<256x128xf32>
    %106 = tpu.matmul %102, %105, %cst_119 {dimension_numbers = #tpu.dot_dimension_numbers<[1], [0], [0], [1], [0, 0, 1, 1], [], []>} : vector<256x128xbf16>, vector<128x128xbf16>, vector<256x128xf32> -> vector<256x128xf32>
    %107 = arith.addf %103, %106 : vector<256x128xf32>
    %c0_120 = arith.constant 0 : index
    %c0_121 = arith.constant 0 : index
    %108 = vector.load %arg8[%c0_120, %c0_121] : memref<256x128xf32, #tpu.memory_space<vmem>>, vector<256x128xf32>
    tpu.vector_store %arg8[%c0_120, %c0_121], %107 {strides = array<i32>} : memref<256x128xf32, #tpu.memory_space<vmem>>, vector<256x128xf32>,
    %c105 = arith.constant 105 : index
    %c0_122 = arith.constant 0 : index
    %109 = vector.load %arg3[%c105, %c0_122] : memref<256x128xbf16, #tpu.memory_space<vmem>>, vector<151x128xbf16>
    %c0_123 = arith.constant 0 : index
    %c0_124 = arith.constant 0 : index
    %110 = vector.load %arg4[%c0_123, %c0_124] : memref<256x128xbf16, #tpu.memory_space<vmem>>, vector<105x128xbf16>
    %111 = tpu.concatenate %109, %110 in 0 : vector<151x128xbf16>, vector<105x128xbf16> -> vector<256x128xbf16>
    %c0_125 = arith.constant 0 : index
    %c0_126 = arith.constant 0 : index
    %112 = vector.load %arg8[%c0_125, %c0_126] : memref<256x128xf32, #tpu.memory_space<vmem>>, vector<256x128xf32>
    %c12 = arith.constant 12 : index
    %c0_127 = arith.constant 0 : index
    %c0_128 = arith.constant 0 : index
    %113 = vector.load %arg5[%c12, %c0_127, %c0_128] : memref<16x128x128xbf16, #tpu.memory_space<vmem>>, vector<1x128x128xbf16>
    %114 = vector.shape_cast %113 : vector<1x128x128xbf16> to vector<128x128xbf16>
    %cst_129 = arith.constant dense<0.000000e+00> : vector<256x128xf32>
    %115 = tpu.matmul %111, %114, %cst_129 {dimension_numbers = #tpu.dot_dimension_numbers<[1], [0], [0], [1], [0, 0, 1, 1], [], []>} : vector<256x128xbf16>, vector<128x128xbf16>, vector<256x128xf32> -> vector<256x128xf32>
    %116 = arith.addf %112, %115 : vector<256x128xf32>
    %c0_130 = arith.constant 0 : index
    %c0_131 = arith.constant 0 : index
    %117 = vector.load %arg8[%c0_130, %c0_131] : memref<256x128xf32, #tpu.memory_space<vmem>>, vector<256x128xf32>
    tpu.vector_store %arg8[%c0_130, %c0_131], %116 {strides = array<i32>} : memref<256x128xf32, #tpu.memory_space<vmem>>, vector<256x128xf32>,
    %c106 = arith.constant 106 : index
    %c0_132 = arith.constant 0 : index
    %118 = vector.load %arg3[%c106, %c0_132] : memref<256x128xbf16, #tpu.memory_space<vmem>>, vector<150x128xbf16>
    %c0_133 = arith.constant 0 : index
    %c0_134 = arith.constant 0 : index
    %119 = vector.load %arg4[%c0_133, %c0_134] : memref<256x128xbf16, #tpu.memory_space<vmem>>, vector<106x128xbf16>
    %120 = tpu.concatenate %118, %119 in 0 : vector<150x128xbf16>, vector<106x128xbf16> -> vector<256x128xbf16>
    %c0_135 = arith.constant 0 : index
    %c0_136 = arith.constant 0 : index
    %121 = vector.load %arg8[%c0_135, %c0_136] : memref<256x128xf32, #tpu.memory_space<vmem>>, vector<256x128xf32>
    %c13 = arith.constant 13 : index
    %c0_137 = arith.constant 0 : index
    %c0_138 = arith.constant 0 : index
    %122 = vector.load %arg5[%c13, %c0_137, %c0_138] : memref<16x128x128xbf16, #tpu.memory_space<vmem>>, vector<1x128x128xbf16>
    %123 = vector.shape_cast %122 : vector<1x128x128xbf16> to vector<128x128xbf16>
    %cst_139 = arith.constant dense<0.000000e+00> : vector<256x128xf32>
    %124 = tpu.matmul %120, %123, %cst_139 {dimension_numbers = #tpu.dot_dimension_numbers<[1], [0], [0], [1], [0, 0, 1, 1], [], []>} : vector<256x128xbf16>, vector<128x128xbf16>, vector<256x128xf32> -> vector<256x128xf32>
    %125 = arith.addf %121, %124 : vector<256x128xf32>
    %c0_140 = arith.constant 0 : index
    %c0_141 = arith.constant 0 : index
    %126 = vector.load %arg8[%c0_140, %c0_141] : memref<256x128xf32, #tpu.memory_space<vmem>>, vector<256x128xf32>
    tpu.vector_store %arg8[%c0_140, %c0_141], %125 {strides = array<i32>} : memref<256x128xf32, #tpu.memory_space<vmem>>, vector<256x128xf32>,
    %c107 = arith.constant 107 : index
    %c0_142 = arith.constant 0 : index
    %127 = vector.load %arg3[%c107, %c0_142] : memref<256x128xbf16, #tpu.memory_space<vmem>>, vector<149x128xbf16>
    %c0_143 = arith.constant 0 : index
    %c0_144 = arith.constant 0 : index
    %128 = vector.load %arg4[%c0_143, %c0_144] : memref<256x128xbf16, #tpu.memory_space<vmem>>, vector<107x128xbf16>
    %129 = tpu.concatenate %127, %128 in 0 : vector<149x128xbf16>, vector<107x128xbf16> -> vector<256x128xbf16>
    %c0_145 = arith.constant 0 : index
    %c0_146 = arith.constant 0 : index
    %130 = vector.load %arg8[%c0_145, %c0_146] : memref<256x128xf32, #tpu.memory_space<vmem>>, vector<256x128xf32>
    %c14 = arith.constant 14 : index
    %c0_147 = arith.constant 0 : index
    %c0_148 = arith.constant 0 : index
    %131 = vector.load %arg5[%c14, %c0_147, %c0_148] : memref<16x128x128xbf16, #tpu.memory_space<vmem>>, vector<1x128x128xbf16>
    %132 = vector.shape_cast %131 : vector<1x128x128xbf16> to vector<128x128xbf16>
    %cst_149 = arith.constant dense<0.000000e+00> : vector<256x128xf32>
    %133 = tpu.matmul %129, %132, %cst_149 {dimension_numbers = #tpu.dot_dimension_numbers<[1], [0], [0], [1], [0, 0, 1, 1], [], []>} : vector<256x128xbf16>, vector<128x128xbf16>, vector<256x128xf32> -> vector<256x128xf32>
    %134 = arith.addf %130, %133 : vector<256x128xf32>
    %c0_150 = arith.constant 0 : index
    %c0_151 = arith.constant 0 : index
    %135 = vector.load %arg8[%c0_150, %c0_151] : memref<256x128xf32, #tpu.memory_space<vmem>>, vector<256x128xf32>
    tpu.vector_store %arg8[%c0_150, %c0_151], %134 {strides = array<i32>} : memref<256x128xf32, #tpu.memory_space<vmem>>, vector<256x128xf32>,
    %c108 = arith.constant 108 : index
    %c0_152 = arith.constant 0 : index
    %136 = vector.load %arg3[%c108, %c0_152] : memref<256x128xbf16, #tpu.memory_space<vmem>>, vector<148x128xbf16>
    %c0_153 = arith.constant 0 : index
    %c0_154 = arith.constant 0 : index
    %137 = vector.load %arg4[%c0_153, %c0_154] : memref<256x128xbf16, #tpu.memory_space<vmem>>, vector<108x128xbf16>
    %138 = tpu.concatenate %136, %137 in 0 : vector<148x128xbf16>, vector<108x128xbf16> -> vector<256x128xbf16>
    %c0_155 = arith.constant 0 : index
    %c0_156 = arith.constant 0 : index
    %139 = vector.load %arg8[%c0_155, %c0_156] : memref<256x128xf32, #tpu.memory_space<vmem>>, vector<256x128xf32>
    %c15 = arith.constant 15 : index
    %c0_157 = arith.constant 0 : index
    %c0_158 = arith.constant 0 : index
    %140 = vector.load %arg5[%c15, %c0_157, %c0_158] : memref<16x128x128xbf16, #tpu.memory_space<vmem>>, vector<1x128x128xbf16>
    %141 = vector.shape_cast %140 : vector<1x128x128xbf16> to vector<128x128xbf16>
    %cst_159 = arith.constant dense<0.000000e+00> : vector<256x128xf32>
    %142 = tpu.matmul %138, %141, %cst_159 {dimension_numbers = #tpu.dot_dimension_numbers<[1], [0], [0], [1], [0, 0, 1, 1], [], []>} : vector<256x128xbf16>, vector<128x128xbf16>, vector<256x128xf32> -> vector<256x128xf32>
    %143 = arith.addf %139, %142 : vector<256x128xf32>
    %c0_160 = arith.constant 0 : index
    %c0_161 = arith.constant 0 : index
    %144 = vector.load %arg8[%c0_160, %c0_161] : memref<256x128xf32, #tpu.memory_space<vmem>>, vector<256x128xf32>
    tpu.vector_store %arg8[%c0_160, %c0_161], %143 {strides = array<i32>} : memref<256x128xf32, #tpu.memory_space<vmem>>, vector<256x128xf32>,
    %c0_i32_162 = arith.constant 0 : i32
    %145 = arith.cmpi eq, %arg2, %c0_i32_162 : i32
    %146 = arith.extui %145 : i1 to i32
    %c0_i32_163 = arith.constant 0 : i32
    %147 = arith.cmpi ne, %146, %c0_i32_163 : i32
    scf.if %147 {
      %c0_164 = arith.constant 0 : index
      %c0_165 = arith.constant 0 : index
      %148 = vector.load %arg8[%c0_164, %c0_165] : memref<256x128xf32, #tpu.memory_space<vmem>>, vector<256x128xf32>
      %c0_166 = arith.constant 0 : index
      %c0_167 = arith.constant 0 : index
      %149 = vector.load %arg6[%c0_166, %c0_167] : memref<1x128xf32, #tpu.memory_space<vmem>>, vector<1x128xf32>
      %150 = vector.broadcast %149 : vector<1x128xf32> to vector<256x128xf32>
      %151 = arith.addf %148, %150 : vector<256x128xf32>
      %cst_168 = arith.constant 0.000000e+00 : f32
      %152 = vector.broadcast %cst_168 : f32 to vector<256x128xf32>
      %153 = arith.maximumf %151, %152 : vector<256x128xf32>
      %154 = arith.truncf %153 : vector<256x128xf32> to vector<256x128xbf16>
      %c0_169 = arith.constant 0 : index
      %c0_170 = arith.constant 0 : index
      %155 = vector.load %arg7[%c0_169, %c0_170] : memref<256x128xbf16, #tpu.memory_space<vmem>>, vector<256x128xbf16>
      tpu.vector_store %arg7[%c0_169, %c0_170], %154 {strides = array<i32>} : memref<256x128xbf16, #tpu.memory_space<vmem>>, vector<256x128xbf16>,
    } else {
    }
    return
  }
  func.func @transform_0(%arg0: i32, %arg1: i32, %arg2: i32) -> (i32, i32) {
    %c0_i32 = arith.constant 0 : i32
    return %arg0, %arg2 : i32, i32
  }
  func.func @transform_1(%arg0: i32, %arg1: i32, %arg2: i32) -> (i32, i32) {
    %c1_i32 = arith.constant 1 : i32
    %0 = arith.addi %arg0, %c1_i32 : i32
    %c0_i32 = arith.constant 0 : i32
    return %0, %arg2 : i32, i32
  }
  func.func @transform_2(%arg0: i32, %arg1: i32, %arg2: i32) -> (i32, i32, i32) {
    %c0_i32 = arith.constant 0 : i32
    %c0_i32_0 = arith.constant 0 : i32
    return %c0_i32, %arg2, %arg1 : i32, i32, i32
  }
  func.func @transform_3(%arg0: i32, %arg1: i32, %arg2: i32) -> (i32, i32) {
    %c0_i32 = arith.constant 0 : i32
    %c0_i32_0 = arith.constant 0 : i32
    return %c0_i32, %arg1 : i32, i32
  }
  func.func @transform_4(%arg0: i32, %arg1: i32, %arg2: i32) -> (i32, i32) {
    %c0_i32 = arith.constant 0 : i32
    return %arg0, %arg1 : i32, i32
  }
}

</mosaic_0001>

<bundles_post_ra>
// kernel: conv2d.1
= control target key start
LH: loop header
LB: loop body
LE: loop exit
PB: predicated region body
PF: predicated region fallthrough
CT: control target
= control target key end

     0   :  { %s10520_s15 = smov 0   ;;  %s10522_s16 = smov 0   ;;  %s12119_s0 = inlined_call_operand.vmem [shape: bf16[2816,128], index: 0, kind: input, shape index: {}, may-alias: {0,1}]   ;;  %s12120_s1 = inlined_call_operand.vmem [shape: bf16[2816,128], index: 1, kind: input, shape index: {}, may-alias: {0,1}]   ;;  %s12121_s2 = inlined_call_operand.vmem [shape: bf16[16,128,128], index: 2, kind: input, shape index: {}]   ;;  %s12122_s3 = inlined_call_operand.vmem [shape: f32[1,128], index: 3, kind: input, shape index: {}]   ;;  %s12123_s4 = inlined_call_operand.vmem [shape: bf16[2560,128], index: 4, kind: output, shape index: {}]  }
   0x1   :  { %s10524_s17 = smov 0  }
   0x2 LB: > { %s33_s18 = sadd.s32 1, %s10489_s16  ;;  %p8185_p0 = scmp.ge.s32.totalorder %s10493_s17, 1  ;;  %s10493_s17 = sphi %s10524_s17, %s14_s17   ;;  %s10489_s16 = sphi %s10522_s16, %s12139_s16   ;;  %s10485_s15 = sphi %s10520_s15, %s12138_s15  }
   0x3   : > { %p35_p1 = scmp.ge.s32.totalorder %s33_s18, 10  ;;  %p233_p2 = scmp.lt.s32.totalorder %s10493_s17, 11 }
   0x5   : > { %s12141_s18 = smov (%p35_p1, %s33_s18), 0  ;;  %p234_p3 = pnand %p8185_p0, %p233_p2 }
   0x7   : > { %237 = sbr.rel (%p234_p3) target bundleno = 1205 (0x4b5), region = 36 }
   0xc   : > { %v9991_v0 = vld [vmem:[%s12121_s2 + $0x38] sm:$0xff]  ;;  %s10547_s25 = sshll.u32 %s10485_s15, 5  ;;  %v9990_v4 = vld [vmem:[%s12121_s2 + $0x30] sm:$0xff]  ;;  %v9989_v8 = vld [vmem:[%s12121_s2 + $0x28] sm:$0xff]  ;;  %vm852_vm0 = vsmask.f32 7424 }
   0xd   : > { %v10015_v1 = vld [vmem:[%s12121_s2 + $0x78] sm:$0xff]  ;;  %p286_p4 = scmp.lt.s32.totalorder %s10547_s25, 351  ;;  %586 = vmatpush.bf16.msra.mxu0 %v9991_v0  ;;  %v10014_v5 = vld [vmem:[%s12121_s2 + $0x70] sm:$0xff]  ;;  %v10013_v9 = vld [vmem:[%s12121_s2 + $0x68] sm:$0xff]  ;;  %vm1370_vm1 = vcmask 1046528   ;;  %s9967_s22 = sadd.s32 32, %s10547_s25 }
   0xe   : > { %v10039_v2 = vld [vmem:[%s12121_s2 + $0xb8] sm:$0xff]  ;;  %1104 = vmatpush.bf16.msra.mxu1 %v10015_v1  ;;  %v10038_v6 = vld [vmem:[%s12121_s2 + $0xb0] sm:$0xff]  ;;  %v10037_v10 = vld [vmem:[%s12121_s2 + $0xa8] sm:$0xff]  ;;  %vm1789_vm2 = vsmask.f32 6400  ;;  %p296_p5 = scmp.lt.s32.totalorder %s9967_s22, 351 }
   0xf   : > { %v10063_v3 = vld [vmem:[%s12121_s2 + $0xf8] sm:$0xff]  ;;  %1523 = vmatpush.bf16.msra.mxu2 %v10039_v2  ;;  %v10062_v7 = vld [vmem:[%s12121_s2 + $0xf0] sm:$0xff]  ;;  %s287_s10 = scalar_select %p286_p4, %s10547_s25, 351  ;;  %v10061_v11 = vld [vmem:[%s12121_s2 + $0xe8] sm:$0xff]  ;;  %vm1004_vm3 = vcmask 1047552   ;;  %vm2851_vm6 = vcmask 1045504  }
  0x10   : > { %2060 = vmatpush.bf16.msra.mxu3 %v10063_v3  ;;  %v9988_v12 = vld [vmem:[%s12121_s2 + $0x20] sm:$0xff]  ;;  %v9987_v18 = vld [vmem:[%s12121_s2 + $0x18] sm:$0xff]  ;;  %v9986_v25 = vld [vmem:[%s12121_s2 + $0x10] sm:$0xff]  ;;  %s12143_s22 = smov (!%p296_p5, %s9967_s22), 351  ;;  %vm3270_vm7 = vsmask.f32 5376 }
  0x11   : > { %587 = vmatpush.bf16.msra.mxu0 %v9990_v4  ;;  %s8187_s15 = sshll.u32 %s287_s10, 2  ;;  %v10012_v13 = vld [vmem:[%s12121_s2 + $0x60] sm:$0xff]  ;;  %v10011_v19 = vld [vmem:[%s12121_s2 + $0x58] sm:$0xff]  ;;  %v10010_v26 = vld [vmem:[%s12121_s2 + $0x50] sm:$0xff]  ;;  %s8189_s27 = sshll.u32 %s12143_s22, 2  ;;  %vm3807_vm8 = vcmask 1044480  }
  0x12   : > { %1105 = vmatpush.bf16.msra.mxu1 %v10014_v5  ;;  %s10581_s26 = scalar_lea.vmem %s12119_s0, %s8187_s15  ;;  %v10036_v14 = vld [vmem:[%s12121_s2 + $0xa0] sm:$0xff]  ;;  %v10035_v21 = vld [vmem:[%s12121_s2 + $0x98] sm:$0xff]  ;;  %v10034_v27 = vld [vmem:[%s12121_s2 + $0x90] sm:$0xff]  ;;  %s10886_s30 = scalar_lea.vmem %s12120_s1, %s8189_s27  ;;  %vm4633_vm10 = vsmask.f32 4352  ;;  %vm5205_vm11 = vcmask 1043456  }
  0x13   : > { %1524 = vmatpush.bf16.msra.mxu2 %v10038_v6  ;;  %v10060_v15 = vld [vmem:[%s12121_s2 + $0xe0] sm:$0xff]  ;;  %v10059_v22 = vld [vmem:[%s12121_s2 + $0xd8] sm:$0xff]  ;;  %v10041_v23 = vld [vmem:[%s10581_s26 + $0x8] sm:$0xff]  ;;  %vm5683_vm12 = vsmask.f32 3328  ;;  %vm6655_vm15 = vcmask 1042432  }
  0x14   : > { %2061 = vmatpush.bf16.msra.mxu3 %v10062_v7  ;;  %v8514_v16 = vld [vmem:[%s10581_s26] sm:$0xe]  ;;  %v10040_v17 = vld [vmem:[%s10581_s26] sm:$0xf0]  ;;  %v10058_v28 = vld [vmem:[%s12121_s2 + $0xd0] sm:$0xff]  ;;  %v1799_v35 = vshrl.u32 %v10041_v23, 16 }
  0x15   : > { %588 = vmatpush.bf16.msra.mxu0 %v9989_v8  ;;  %v9992_v20 = vld [vmem:[%s10581_s26] sm:$0xff]  ;;  %v8515_v24 = vor.u32 %v10040_v17, %v8514_v16  ;;  %v10624_v29 = vld [vmem:[%s10581_s26 + $0x8] sm:$0xff]  ;;  %v1802_v36 = vshll.u32 %v10041_v23, 16  ;;  %v10135_v60 = vld [vmem:[%s12121_s2 + $0x1b8] sm:$0xff]  ;;  %p318_p6 = scmp.lt.s32.totalorder %s10547_s25, 319 }
  0x16   : > { %1106 = vmatpush.bf16.msra.mxu1 %v10013_v9  ;;  %v856_v30 = vshll.u32 %v9992_v20, 16  ;;  %v8402_v31 = vld [vmem:[%s10581_s26] sm:$0xe]  ;;  %v10016_v32 = vld [vmem:[%s10581_s26] sm:$0xf0]  ;;  %v9985_v37 = vld [vmem:[%s12121_s2 + $0x8] sm:$0xff] }
  0x17   : > { %1525 = vmatpush.bf16.msra.mxu2 %v10037_v10  ;;  %v1791_v33 = vshrl.u32 %v8515_v24, 16  ;;  %v1794_v34 = vshll.u32 %v8515_v24, 16  ;;  %v10009_v38 = vld [vmem:[%s12121_s2 + $0x48] sm:$0xff]  ;;  %v854_v40 = vshrl.u32 %v9992_v20, 16  ;;  %v861_v42 = vshll.u32 %v10624_v29, 16  ;;  %v9984_v50 = vld [vmem:[%s12121_s2] sm:$0xff]  ;;  %vm10928_vm4 = vmand %vm1004_vm3, %vm852_vm0 }
  0x18   : > { %2062 = vmatpush.bf16.msra.mxu3 %v10061_v11  ;;  %v10033_v39 = vld [vmem:[%s12121_s2 + $0x88] sm:$0xff]  ;;  %v858_v41 = vrot.slane %v856_v30, 1  ;;  %v8403_v43 = vor.u32 %v10016_v32, %v8402_v31  ;;  %v1801_v48 = vrot.slane %v1799_v35, 1  ;;  %v1804_v49 = vrot.slane %v1802_v36, 2  ;;  %v10008_v51 = vld [vmem:[%s12121_s2 + $0x40] sm:$0xff]  ;;  %v10087_v61 = vld [vmem:[%s12121_s2 + $0x138] sm:$0xff] }
  0x19   : > { %589 = vmatpush.bf16.msra.mxu0 %v9988_v12  ;;  %v10057_v44 = vld [vmem:[%s12121_s2 + $0xc8] sm:$0xff]  ;;  %v1793_v46 = vrot.slane %v1791_v33, 1  ;;  %v1796_v47 = vrot.slane %v1794_v34, 2  ;;  %v863_v53 = vrot.slane %v861_v42, 1  ;;  %v10032_v54 = vld [vmem:[%s12121_s2 + $0x80] sm:$0xff]  ;;  %v10159_v2 = vld [vmem:[%s12121_s2 + $0x1f8] sm:$0xff] }
  0x1a   : > { %1107 = vmatpush.bf16.msra.mxu1 %v10012_v13  ;;  %v10642_v45 = vld [vmem:[%s10581_s26 + $0x8] sm:$0xff]  ;;  %v859_v52 = vor.u32 %v858_v41, %v854_v40  ;;  %v10056_v55 = vld [vmem:[%s12121_s2 + $0xc0] sm:$0xff]  ;;  %v1371_v56 = vrot.slane %v8403_v43, 1  ;;  %v1805_v59 = vor.u32 %v1804_v49, %v1801_v48  ;;  %v10111_v3 = vld [vmem:[%s12121_s2 + $0x178] sm:$0xff]  ;;  %v865_v12 = vshrl.u32 %v10624_v29, 16  ;;  %s12145_s25 = smov (!%p318_p6, %s10547_s25), 319 }
  0x1b   : > { %1526 = vmatpush.bf16.msra.mxu2 %v10036_v14  ;;  %v1372_v57 = vrot.slane %v10642_v45, 1  ;;  %v1797_v58 = vor.u32 %v1796_v47, %v1793_v46  ;;  %v9968_v62 = vld [vmem:[%s10581_s26] sm:$0xff]  ;;  %v10042_v4 = vld [vmem:[%s10581_s26 + $0x10] sm:$0xff]  ;;  %v10019_v31 = vld [vmem:[%s10581_s26 + $0x18] sm:$0xff]  ;;  %s8191_s14 = sshll.u32 %s12145_s25, 2 }
  0x1c   : > { %2063 = vmatpush.bf16.msra.mxu3 %v10060_v15  ;;  %v864_v63 = vsel %vm852_vm0, %v859_v52, %v863_v53  ;;  %v9994_v5 = vld [vmem:[%s10581_s26 + $0x10] sm:$0xff]  ;;  %v1808_v8 = vshrl.u32 %v10042_v4, 16  ;;  %v1811_v9 = vshll.u32 %v10042_v4, 16  ;;  %v867_v17 = vor.u32 %v865_v12, %v863_v53  ;;  %v10044_v42 = vld [vmem:[%s10581_s26 + $0x20] sm:$0xff]  ;;  %v10085_v45 = vld [vmem:[%s12121_s2 + $0x128] sm:$0xff]  ;;  %s11915_s20 = scalar_lea.vmem %s12123_s4, %s8191_s14 }
  0x1d   : > { %590 = vmatpush.bf16.msra.mxu0 %v9987_v18  ;;  %v1373_v0 = vsel %vm1370_vm1, %v1371_v56, %v1372_v57  ;;  %v1806_v1 = vsel %vm1789_vm2, %v1797_v58, %v1805_v59  ;;  %v10134_v6 = vld [vmem:[%s12121_s2 + $0x1b0] sm:$0xff]  ;;  %v869_v13 = vshll.u32 %v9994_v5, 16  ;;  %v873_v29 = vshrl.u32 %v9994_v5, 16  ;;  %v9996_v43 = vld [vmem:[%s10581_s26 + $0x20] sm:$0xff]  ;;  %v10157_v46 = vld [vmem:[%s12121_s2 + $0x1e8] sm:$0xff] }
  0x1e   : > { %1108 = vmatpush.bf16.msra.mxu1 %v10011_v19  ;;  %v10086_v7 = vld [vmem:[%s12121_s2 + $0x130] sm:$0xff]  ;;  %v1810_v15 = vrot.slane %v1808_v8, 1  ;;  %v1813_v16 = vrot.slane %v1811_v9, 2  ;;  %v1376_v36 = vrot.slane %v10019_v31, 1  ;;  %v1826_v47 = vshrl.u32 %v10044_v42, 16  ;;  %v10109_v49 = vld [vmem:[%s12121_s2 + $0x168] sm:$0xff]  ;;  %vm10936_vm5 = vmand %vm1370_vm1, %vm1789_vm2 }
  0x1f   : > { %1527 = vmatpush.bf16.msra.mxu2 %v10035_v21  ;;  %v10158_v10 = vld [vmem:[%s12121_s2 + $0x1f0] sm:$0xff]  ;;  %v871_v18 = vrot.slane %v869_v13, 1  ;;  %v9969_v21 = vld [vmem:[%s10581_s26 + $0x8] sm:$0xff]  ;;  %v1829_v48 = vshll.u32 %v10044_v42, 16  ;;  %v10020_v52 = vld [vmem:[%s10581_s26 + $0x20] sm:$0xff] }
  0x20   : > { %2064 = vmatpush.bf16.msra.mxu3 %v10059_v22  ;;  %v10110_v11 = vld [vmem:[%s12121_s2 + $0x170] sm:$0xff]  ;;  %v1814_v20 = vor.u32 %v1813_v16, %v1810_v15  ;;  %v1828_v53 = vrot.slane %v1826_v47, 1  ;;  %v10021_v5 = vld [vmem:[%s10581_s26 + $0x28] sm:$0xff]  ;;  %v9972_v12 = vld [vmem:[%s10581_s26 + $0x20] sm:$0xff] }
  0x21   : > { %591 = vmatpush.bf16.msra.mxu0 %v9986_v25  ;;  %v10018_v14 = vld [vmem:[%s10581_s26 + $0x10] sm:$0xff]  ;;  %v872_v22 = vsel %vm852_vm0, %v867_v17, %v871_v18  ;;  %v10043_v25 = vld [vmem:[%s10581_s26 + $0x18] sm:$0xff]  ;;  %v875_v34 = vor.u32 %v873_v29, %v871_v18  ;;  %v10132_v18 = vld [vmem:[%s12121_s2 + $0x1a0] sm:$0xff] }
  0x22   : > { %1109 = vmatpush.bf16.msra.mxu1 %v10010_v26  ;;  %v1374_v19 = vrot.slane %v10018_v14, 1  ;;  %v1815_v24 = vsel %vm1789_vm2, %v1805_v59, %v1814_v20  ;;  %v9995_v26 = vld [vmem:[%s10581_s26 + $0x18] sm:$0xff]  ;;  %v10046_v16 = vld [vmem:[%s10581_s26 + $0x30] sm:$0xff]  ;;  %vm11267_vm9 = vmand %vm2851_vm6, %vm3270_vm7 }
  0x23   : > { %1528 = vmatpush.bf16.msra.mxu2 %v10034_v27  ;;  %v1817_v27 = vshrl.u32 %v10043_v25, 16  ;;  %v877_v30 = vshll.u32 %v9995_v26, 16  ;;  %v9971_v59 = vld [vmem:[%s10581_s26 + $0x18] sm:$0xff]  ;;  %v9998_v17 = vld [vmem:[%s10581_s26 + $0x30] sm:$0xff]  ;;  %vm11608_vm13 = vmand %vm3807_vm8, %vm4633_vm10 }
  0x24   : > { %2065 = vmatpush.bf16.msra.mxu3 %v10058_v28  ;;  %v1375_v23 = vsel %vm1370_vm1, %v1372_v57, %v1374_v19  ;;  %v1820_v28 = vshll.u32 %v10043_v25, 16  ;;  %v1377_v40 = vsel %vm1370_vm1, %v1374_v19, %v1376_v36  ;;  %v1378_v57 = vrot.slane %v10020_v52, 1  ;;  %v10084_v19 = vld [vmem:[%s12121_s2 + $0x120] sm:$0xff]  ;;  %vm11614_vm14 = vmand %vm5205_vm11, %vm5683_vm12 }
  0x25   : > { %592 = vmatpush.bf16.msra.mxu0 %v9985_v37  ;;  %v1819_v32 = vrot.slane %v1817_v27, 1  ;;  %v879_v35 = vrot.slane %v877_v30, 1  ;;  %v901_v25 = vshll.u32 %v9998_v17, 16 }
  0x26   : > { %1110 = vmatpush.bf16.msra.mxu1 %v10009_v38  ;;  %v1822_v33 = vrot.slane %v1820_v28, 2  ;;  %v9970_v38 = vld [vmem:[%s10581_s26 + $0x10] sm:$0xff] }
  0x27   : > { %1529 = vmatpush.bf16.msra.mxu2 %v10033_v39  ;;  %v880_v39 = vsel %vm852_vm0, %v875_v34, %v879_v35  ;;  %v903_v30 = vrot.slane %v901_v25, 1 }
  0x28   : > { %2066 = vmatpush.bf16.msra.mxu3 %v10057_v44  ;;  %v1823_v37 = vor.u32 %v1822_v33, %v1819_v32  ;;  %v10133_v44 = vld [vmem:[%s12121_s2 + $0x1a8] sm:$0xff] }
  0x29   : > { %593 = vmatpush.bf16.msra.mxu0 %v9984_v50  ;;  %v881_v50 = vshrl.u32 %v9995_v26, 16  ;;  %v10022_v26 = vld [vmem:[%s10581_s26 + $0x30] sm:$0xff]  ;;  %v9973_v33 = vld [vmem:[%s10581_s26 + $0x28] sm:$0xff] }
  0x2a   : > { %1111 = vmatpush.bf16.msra.mxu1 %v10008_v51  ;;  %v1824_v41 = vsel %vm1789_vm2, %v1814_v20, %v1823_v37  ;;  %v885_v51 = vshll.u32 %v9996_v43, 16  ;;  %v10156_v20 = vld [vmem:[%s12121_s2 + $0x1e0] sm:$0xff]  ;;  %v1382_v31 = vrot.slane %v10022_v26, 1 }
  0x2b   : > { %1530 = vmatpush.bf16.msra.mxu2 %v10032_v54  ;;  %v1831_v54 = vrot.slane %v1829_v48, 2 }
  0x2c   : > { %2067 = vmatpush.bf16.msra.mxu3 %v10056_v55  ;;  %594 = vmatmul.bf16.vlgmr.msra.gmra.mxu0 %v9968_v62  ;;  %v883_v55 = vor.u32 %v881_v50, %v879_v35  ;;  %v887_v56 = vrot.slane %v885_v51, 1  ;;  %v9974_v50 = vld [vmem:[%s10581_s26 + $0x30] sm:$0xff] }
  0x2d   : > { %2595 = vmatpush.bf16.msrb.mxu0 %v10087_v61  ;;  %1112 = vmatmul.bf16.vlgmr.msra.gmra.mxu1 %v864_v63  ;;  %v1832_v58 = vor.u32 %v1831_v54, %v1828_v53  ;;  %v1379_v61 = vsel %vm1370_vm1, %v1376_v36, %v1378_v57  ;;  %v10045_v63 = vld [vmem:[%s10581_s26 + $0x28] sm:$0xff]  ;;  %v10048_v54 = vld [vmem:[%s10581_s26 + $0x40] sm:$0xff] }
  0x2e   : > { %1531 = vmatmul.bf16.vlgmr.msra.gmra.mxu2 %v1373_v0  ;;  %3014 = vmatpush.bf16.msrb.mxu1 %v10111_v3  ;;  %v9997_v0 = vld [vmem:[%s10581_s26 + $0x28] sm:$0xff]  ;;  %v889_v3 = vshrl.u32 %v9996_v43, 16  ;;  %v10023_v43 = vld [vmem:[%s10581_s26 + $0x38] sm:$0xff] }
  0x2f   : > { %3551 = vmatpush.bf16.msrb.mxu2 %v10135_v60  ;;  %2068 = vmatmul.bf16.vlgmr.msra.gmra.mxu3 %v1806_v1  ;;  %v888_v60 = vsel %vm852_vm0, %v883_v55, %v887_v56  ;;  %v1833_v62 = vsel %vm1789_vm2, %v1823_v37, %v1832_v58  ;;  %v1835_v1 = vshrl.u32 %v10045_v63, 16  ;;  %v893_v4 = vshll.u32 %v9997_v0, 16  ;;  %v10047_v37 = vld [vmem:[%s10581_s26 + $0x38] sm:$0xff]  ;;  %v10000_v55 = vld [vmem:[%s10581_s26 + $0x40] sm:$0xff] }
  0x30   : > { %3970 = vmatpush.bf16.msrb.mxu3 %v10159_v2  ;;  %v1838_v2 = vshll.u32 %v10045_v63, 16  ;;  %v891_v8 = vor.u32 %v889_v3, %v887_v56  ;;  %v1384_v48 = vrot.slane %v10023_v43, 1  ;;  %v10131_v56 = vld [vmem:[%s12121_s2 + $0x198] sm:$0xff]  ;;  %v10024_v63 = vld [vmem:[%s10581_s26 + $0x40] sm:$0xff] }
  0x31   : > { %2596 = vmatpush.bf16.msrb.mxu0 %v10086_v7  ;;  %v895_v9 = vrot.slane %v893_v4, 1 }
  0x32   : > { %3015 = vmatpush.bf16.msrb.mxu1 %v10110_v11  ;;  %v1840_v7 = vrot.slane %v1838_v2, 2  ;;  %v1385_v52 = vsel %vm1370_vm1, %v1382_v31, %v1384_v48  ;;  %v10107_v2 = vld [vmem:[%s12121_s2 + $0x158] sm:$0xff] }
  0x33   : > { %3552 = vmatpush.bf16.msrb.mxu2 %v10134_v6  ;;  %v1837_v6 = vrot.slane %v1835_v1, 1  ;;  %v896_v13 = vsel %vm852_vm0, %v891_v8, %v895_v9 }
  0x34   : > { %3971 = vmatpush.bf16.msrb.mxu3 %v10158_v10  ;;  %v1380_v10 = vrot.slane %v10021_v5, 1  ;;  %v1386_v5 = vrot.slane %v10024_v63, 1 }
  0x35   : > { %2597 = vmatpush.bf16.msrb.mxu0 %v10085_v45  ;;  %v1841_v11 = vor.u32 %v1840_v7, %v1837_v6  ;;  %v9975_v7 = vld [vmem:[%s10581_s26 + $0x38] sm:$0xff] }
  0x36   : > { %3016 = vmatpush.bf16.msrb.mxu1 %v10109_v49  ;;  %v1381_v14 = vsel %vm1370_vm1, %v1378_v57, %v1380_v10  ;;  %v1383_v35 = vsel %vm1370_vm1, %v1380_v10, %v1382_v31  ;;  %v10083_v57 = vld [vmem:[%s12121_s2 + $0x118] sm:$0xff]  ;;  %v10050_v31 = vld [vmem:[%s10581_s26 + $0x50] sm:$0xff] }
  0x37   : > { %3553 = vmatpush.bf16.msrb.mxu2 %v10133_v44  ;;  %v1842_v15 = vsel %vm1789_vm2, %v1832_v58, %v1841_v11  ;;  %v10155_v58 = vld [vmem:[%s12121_s2 + $0x1d8] sm:$0xff] }
  0x38   : > { %3972 = vmatpush.bf16.msrb.mxu3 %v10157_v46 }
  0x39   : > { %2598 = vmatpush.bf16.msrb.mxu0 %v10084_v19 }
  0x3b   : > { %3554 = vmatpush.bf16.msrb.mxu2 %v10132_v18 }
  0x3c   : > { %599 = vmatmul.bf16.gmra.mxu0 %v9969_v21  ;;  %v1844_v21 = vshrl.u32 %v10046_v16, 16  ;;  %3973 = vmatpush.bf16.msrb.mxu3 %v10156_v20 }
  0x3d   : > { %1117 = vmatmul.bf16.gmra.mxu1 %v872_v22  ;;  %v1847_v22 = vshll.u32 %v10046_v16, 16  ;;  %2599 = vmatpush.bf16.msrb.mxu0 %v10083_v57  ;;  %v9977_v57 = vld [vmem:[%s10581_s26 + $0x48] sm:$0xff] }
  0x3e   : > { %1536 = vmatmul.bf16.gmra.mxu2 %v1375_v23  ;;  %v10108_v23 = vld [vmem:[%s12121_s2 + $0x160] sm:$0xff]  ;;  %v1846_v27 = vrot.slane %v1844_v21, 1 }
  0x3f   : > { %2073 = vmatmul.bf16.gmra.mxu3 %v1815_v24  ;;  %3017 = vmatpush.bf16.msrb.mxu1 %v10108_v23  ;;  %v897_v24 = vshrl.u32 %v9997_v0, 16  ;;  %v1849_v28 = vrot.slane %v1847_v22, 2 }
  0x40   : > { %3555 = vmatpush.bf16.msrb.mxu2 %v10131_v56  ;;  %3974 = vmatpush.bf16.msrb.mxu3 %v10155_v58 }
  0x41   : > { %v899_v29 = vor.u32 %v897_v24, %v895_v9  ;;  %v1850_v32 = vor.u32 %v1849_v28, %v1846_v27  ;;  %v1387_v9 = vsel %vm1370_vm1, %v1384_v48, %v1386_v5  ;;  %v9976_v24 = vld [vmem:[%s10581_s26 + $0x40] sm:$0xff] }
  0x43   : > { %v904_v34 = vsel %vm852_vm0, %v899_v29, %v903_v30  ;;  %v1851_v36 = vsel %vm1789_vm2, %v1841_v11, %v1850_v32  ;;  %3018 = vmatpush.bf16.msrb.mxu1 %v10107_v2  ;;  %v10049_v11 = vld [vmem:[%s10581_s26 + $0x48] sm:$0xff] }
  0x4c   : > { %604 = vmatmul.bf16.gmra.mxu0 %v9970_v38  ;;  %v9999_v38 = vld [vmem:[%s10581_s26 + $0x38] sm:$0xff] }
  0x4d   : > { %1122 = vmatmul.bf16.gmra.mxu1 %v880_v39  ;;  %v1853_v39 = vshrl.u32 %v10047_v37, 16  ;;  %v909_v42 = vshll.u32 %v9999_v38, 16 }
  0x4e   : > { %1541 = vmatmul.bf16.gmra.mxu2 %v1377_v40  ;;  %v1856_v40 = vshll.u32 %v10047_v37, 16  ;;  %v1883_v37 = vshll.u32 %v10050_v31, 16 }
  0x4f   : > { %2078 = vmatmul.bf16.gmra.mxu3 %v1824_v41  ;;  %v905_v41 = vshrl.u32 %v9998_v17, 16  ;;  %v1855_v44 = vrot.slane %v1853_v39, 1  ;;  %v911_v47 = vrot.slane %v909_v42, 1  ;;  %v10025_v17 = vld [vmem:[%s10581_s26 + $0x48] sm:$0xff] }
  0x50   : > { %v1858_v45 = vrot.slane %v1856_v40, 2  ;;  %v1388_v22 = vrot.slane %v10025_v17, 1  ;;  %v1885_v48 = vrot.slane %v1883_v37, 2  ;;  %v10153_v37 = vld [vmem:[%s12121_s2 + $0x1c8] sm:$0xff] }
  0x51   : > { %v907_v46 = vor.u32 %v905_v41, %v903_v30 }
  0x52   : > { %v1859_v49 = vor.u32 %v1858_v45, %v1855_v44  ;;  %v1389_v29 = vsel %vm1370_vm1, %v1386_v5, %v1388_v22 }
  0x53   : > { %v912_v51 = vsel %vm852_vm0, %v907_v46, %v911_v47  ;;  %v10026_v46 = vld [vmem:[%s10581_s26 + $0x50] sm:$0xff] }
  0x54   : > { %v1860_v53 = vsel %vm1789_vm2, %v1850_v32, %v1859_v49  ;;  %v10002_v32 = vld [vmem:[%s10581_s26 + $0x50] sm:$0xff] }
  0x55   : > { %v933_v44 = vshll.u32 %v10002_v32, 16 }
  0x5c   : > { %609 = vmatmul.bf16.gmra.mxu0 %v9971_v59  ;;  %v1862_v59 = vshrl.u32 %v10048_v54, 16 }
  0x5d   : > { %1127 = vmatmul.bf16.gmra.mxu1 %v888_v60  ;;  %v1865_v60 = vshll.u32 %v10048_v54, 16 }
  0x5e   : > { %1546 = vmatmul.bf16.gmra.mxu2 %v1379_v61  ;;  %v913_v61 = vshrl.u32 %v9999_v38, 16  ;;  %v1864_v0 = vrot.slane %v1862_v59, 1 }
  0x5f   : > { %2083 = vmatmul.bf16.gmra.mxu3 %v1833_v62  ;;  %v917_v62 = vshll.u32 %v10000_v55, 16  ;;  %v1867_v1 = vrot.slane %v1865_v60, 2 }
  0x60   : > { %v915_v3 = vor.u32 %v913_v61, %v911_v47 }
  0x61   : > { %v919_v4 = vrot.slane %v917_v62, 1  ;;  %v1868_v6 = vor.u32 %v1867_v1, %v1864_v0  ;;  %v10051_v1 = vld [vmem:[%s10581_s26 + $0x58] sm:$0xff] }
  0x62   : > { %v1892_v5 = vshll.u32 %v10051_v1, 16 }
  0x63   : > { %v920_v8 = vsel %vm852_vm0, %v915_v3, %v919_v4  ;;  %v1869_v10 = vsel %vm1789_vm2, %v1859_v49, %v1868_v6  ;;  %v10003_v3 = vld [vmem:[%s10581_s26 + $0x58] sm:$0xff] }
  0x6c   : > { %614 = vmatmul.bf16.gmra.mxu0 %v9972_v12  ;;  %v10001_v12 = vld [vmem:[%s10581_s26 + $0x48] sm:$0xff] }
  0x6d   : > { %1132 = vmatmul.bf16.gmra.mxu1 %v896_v13  ;;  %v1871_v13 = vshrl.u32 %v10049_v11, 16  ;;  %v925_v16 = vshll.u32 %v10001_v12, 16  ;;  %v929_v43 = vshrl.u32 %v10001_v12, 16  ;;  %v941_v12 = vshll.u32 %v10003_v3, 16 }
  0x6e   : > { %1551 = vmatmul.bf16.gmra.mxu2 %v1381_v14  ;;  %v1874_v14 = vshll.u32 %v10049_v11, 16  ;;  %v937_v11 = vshrl.u32 %v10002_v32, 16  ;;  %v10052_v32 = vld [vmem:[%s10581_s26 + $0x60] sm:$0xff] }
  0x6f   : > { %2088 = vmatmul.bf16.gmra.mxu3 %v1842_v15  ;;  %v921_v15 = vshrl.u32 %v10000_v55, 16  ;;  %v1873_v18 = vrot.slane %v1871_v13, 1  ;;  %v927_v21 = vrot.slane %v925_v16, 1  ;;  %v1894_v16 = vrot.slane %v1892_v5, 2  ;;  %v10053_v5 = vld [vmem:[%s10581_s26 + $0x68] sm:$0xff] }
  0x70   : > { %v1876_v19 = vrot.slane %v1874_v14, 2  ;;  %v10027_v14 = vld [vmem:[%s10581_s26 + $0x58] sm:$0xff] }
  0x71   : > { %v923_v20 = vor.u32 %v921_v15, %v919_v4  ;;  %v1889_v4 = vshrl.u32 %v10051_v1, 16 }
  0x72   : > { %v1877_v23 = vor.u32 %v1876_v19, %v1873_v18  ;;  %v943_v19 = vrot.slane %v941_v12, 1 }
  0x73   : > { %v928_v27 = vsel %vm852_vm0, %v923_v20, %v927_v21  ;;  %v1891_v15 = vrot.slane %v1889_v4, 1  ;;  %v1392_v20 = vrot.slane %v10027_v14, 1 }
  0x74   : > { %v1878_v30 = vsel %vm1789_vm2, %v1868_v6, %v1877_v23 }
  0x7c   : > { %619 = vmatmul.bf16.gmra.mxu0 %v9973_v33  ;;  %v10130_v33 = vld [vmem:[%s12121_s2 + $0x190] sm:$0xff] }
  0x7d   : > { %1137 = vmatmul.bf16.gmra.mxu1 %v904_v34  ;;  %v10082_v34 = vld [vmem:[%s12121_s2 + $0x110] sm:$0xff]  ;;  %3556 = vmatpush.bf16.msrb.mxu2 %v10130_v33 }
  0x7e   : > { %1556 = vmatmul.bf16.gmra.mxu2 %v1383_v35  ;;  %v10154_v35 = vld [vmem:[%s12121_s2 + $0x1d0] sm:$0xff]  ;;  %2600 = vmatpush.bf16.msrb.mxu0 %v10082_v34  ;;  %v10004_v34 = vld [vmem:[%s10581_s26 + $0x60] sm:$0xff] }
  0x7f   : > { %2093 = vmatmul.bf16.gmra.mxu3 %v1851_v36  ;;  %v1880_v36 = vshrl.u32 %v10050_v31, 16 }
  0x80   : > { %3975 = vmatpush.bf16.msrb.mxu3 %v10154_v35  ;;  %v10129_v35 = vld [vmem:[%s12121_s2 + $0x188] sm:$0xff] }
  0x81   : > { %v1882_v47 = vrot.slane %v1880_v36, 1  ;;  %v10081_v36 = vld [vmem:[%s12121_s2 + $0x108] sm:$0xff]  ;;  %3557 = vmatpush.bf16.msrb.mxu2 %v10129_v35 }
  0x82   : > { %2601 = vmatpush.bf16.msrb.mxu0 %v10081_v36 }
  0x83   : > { %v1886_v54 = vor.u32 %v1885_v48, %v1882_v47  ;;  %v10028_v48 = vld [vmem:[%s10581_s26 + $0x60] sm:$0xff] }
  0x84   : > { %3976 = vmatpush.bf16.msrb.mxu3 %v10153_v37 }
  0x85   : > { %v1887_v0 = vsel %vm1789_vm2, %v1877_v23, %v1886_v54 }
  0x8c   : > { %624 = vmatmul.bf16.gmra.mxu0 %v9974_v50  ;;  %v10106_v50 = vld [vmem:[%s12121_s2 + $0x150] sm:$0xff] }
  0x8d   : > { %1142 = vmatmul.bf16.gmra.mxu1 %v912_v51  ;;  %v931_v51 = vor.u32 %v929_v43, %v927_v21  ;;  %v1895_v21 = vor.u32 %v1894_v16, %v1891_v15  ;;  %v953_v15 = vshrl.u32 %v10004_v34, 16 }
  0x8e   : > { %1561 = vmatmul.bf16.gmra.mxu2 %v1385_v52  ;;  %v935_v52 = vrot.slane %v933_v44, 1  ;;  %3019 = vmatpush.bf16.msrb.mxu1 %v10106_v50 }
  0x8f   : > { %2098 = vmatmul.bf16.gmra.mxu3 %v1860_v53  ;;  %v1390_v53 = vrot.slane %v10026_v46, 1  ;;  %v1896_v31 = vsel %vm1789_vm2, %v1886_v54, %v1895_v21  ;;  %v949_v46 = vshll.u32 %v10004_v34, 16 }
  0x90   : > { %v936_v61 = vsel %vm852_vm0, %v931_v51, %v935_v52  ;;  %v939_v18 = vor.u32 %v937_v11, %v935_v52 }
  0x91   : > { %v1391_v63 = vsel %vm1370_vm1, %v1388_v22, %v1390_v53 }
  0x9c   : > { %629 = vmatmul.bf16.gmra.mxu0 %v9975_v7 }
  0x9d   : > { %1147 = vmatmul.bf16.gmra.mxu1 %v920_v8 }
  0x9e   : > { %1566 = vmatmul.bf16.gmra.mxu2 %v1387_v9 }
  0x9f   : > { %2103 = vmatmul.bf16.gmra.mxu3 %v1869_v10 }
  0xa9   : > { %v595_v25 = vpop.f32.mrf.mxu0 }
  0xaa   : > { %v1113_v26 = vpop.f32.mrf.mxu1 }
  0xab   : > { %v1193_v28 = vadd.f32 %v1113_v26, %v595_v25 }
  0xac   : > { %634 = vmatmul.bf16.gmra.mxu0 %v9976_v24  ;;  %v9978_v24 = vld [vmem:[%s10581_s26 + $0x50] sm:$0xff] }
  0xad   : > { %1152 = vmatmul.bf16.gmra.mxu1 %v928_v27 }
  0xae   : > { %1571 = vmatmul.bf16.gmra.mxu2 %v1389_v29 }
  0xaf   : > { %2108 = vmatmul.bf16.gmra.mxu3 %v1878_v30  ;;  %v1393_v30 = vsel %vm1370_vm1, %v1390_v53, %v1392_v20  ;;  %v10105_v53 = vld [vmem:[%s12121_s2 + $0x148] sm:$0xff] }
  0xb0   : > { %3020 = vmatpush.bf16.msrb.mxu1 %v10105_v53 }
  0xb1   : > { %v1532_v38 = vpop.f32.mrf.mxu2  ;;  %v597_v41 = vpop.f32.mrf.mxu0 }
  0xb2   : > { %v2069_v39 = vpop.f32.mrf.mxu3  ;;  %v1612_v40 = vadd.f32 %v1532_v38, %v1193_v28  ;;  %v1115_v42 = vpop.f32.mrf.mxu1  ;;  %v944_v28 = vsel %vm852_vm0, %v939_v18, %v943_v19  ;;  %v1898_v38 = vshrl.u32 %v10052_v32, 16 }
  0xb3   : > { %v1194_v45 = vadd.f32 %v1115_v42, %v597_v41 }
  0xb4   : > { %v10790_v49 = vadd.f32 %v2069_v39, %v1612_v40  ;;  %v1901_v39 = vshll.u32 %v10052_v32, 16  ;;  %v1900_v50 = vrot.slane %v1898_v38, 1  ;;  %v10054_v38 = vld [vmem:[%s10581_s26 + $0x70] sm:$0xff] }
  0xb6   : > { %v1903_v51 = vrot.slane %v1901_v39, 2 }
  0xb9   : > { %v1534_v55 = vpop.f32.mrf.mxu2  ;;  %v600_v59 = vpop.f32.mrf.mxu0 }
  0xba   : > { %v2071_v56 = vpop.f32.mrf.mxu3  ;;  %v1613_v58 = vadd.f32 %v1534_v55, %v1194_v45  ;;  %v1118_v60 = vpop.f32.mrf.mxu1  ;;  %v945_v45 = vshrl.u32 %v10003_v3, 16  ;;  %v951_v55 = vrot.slane %v949_v46, 1 }
  0xbb   : > { %v1195_v62 = vadd.f32 %v1118_v60, %v600_v59  ;;  %v9979_v60 = vld [vmem:[%s10581_s26 + $0x58] sm:$0xff] }
  0xbc   : > { %v10800_v2 = vadd.f32 %v2071_v56, %v1613_v58  ;;  %639 = vmatmul.bf16.gmra.mxu0 %v9977_v57  ;;  %v947_v54 = vor.u32 %v945_v45, %v943_v19  ;;  %v1394_v56 = vrot.slane %v10028_v48, 1  ;;  %v1904_v57 = vor.u32 %v1903_v51, %v1900_v50  ;;  %v10838_v19 = vld [vmem:[%s10581_s26 + $0x68] sm:$0xff] }
  0xbd   : > { %1157 = vmatmul.bf16.gmra.mxu1 %v936_v61  ;;  %v1919_v45 = vshll.u32 %v10054_v38, 16 }
  0xbe   : > { %1576 = vmatmul.bf16.gmra.mxu2 %v1391_v63  ;;  %v1395_v3 = vsel %vm1370_vm1, %v1392_v20, %v1394_v56  ;;  %v1905_v4 = vsel %vm1789_vm2, %v1895_v21, %v1904_v57 }
  0xbf   : > { %2113 = vmatmul.bf16.gmra.mxu3 %v1887_v0  ;;  %v952_v0 = vsel %vm852_vm0, %v947_v54, %v951_v55 }
  0xc1   : > { %v1537_v6 = vpop.f32.mrf.mxu2  ;;  %v602_v9 = vpop.f32.mrf.mxu0 }
  0xc2   : > { %v2074_v7 = vpop.f32.mrf.mxu3  ;;  %v1614_v8 = vadd.f32 %v1537_v6, %v1195_v62  ;;  %v1120_v10 = vpop.f32.mrf.mxu1 }
  0xc3   : > { %v1196_v13 = vadd.f32 %v1120_v10, %v602_v9  ;;  %v1910_v9 = vshll.u32 %v10053_v5, 16 }
  0xc4   : > { %v10804_v17 = vadd.f32 %v2074_v7, %v1614_v8  ;;  %v10005_v7 = vld [vmem:[%s10581_s26 + $0x68] sm:$0xff]  ;;  %v1907_v8 = vshrl.u32 %v10053_v5, 16 }
  0xc5   : > { %v957_v16 = vshll.u32 %v10005_v7, 16  ;;  %v1912_v21 = vrot.slane %v1910_v9, 2  ;;  %v961_v53 = vshrl.u32 %v10005_v7, 16 }
  0xc6   : > { %v1909_v20 = vrot.slane %v1907_v8, 1 }
  0xc9   : > { %v1539_v22 = vpop.f32.mrf.mxu2  ;;  %v605_v26 = vpop.f32.mrf.mxu0 }
  0xca   : > { %v2076_v23 = vpop.f32.mrf.mxu3  ;;  %v1615_v25 = vadd.f32 %v1539_v22, %v1196_v13  ;;  %v1123_v27 = vpop.f32.mrf.mxu1 }
  0xcb   : > { %v1197_v29 = vadd.f32 %v1123_v27, %v605_v26  ;;  %v1913_v26 = vor.u32 %v1912_v21, %v1909_v20 }
  0xcc   : > { %v10811_v33 = vadd.f32 %v2076_v23, %v1615_v25  ;;  %644 = vmatmul.bf16.gmra.mxu0 %v9978_v24  ;;  %v955_v23 = vor.u32 %v953_v15, %v951_v55  ;;  %v959_v24 = vrot.slane %v957_v16, 1  ;;  %v1396_v25 = vrot.slane %v10838_v19, 1  ;;  %v10881_v15 = vld [vmem:[%s10581_s26 + $0x78] sm:$0xff] }
  0xcd   : > { %1162 = vmatmul.bf16.gmra.mxu1 %v944_v28  ;;  %v1914_v37 = vsel %vm1789_vm2, %v1904_v57, %v1913_v26 }
  0xce   : > { %1581 = vmatmul.bf16.gmra.mxu2 %v1393_v30  ;;  %v960_v34 = vsel %vm852_vm0, %v955_v23, %v959_v24  ;;  %v1397_v36 = vsel %vm1370_vm1, %v1394_v56, %v1396_v25  ;;  %v10864_v56 = vld [vmem:[%s10581_s26 + $0x70] sm:$0xff] }
  0xcf   : > { %2118 = vmatmul.bf16.gmra.mxu3 %v1896_v31 }
  0xd1   : > { %v1542_v40 = vpop.f32.mrf.mxu2  ;;  %v607_v43 = vpop.f32.mrf.mxu0 }
  0xd2   : > { %v2079_v41 = vpop.f32.mrf.mxu3  ;;  %v1616_v42 = vadd.f32 %v1542_v40, %v1197_v29  ;;  %v1125_v44 = vpop.f32.mrf.mxu1  ;;  %v9980_v29 = vld [vmem:[%s10581_s26 + $0x60] sm:$0xff]  ;;  %v10851_v40 = vld [vmem:[%s10581_s26 + $0x70] sm:$0xff] }
  0xd3   : > { %v1198_v47 = vadd.f32 %v1125_v44, %v607_v43  ;;  %v10152_v43 = vld [vmem:[%s12121_s2 + $0x1c0] sm:$0xff]  ;;  %v1916_v44 = vshrl.u32 %v10054_v38, 16  ;;  %v965_v54 = vshll.u32 %v10851_v40, 16 }
  0xd4   : > { %v10824_v52 = vadd.f32 %v2079_v41, %v1616_v42  ;;  %v10128_v41 = vld [vmem:[%s12121_s2 + $0x180] sm:$0xff]  ;;  %3977 = vmatpush.bf16.msrb.mxu3 %v10152_v43  ;;  %v9982_v43 = vld [vmem:[%s10581_s26 + $0x70] sm:$0xff] }
  0xd5   : > { %v10080_v42 = vld [vmem:[%s12121_s2 + $0x100] sm:$0xff]  ;;  %3558 = vmatpush.bf16.msrb.mxu2 %v10128_v41  ;;  %v1918_v57 = vrot.slane %v1916_v44, 1 }
  0xd6   : > { %2602 = vmatpush.bf16.msrb.mxu0 %v10080_v42  ;;  %v771_v38 = vld [vmem:[%s10886_s30] sm:$0x1] }
  0xd9   : > { %v1544_v58 = vpop.f32.mrf.mxu2  ;;  %v610_v62 = vpop.f32.mrf.mxu0 }
  0xda   : > { %v2081_v59 = vpop.f32.mrf.mxu3  ;;  %v1617_v61 = vadd.f32 %v1544_v58, %v1198_v47  ;;  %v1128_v63 = vpop.f32.mrf.mxu1  ;;  %v1921_v58 = vrot.slane %v1919_v45, 2 }
  0xdb   : > { %v1199_v1 = vadd.f32 %v1128_v63, %v610_v62  ;;  %v967_v62 = vrot.slane %v965_v54, 1  ;;  %v1398_v63 = vrot.slane %v10864_v56, 1  ;;  %v1289_v56 = vld [vmem:[%s10886_s30] sm:$0x1] }
  0xdc   : > { %v10834_v6 = vadd.f32 %v2081_v59, %v1617_v61  ;;  %649 = vmatmul.bf16.gmra.mxu0 %v9979_v60  ;;  %v10104_v60 = vld [vmem:[%s12121_s2 + $0x140] sm:$0xff]  ;;  %v963_v61 = vor.u32 %v961_v53, %v959_v24 }
  0xdd   : > { %1167 = vmatmul.bf16.gmra.mxu1 %v952_v0  ;;  %v1922_v0 = vor.u32 %v1921_v58, %v1918_v57  ;;  %v10230_v58 = vld [vmem:[%s12121_s2 + $0x2b8] sm:$0xff] }
  0xde   : > { %1586 = vmatmul.bf16.gmra.mxu2 %v1395_v3  ;;  %3021 = vmatpush.bf16.msrb.mxu1 %v10104_v60  ;;  %v968_v9 = vsel %vm852_vm0, %v963_v61, %v967_v62  ;;  %v10183_v60 = vld [vmem:[%s12121_s2 + $0x238] sm:$0xff] }
  0xdf   : > { %2123 = vmatmul.bf16.gmra.mxu3 %v1905_v4  ;;  %v9981_v4 = vld [vmem:[%s10581_s26 + $0x68] sm:$0xff]  ;;  %v10254_v61 = vld [vmem:[%s12121_s2 + $0x2f8] sm:$0xff]  ;;  %5307 = vmatpush.bf16.msra.mxu2 %v10230_v58  ;;  %v10088_v58 = vld [vmem:[%s10581_s26 + $0x10] sm:$0xf0] }
  0xe0   : > { %4387 = vmatpush.bf16.msra.mxu0 %v10183_v60  ;;  %5833 = vmatpush.bf16.msra.mxu3 %v10254_v61  ;;  %v8962_v61 = vld [vmem:[%s10581_s26 + $0x10] sm:$0x8] }
  0xe1   : > { %v1547_v10 = vpop.f32.mrf.mxu2  ;;  %v612_v13 = vpop.f32.mrf.mxu0 }
  0xe2   : > { %v2084_v11 = vpop.f32.mrf.mxu3  ;;  %v1618_v12 = vadd.f32 %v1547_v10, %v1199_v1  ;;  %v1130_v14 = vpop.f32.mrf.mxu1 }
  0xe3   : > { %v1200_v18 = vadd.f32 %v1130_v14, %v612_v13  ;;  %v10055_v13 = vld [vmem:[%s10581_s26 + $0x78] sm:$0xff] }
  0xe4   : > { %v10840_v22 = vadd.f32 %v2084_v11, %v1618_v12  ;;  %v1399_v11 = vsel %vm1370_vm1, %v1396_v25, %v1398_v63  ;;  %v1923_v12 = vsel %vm1789_vm2, %v1913_v26, %v1922_v0  ;;  %v1925_v16 = vshrl.u32 %v10055_v13, 16 }
  0xe5   : > { %v969_v25 = vshrl.u32 %v10851_v40, 16  ;;  %v973_v26 = vshll.u32 %v10881_v15, 16 }
  0xe9   : > { %v1549_v27 = vpop.f32.mrf.mxu2  ;;  %v615_v31 = vpop.f32.mrf.mxu0 }
  0xea   : > { %v2086_v28 = vpop.f32.mrf.mxu3  ;;  %v1619_v30 = vadd.f32 %v1549_v27, %v1200_v18  ;;  %v1133_v32 = vpop.f32.mrf.mxu1  ;;  %v1928_v18 = vshll.u32 %v10055_v13, 16 }
  0xeb   : > { %v1201_v35 = vadd.f32 %v1133_v32, %v615_v31  ;;  %v1708_v32 = vld [vmem:[%s10886_s30] sm:$0x3] }
  0xec   : > { %v10848_v39 = vadd.f32 %v2086_v28, %v1619_v30  ;;  %654 = vmatmul.bf16.gmra.mxu0 %v9980_v29  ;;  %v10891_v28 = vld [vmem:[%s10581_s26 + $0x78] sm:$0xff]  ;;  %v1927_v29 = vrot.slane %v1925_v16, 1  ;;  %v1930_v30 = vrot.slane %v1928_v18, 2  ;;  %v1950_v40 = vunpack.c.l.b16 %v1708_v32 }
  0xed   : > { %1172 = vmatmul.bf16.gmra.mxu1 %v960_v34  ;;  %v971_v34 = vor.u32 %v969_v25, %v967_v62  ;;  %v1418_v62 = vunpack.c.l.b16 %v1289_v56  ;;  %v10207_v18 = vld [vmem:[%s12121_s2 + $0x278] sm:$0xff] }
  0xee   : > { %1591 = vmatmul.bf16.gmra.mxu2 %v1397_v36  ;;  %v1400_v36 = vrot.slane %v10891_v28, 1  ;;  %v1951_v54 = vpack.c.b16 %v1950_v40, %v1950_v40  ;;  %4924 = vmatpush.bf16.msra.mxu1 %v10207_v18 }
  0xef   : > { %2128 = vmatmul.bf16.gmra.mxu3 %v1914_v37  ;;  %v10897_v37 = vor.u32 %v1930_v30, %v1927_v29 }
  0xf1   : > { %v1552_v46 = vpop.f32.mrf.mxu2  ;;  %v617_v50 = vpop.f32.mrf.mxu0  ;;  %v1932_v53 = vsel %vm1789_vm2, %v1922_v0, %v10897_v37  ;;  %v1956_v0 = vshll.u32 %v1951_v54, 16 }
  0xf2   : > { %v2089_v47 = vpop.f32.mrf.mxu3  ;;  %v1620_v48 = vadd.f32 %v1552_v46, %v1201_v35  ;;  %v1135_v51 = vpop.f32.mrf.mxu1  ;;  %v975_v35 = vrot.slane %v973_v26, 1  ;;  %v8850_v26 = vld [vmem:[%s10581_s26 + $0x10] sm:$0xc] }
  0xf3   : > { %v1202_v55 = vadd.f32 %v1135_v51, %v617_v50  ;;  %v1401_v51 = vsel %vm1370_vm1, %v1398_v63, %v1400_v36  ;;  %v1953_v63 = vshrl.u32 %v1951_v54, 16  ;;  %v1958_v13 = vrot.slane %v1956_v0, 2 }
  0xf4   : > { %v10867_v59 = vadd.f32 %v2089_v47, %v1620_v48  ;;  %v976_v47 = vsel %vm852_vm0, %v971_v34, %v975_v35  ;;  %v997_v48 = vunpack.c.l.b16 %v771_v38  ;;  %v9983_v34 = vld [vmem:[%s10581_s26 + $0x78] sm:$0xff] }
  0xf6   : > { %v998_v57 = vpack.c.b16 %v997_v48, %v997_v48  ;;  %v10113_v48 = vld [vmem:[%s10581_s26 + $0x18] sm:$0xff] }
  0xf7   : > { %v3280_v60 = vshrl.u32 %v10113_v48, 16 }
  0xf9   : > { %v1554_v1 = vpop.f32.mrf.mxu2  ;;  %v620_v7 = vpop.f32.mrf.mxu0 }
  0xfa   : > { %v2091_v3 = vpop.f32.mrf.mxu3  ;;  %v1621_v5 = vadd.f32 %v1554_v1, %v1202_v55  ;;  %v1138_v8 = vpop.f32.mrf.mxu1 }
  0xfb   : > { %v1203_v10 = vadd.f32 %v1138_v8, %v620_v7  ;;  %v977_v8 = vshrl.u32 %v10881_v15, 16  ;;  %v10064_v15 = vld [vmem:[%s10581_s26 + $0x10] sm:$0xf0] }
  0xfc   : > { %v10878_v14 = vadd.f32 %v2091_v3, %v1621_v5  ;;  %659 = vmatmul.bf16.gmra.mxu0 %v9981_v4 }
  0xfd   : > { %1177 = vmatmul.bf16.gmra.mxu1 %v968_v9  ;;  %v1000_v9 = vshll.u32 %v998_v57, 16 }
  0xfe   : > { %1596 = vmatmul.bf16.gmra.mxu2 %v1399_v11  ;;  %v1419_v11 = vpack.c.b16 %v1418_v62, %v1418_v62  ;;  %v10136_v62 = vld [vmem:[%s10581_s26 + $0x10] sm:$0xf0] }
  0xff   : > { %2133 = vmatmul.bf16.gmra.mxu3 %v1923_v12  ;;  %v1955_v12 = vrot.slane %v1953_v63, 1 }
 0x101   : > { %v1557_v19 = vpop.f32.mrf.mxu2  ;;  %v622_v23 = vpop.f32.mrf.mxu0  ;;  %v1959_v25 = vor.u32 %v1958_v13, %v1955_v12 }
 0x102   : > { %v2094_v20 = vpop.f32.mrf.mxu3  ;;  %v1622_v21 = vadd.f32 %v1557_v19, %v1203_v10  ;;  %v1140_v24 = vpop.f32.mrf.mxu1  ;;  %v979_v19 = vor.u32 %v977_v8, %v975_v35  ;;  %v10065_v35 = vld [vmem:[%s10581_s26 + $0x18] sm:$0xff] }
 0x103   : > { %v1204_v27 = vadd.f32 %v1140_v24, %v622_v23  ;;  %v1420_v24 = vrot.slane %v1419_v11, 1  ;;  %v2325_v54 = vshrl.u32 %v10065_v35, 16  ;;  %v2328_v56 = vshll.u32 %v10065_v35, 16 }
 0x104   : > { %v10893_v31 = vadd.f32 %v2094_v20, %v1622_v21  ;;  %v1002_v20 = vrot.slane %v1000_v9, 1  ;;  %v8626_v21 = vld [vmem:[%s10581_s26 + $0x10] sm:$0xe] }
 0x105   : > { %v8627_v38 = vor.u32 %v10064_v15, %v8626_v21  ;;  %v10961_v21 = vld [vmem:[%s10581_s26 + $0x18] sm:$0xff]  ;;  %v8963_v15 = vor.u32 %v10136_v62, %v8962_v61 }
 0x106   : > { %v3809_v35 = vrot.slane %v10961_v21, 3 }
 0x109   : > { %v1559_v41 = vpop.f32.mrf.mxu2  ;;  %v625_v45 = vpop.f32.mrf.mxu0 }
 0x10a   : > { %v2096_v42 = vpop.f32.mrf.mxu3  ;;  %v1623_v44 = vadd.f32 %v1559_v41, %v1204_v27  ;;  %v1143_v46 = vpop.f32.mrf.mxu1  ;;  %v10112_v27 = vld [vmem:[%s10581_s26 + $0x10] sm:$0xf0] }
 0x10b   : > { %v1205_v50 = vadd.f32 %v1143_v46, %v625_v45  ;;  %v1424_v46 = vsel %vm1370_vm1, %v1400_v36, %v1420_v24  ;;  %v8738_v36 = vld [vmem:[%s10581_s26 + $0x10] sm:$0xc] }
 0x10c   : > { %v10907_v55 = vadd.f32 %v2096_v42, %v1623_v44  ;;  %664 = vmatmul.bf16.gmra.mxu0 %v9982_v43  ;;  %v1006_v43 = vsel %vm10928_vm4, %v979_v19, %v1002_v20  ;;  %v8851_v44 = vor.u32 %v10112_v27, %v8850_v26  ;;  %v8739_v11 = vor.u32 %v10088_v58, %v8738_v36  ;;  %v10182_v36 = vld [vmem:[%s12121_s2 + $0x230] sm:$0xff] }
 0x10d   : > { %1182 = vmatmul.bf16.gmra.mxu1 %v976_v47  ;;  %v1962_v47 = vsel %vm10936_vm5, %v10897_v37, %v1959_v25  ;;  %v3283_v37 = vshll.u32 %v10113_v48, 16  ;;  %v3282_v19 = vrot.slane %v3280_v60, 2  ;;  %v10253_v58 = vld [vmem:[%s12121_s2 + $0x2f0] sm:$0xff]  ;;  %4388 = vmatpush.bf16.msra.mxu0 %v10182_v36 }
 0x10e   : > { %1601 = vmatmul.bf16.gmra.mxu2 %v1401_v51  ;;  %v2317_v51 = vshrl.u32 %v8627_v38, 16  ;;  %v3272_v28 = vshrl.u32 %v8851_v44, 16  ;;  %v3275_v57 = vshll.u32 %v8851_v44, 16  ;;  %v2852_v26 = vrot.slane %v8739_v11, 2  ;;  %5834 = vmatpush.bf16.msra.mxu3 %v10253_v58 }
 0x10f   : > { %2138 = vmatmul.bf16.gmra.mxu3 %v1932_v53  ;;  %v2320_v53 = vshll.u32 %v8627_v38, 16  ;;  %v3285_v20 = vrot.slane %v3283_v37, 3 }
 0x110   : > { %v3274_v12 = vrot.slane %v3272_v28, 2  ;;  %v3277_v13 = vrot.slane %v3275_v57, 3  ;;  %v10229_v57 = vld [vmem:[%s12121_s2 + $0x2b0] sm:$0xff] }
 0x111   : > { %v1562_v1 = vpop.f32.mrf.mxu2  ;;  %v627_v5 = vpop.f32.mrf.mxu0  ;;  %5308 = vmatpush.bf16.msra.mxu2 %v10229_v57  ;;  %v11000_v57 = vld [vmem:[%s10581_s26 + $0x28] sm:$0xff] }
 0x112   : > { %v2099_v3 = vpop.f32.mrf.mxu3  ;;  %v1624_v4 = vadd.f32 %v1562_v1, %v1205_v50  ;;  %v1145_v7 = vpop.f32.mrf.mxu1  ;;  %v2319_v1 = vrot.slane %v2317_v51, 1 }
 0x113   : > { %v1206_v10 = vadd.f32 %v1145_v7, %v627_v5  ;;  %v2330_v5 = vrot.slane %v2328_v56, 2 }
 0x114   : > { %v10920_v16 = vadd.f32 %v2099_v3, %v1624_v4  ;;  %v2322_v3 = vrot.slane %v2320_v53, 2  ;;  %v2327_v4 = vrot.slane %v2325_v54, 1  ;;  %v10114_v53 = vld [vmem:[%s10581_s26 + $0x20] sm:$0xff] }
 0x115   : > { %v3289_v60 = vshrl.u32 %v10114_v53, 16  ;;  %v3292_v37 = vshll.u32 %v10114_v53, 16 }
 0x116   : > { %v2323_v24 = vor.u32 %v2322_v3, %v2319_v1  ;;  %v2331_v25 = vor.u32 %v2330_v5, %v2327_v4  ;;  %v10090_v5 = vld [vmem:[%s10581_s26 + $0x20] sm:$0xff] }
 0x118   : > { %v2332_v44 = vsel %vm1789_vm2, %v2323_v24, %v2331_v25 }
 0x119   : > { %v1564_v30 = vpop.f32.mrf.mxu2  ;;  %v630_v41 = vpop.f32.mrf.mxu0 }
 0x11a   : > { %v2101_v32 = vpop.f32.mrf.mxu3  ;;  %v1625_v40 = vadd.f32 %v1564_v30, %v1206_v10  ;;  %v1148_v42 = vpop.f32.mrf.mxu1  ;;  %v10958_v10 = vld [vmem:[%s10581_s26 + $0x18] sm:$0xff]  ;;  %v3278_v30 = vor.u32 %v3277_v13, %v3274_v12  ;;  %v10206_v12 = vld [vmem:[%s12121_s2 + $0x270] sm:$0xff] }
 0x11b   : > { %v1207_v45 = vadd.f32 %v1148_v42, %v630_v41  ;;  %v2853_v27 = vrot.slane %v10958_v10, 2  ;;  %v10138_v10 = vld [vmem:[%s10581_s26 + $0x20] sm:$0xff]  ;;  %4925 = vmatpush.bf16.msra.mxu1 %v10206_v12  ;;  %v10068_v12 = vld [vmem:[%s10581_s26 + $0x30] sm:$0xff] }
 0x11c   : > { %v10951_v50 = vadd.f32 %v2101_v32, %v1625_v40  ;;  %669 = vmatmul.bf16.gmra.mxu0 %v9983_v34  ;;  %v3286_v32 = vor.u32 %v3285_v20, %v3282_v19  ;;  %v3808_v34 = vrot.slane %v8963_v15, 3  ;;  %v3811_v20 = vrot.slane %v10138_v10, 3 }
 0x11d   : > { %1187 = vmatmul.bf16.gmra.mxu1 %v1006_v43 }
 0x11e   : > { %1606 = vmatmul.bf16.gmra.mxu2 %v1424_v46  ;;  %v10066_v46 = vld [vmem:[%s10581_s26 + $0x20] sm:$0xff]  ;;  %v3287_v48 = vsel %vm3270_vm7, %v3278_v30, %v3286_v32  ;;  %v3810_v51 = vsel %vm3807_vm8, %v3808_v34, %v3809_v35 }
 0x11f   : > { %2143 = vmatmul.bf16.gmra.mxu3 %v1962_v47  ;;  %v2334_v56 = vshrl.u32 %v10066_v46, 16  ;;  %v2337_v28 = vshll.u32 %v10066_v46, 16 }
 0x121   : > { %v1567_v63 = vpop.f32.mrf.mxu2  ;;  %v632_v8 = vpop.f32.mrf.mxu0  ;;  %v2336_v3 = vrot.slane %v2334_v56, 1  ;;  %v2339_v4 = vrot.slane %v2337_v28, 2 }
 0x122   : > { %v2104_v0 = vpop.f32.mrf.mxu3  ;;  %v1626_v7 = vadd.f32 %v1567_v63, %v1207_v45  ;;  %v1150_v9 = vpop.f32.mrf.mxu1  ;;  %v2854_v45 = vsel %vm2851_vm6, %v2852_v26, %v2853_v27 }
 0x123   : > { %v1208_v18 = vadd.f32 %v1150_v9, %v632_v8  ;;  %v3291_v8 = vrot.slane %v3289_v60, 2  ;;  %v3294_v9 = vrot.slane %v3292_v37, 3  ;;  %v2340_v13 = vor.u32 %v2339_v4, %v2336_v3  ;;  %v11003_v37 = vld [vmem:[%s10581_s26 + $0x28] sm:$0xff] }
 0x124   : > { %v10963_v23 = vadd.f32 %v2104_v0, %v1626_v7 }
 0x125   : > { %v3295_v19 = vor.u32 %v3294_v9, %v3291_v8  ;;  %v2341_v34 = vsel %vm1789_vm2, %v2331_v25, %v2340_v13 }
 0x129   : > { %v1569_v38 = vpop.f32.mrf.mxu2  ;;  %v635_v42 = vpop.f32.mrf.mxu0 }
 0x12a   : > { %v2106_v40 = vpop.f32.mrf.mxu3  ;;  %v1627_v41 = vadd.f32 %v1569_v38, %v1208_v18  ;;  %v1153_v43 = vpop.f32.mrf.mxu1  ;;  %v2855_v18 = vrot.slane %v10090_v5, 2 }
 0x12b   : > { %v1209_v47 = vadd.f32 %v1153_v43, %v635_v42  ;;  %v3296_v42 = vsel %vm3270_vm7, %v3286_v32, %v3295_v19  ;;  %v3812_v43 = vsel %vm3807_vm8, %v3809_v35, %v3811_v20 }
 0x12c   : > { %v10973_v54 = vadd.f32 %v2106_v40, %v1627_v41  ;;  %2603 = vmatmul.bf16.vlgmr.msrb.gmra.mxu0 %v2332_v44  ;;  %v2856_v38 = vsel %vm2851_vm6, %v2853_v27, %v2855_v18  ;;  %v10067_v40 = vld [vmem:[%s10581_s26 + $0x28] sm:$0xff] }
 0x12d   : > { %3022 = vmatmul.bf16.vlgmr.msrb.gmra.mxu1 %v2854_v45  ;;  %v10115_v44 = vld [vmem:[%s10581_s26 + $0x28] sm:$0xff]  ;;  %v2343_v46 = vshrl.u32 %v10067_v40, 16 }
 0x12e   : > { %3559 = vmatmul.bf16.vlgmr.msrb.gmra.mxu2 %v3287_v48  ;;  %v3298_v25 = vshrl.u32 %v10115_v44, 16  ;;  %v3301_v48 = vshll.u32 %v10115_v44, 16 }
 0x12f   : > { %3978 = vmatmul.bf16.vlgmr.msrb.gmra.mxu3 %v3810_v51  ;;  %v2345_v28 = vrot.slane %v2343_v46, 1 }
 0x130   : > { %v3300_v58 = vrot.slane %v3298_v25, 2  ;;  %v3303_v60 = vrot.slane %v3301_v48, 3  ;;  %v10092_v48 = vld [vmem:[%s10581_s26 + $0x30] sm:$0xff] }
 0x131   : > { %v1572_v61 = vpop.f32.mrf.mxu2  ;;  %v637_v0 = vpop.f32.mrf.mxu0 }
 0x132   : > { %v2109_v62 = vpop.f32.mrf.mxu3  ;;  %v1628_v63 = vadd.f32 %v1572_v61, %v1209_v47  ;;  %v1155_v1 = vpop.f32.mrf.mxu1  ;;  %v2346_v47 = vshll.u32 %v10067_v40, 16 }
 0x133   : > { %v1210_v7 = vadd.f32 %v1155_v1, %v637_v0  ;;  %v3304_v0 = vor.u32 %v3303_v60, %v3300_v58  ;;  %v3813_v1 = vrot.slane %v11003_v37, 3 }
 0x134   : > { %v10986_v11 = vadd.f32 %v2109_v62, %v1628_v63  ;;  %v2348_v35 = vrot.slane %v2346_v47, 2  ;;  %v2857_v63 = vrot.slane %v11000_v57, 2  ;;  %v2859_v57 = vrot.slane %v10092_v48, 2 }
 0x136   : > { %v2349_v62 = vor.u32 %v2348_v35, %v2345_v28  ;;  %v2858_v10 = vsel %vm2851_vm6, %v2855_v18, %v2857_v63  ;;  %v10181_v18 = vld [vmem:[%s12121_s2 + $0x228] sm:$0xff] }
 0x137   : > { %4389 = vmatpush.bf16.msra.mxu0 %v10181_v18  ;;  %v10205_v28 = vld [vmem:[%s12121_s2 + $0x268] sm:$0xff] }
 0x138   : > { %v2350_v9 = vsel %vm1789_vm2, %v2340_v13, %v2349_v62  ;;  %v10228_v13 = vld [vmem:[%s12121_s2 + $0x2a8] sm:$0xff]  ;;  %4926 = vmatpush.bf16.msra.mxu1 %v10205_v28 }
 0x139   : > { %v1574_v21 = vpop.f32.mrf.mxu2  ;;  %v640_v26 = vpop.f32.mrf.mxu0  ;;  %5309 = vmatpush.bf16.msra.mxu2 %v10228_v13 }
 0x13a   : > { %v2111_v15 = vpop.f32.mrf.mxu3  ;;  %v1629_v24 = vadd.f32 %v1574_v21, %v1210_v7  ;;  %v1158_v30 = vpop.f32.mrf.mxu1 }
 0x13b   : > { %v1211_v41 = vadd.f32 %v1158_v30, %v640_v26  ;;  %v10116_v26 = vld [vmem:[%s10581_s26 + $0x30] sm:$0xff] }
 0x13c   : > { %v10997_v45 = vadd.f32 %v2111_v15, %v1629_v24  ;;  %2608 = vmatmul.bf16.gmra.mxu0 %v2341_v34  ;;  %v3305_v15 = vsel %vm3270_vm7, %v3295_v19, %v3304_v0  ;;  %v3814_v24 = vsel %vm3807_vm8, %v3811_v20, %v3813_v1  ;;  %v2352_v34 = vshrl.u32 %v10068_v12, 16  ;;  %v10252_v19 = vld [vmem:[%s12121_s2 + $0x2e8] sm:$0xff] }
 0x13d   : > { %3027 = vmatmul.bf16.gmra.mxu1 %v2856_v38  ;;  %v2355_v38 = vshll.u32 %v10068_v12, 16  ;;  %v3307_v20 = vshrl.u32 %v10116_v26, 16  ;;  %v3310_v40 = vshll.u32 %v10116_v26, 16  ;;  %5835 = vmatpush.bf16.msra.mxu3 %v10252_v19 }
 0x13e   : > { %3564 = vmatmul.bf16.gmra.mxu2 %v3296_v42  ;;  %v2354_v47 = vrot.slane %v2352_v34, 1 }
 0x13f   : > { %3983 = vmatmul.bf16.gmra.mxu3 %v3812_v43  ;;  %v2357_v25 = vrot.slane %v2355_v38, 2 }
 0x141   : > { %v1577_v27 = vpop.f32.mrf.mxu2  ;;  %v642_v56 = vpop.f32.mrf.mxu0  ;;  %v2358_v35 = vor.u32 %v2357_v25, %v2354_v47 }
 0x142   : > { %v2114_v51 = vpop.f32.mrf.mxu3  ;;  %v1630_v53 = vadd.f32 %v1577_v27, %v1211_v41  ;;  %v1160_v32 = vpop.f32.mrf.mxu1 }
 0x143   : > { %v1212_v36 = vadd.f32 %v1160_v32, %v642_v56  ;;  %v10140_v56 = vld [vmem:[%s10581_s26 + $0x30] sm:$0xff] }
 0x144   : > { %v11005_v61 = vadd.f32 %v2114_v51, %v1630_v53  ;;  %v3309_v51 = vrot.slane %v3307_v20, 2  ;;  %v3312_v53 = vrot.slane %v3310_v40, 3  ;;  %v3815_v58 = vrot.slane %v10140_v56, 3  ;;  %v11042_v40 = vld [vmem:[%s10581_s26 + $0x38] sm:$0xff] }
 0x145   : > { %v2861_v25 = vrot.slane %v11042_v40, 2  ;;  %v10142_v40 = vld [vmem:[%s10581_s26 + $0x40] sm:$0xff] }
 0x149   : > { %v1579_v3 = vpop.f32.mrf.mxu2  ;;  %v645_v7 = vpop.f32.mrf.mxu0 }
 0x14a   : > { %v2116_v4 = vpop.f32.mrf.mxu3  ;;  %v1631_v5 = vadd.f32 %v1579_v3, %v1212_v36  ;;  %v1163_v8 = vpop.f32.mrf.mxu1  ;;  %v3313_v36 = vor.u32 %v3312_v53, %v3309_v51 }
 0x14b   : > { %v1213_v21 = vadd.f32 %v1163_v8, %v645_v7  ;;  %v2359_v7 = vsel %vm1789_vm2, %v2349_v62, %v2358_v35  ;;  %v2860_v8 = vsel %vm2851_vm6, %v2857_v63, %v2859_v57 }
 0x14c   : > { %v11015_v30 = vadd.f32 %v2116_v4, %v1631_v5  ;;  %2613 = vmatmul.bf16.gmra.mxu0 %v2350_v9  ;;  %v10069_v9 = vld [vmem:[%s10581_s26 + $0x38] sm:$0xff]  ;;  %v3314_v12 = vsel %vm3270_vm7, %v3304_v0, %v3313_v36 }
 0x14d   : > { %3032 = vmatmul.bf16.gmra.mxu1 %v2858_v10  ;;  %v2361_v26 = vshrl.u32 %v10069_v9, 16  ;;  %v2364_v34 = vshll.u32 %v10069_v9, 16  ;;  %v10118_v9 = vld [vmem:[%s10581_s26 + $0x40] sm:$0xff] }
 0x14e   : > { %3569 = vmatmul.bf16.gmra.mxu2 %v3305_v15  ;;  %v10117_v15 = vld [vmem:[%s10581_s26 + $0x38] sm:$0xff] }
 0x14f   : > { %3988 = vmatmul.bf16.gmra.mxu3 %v3814_v24  ;;  %v3316_v62 = vshrl.u32 %v10117_v15, 16  ;;  %v3319_v38 = vshll.u32 %v10117_v15, 16  ;;  %v2363_v20 = vrot.slane %v2361_v26, 1  ;;  %v3328_v15 = vshll.u32 %v10118_v9, 16 }
 0x151   : > { %v1582_v41 = vpop.f32.mrf.mxu2  ;;  %v647_v44 = vpop.f32.mrf.mxu0 }
 0x152   : > { %v2119_v42 = vpop.f32.mrf.mxu3  ;;  %v1632_v43 = vadd.f32 %v1582_v41, %v1213_v21  ;;  %v1165_v46 = vpop.f32.mrf.mxu1  ;;  %v3816_v21 = vsel %vm3807_vm8, %v3813_v1, %v3815_v58  ;;  %v2366_v1 = vrot.slane %v2364_v34, 2 }
 0x153   : > { %v1214_v27 = vadd.f32 %v1165_v46, %v647_v44  ;;  %v11045_v44 = vld [vmem:[%s10581_s26 + $0x38] sm:$0xff] }
 0x154   : > { %v11028_v32 = vadd.f32 %v2119_v42, %v1632_v43  ;;  %v3318_v42 = vrot.slane %v3316_v62, 2  ;;  %v3321_v43 = vrot.slane %v3319_v38, 3  ;;  %v2367_v47 = vor.u32 %v2366_v1, %v2363_v20 }
 0x155   : > { %v3330_v1 = vrot.slane %v3328_v15, 3 }
 0x156   : > { %v3322_v48 = vor.u32 %v3321_v43, %v3318_v42  ;;  %v10204_v42 = vld [vmem:[%s12121_s2 + $0x260] sm:$0xff] }
 0x157   : > { %4927 = vmatpush.bf16.msra.mxu1 %v10204_v42 }
 0x159   : > { %v1584_v60 = vpop.f32.mrf.mxu2  ;;  %v650_v4 = vpop.f32.mrf.mxu0 }
 0x15a   : > { %v2121_v37 = vpop.f32.mrf.mxu3  ;;  %v1633_v3 = vadd.f32 %v1584_v60, %v1214_v27  ;;  %v1168_v5 = vpop.f32.mrf.mxu1  ;;  %v3817_v27 = vrot.slane %v11045_v44, 3 }
 0x15b   : > { %v1215_v10 = vadd.f32 %v1168_v5, %v650_v4  ;;  %v10070_v4 = vld [vmem:[%s10581_s26 + $0x40] sm:$0xff] }
 0x15c   : > { %v11039_v24 = vadd.f32 %v2121_v37, %v1633_v3  ;;  %2618 = vmatmul.bf16.gmra.mxu0 %v2359_v7  ;;  %v2368_v37 = vsel %vm1789_vm2, %v2358_v35, %v2367_v47  ;;  %v2862_v3 = vsel %vm2851_vm6, %v2859_v57, %v2861_v25  ;;  %v3323_v7 = vsel %vm3270_vm7, %v3313_v36, %v3322_v48  ;;  %v10227_v35 = vld [vmem:[%s12121_s2 + $0x2a0] sm:$0xff] }
 0x15d   : > { %3037 = vmatmul.bf16.gmra.mxu1 %v2860_v8  ;;  %v3818_v8 = vsel %vm3807_vm8, %v3815_v58, %v3817_v27  ;;  %v10180_v57 = vld [vmem:[%s12121_s2 + $0x220] sm:$0xff]  ;;  %v3325_v58 = vshrl.u32 %v10118_v9, 16  ;;  %5310 = vmatpush.bf16.msra.mxu2 %v10227_v35 }
 0x15e   : > { %3574 = vmatmul.bf16.gmra.mxu2 %v3314_v12  ;;  %v2370_v12 = vshrl.u32 %v10070_v4, 16  ;;  %v10251_v36 = vld [vmem:[%s12121_s2 + $0x2e0] sm:$0xff]  ;;  %4390 = vmatpush.bf16.msra.mxu0 %v10180_v57 }
 0x15f   : > { %3993 = vmatmul.bf16.gmra.mxu3 %v3816_v21  ;;  %v2373_v21 = vshll.u32 %v10070_v4, 16  ;;  %v3327_v20 = vrot.slane %v3325_v58, 2 }
 0x160   : > { %5836 = vmatpush.bf16.msra.mxu3 %v10251_v36 }
 0x161   : > { %v1587_v63 = vpop.f32.mrf.mxu2  ;;  %v652_v19 = vpop.f32.mrf.mxu0 }
 0x162   : > { %v2124_v13 = vpop.f32.mrf.mxu3  ;;  %v1634_v18 = vadd.f32 %v1587_v63, %v1215_v10  ;;  %v1170_v0 = vpop.f32.mrf.mxu1 }
 0x163   : > { %v1216_v41 = vadd.f32 %v1170_v0, %v652_v19  ;;  %v10094_v19 = vld [vmem:[%s10581_s26 + $0x40] sm:$0xff] }
 0x164   : > { %v11047_v46 = vadd.f32 %v2124_v13, %v1634_v18  ;;  %v2372_v13 = vrot.slane %v2370_v12, 1  ;;  %v2375_v18 = vrot.slane %v2373_v21, 2  ;;  %v2863_v44 = vrot.slane %v10094_v19, 2  ;;  %v10119_v21 = vld [vmem:[%s10581_s26 + $0x48] sm:$0xff] }
 0x165   : > { %v3337_v58 = vshll.u32 %v10119_v21, 16  ;;  %v11087_v19 = vld [vmem:[%s10581_s26 + $0x48] sm:$0xff] }
 0x166   : > { %v2376_v43 = vor.u32 %v2375_v18, %v2372_v13  ;;  %v3821_v42 = vrot.slane %v11087_v19, 3  ;;  %v10144_v19 = vld [vmem:[%s10581_s26 + $0x50] sm:$0xff] }
 0x167   : > { %v3339_v18 = vrot.slane %v3337_v58, 3 }
 0x168   : > { %v2377_v4 = vsel %vm1789_vm2, %v2367_v47, %v2376_v43  ;;  %v3334_v47 = vshrl.u32 %v10119_v21, 16  ;;  %v10120_v21 = vld [vmem:[%s10581_s26 + $0x50] sm:$0xff] }
 0x169   : > { %v1589_v51 = vpop.f32.mrf.mxu2  ;;  %v655_v28 = vpop.f32.mrf.mxu0  ;;  %v3346_v58 = vshll.u32 %v10120_v21, 16 }
 0x16a   : > { %v2126_v53 = vpop.f32.mrf.mxu3  ;;  %v1635_v56 = vadd.f32 %v1589_v51, %v1216_v41  ;;  %v1173_v60 = vpop.f32.mrf.mxu1  ;;  %v3331_v51 = vor.u32 %v3330_v1, %v3327_v20  ;;  %v3336_v13 = vrot.slane %v3334_v47, 2 }
 0x16b   : > { %v1217_v5 = vadd.f32 %v1173_v60, %v655_v28 }
 0x16c   : > { %v11057_v10 = vadd.f32 %v2126_v53, %v1635_v56  ;;  %2623 = vmatmul.bf16.gmra.mxu0 %v2368_v37  ;;  %v3819_v53 = vrot.slane %v10142_v40, 3  ;;  %v3332_v9 = vsel %vm3270_vm7, %v3322_v48, %v3331_v51  ;;  %v3340_v40 = vor.u32 %v3339_v18, %v3336_v13 }
 0x16d   : > { %3042 = vmatmul.bf16.gmra.mxu1 %v2862_v3  ;;  %v3348_v18 = vrot.slane %v3346_v58, 3 }
 0x16e   : > { %3579 = vmatmul.bf16.gmra.mxu2 %v3323_v7  ;;  %v10071_v7 = vld [vmem:[%s10581_s26 + $0x48] sm:$0xff]  ;;  %v3820_v12 = vsel %vm3807_vm8, %v3817_v27, %v3819_v53 }
 0x16f   : > { %3998 = vmatmul.bf16.gmra.mxu3 %v3818_v8  ;;  %v2379_v57 = vshrl.u32 %v10071_v7, 16  ;;  %v2382_v36 = vshll.u32 %v10071_v7, 16  ;;  %v10072_v7 = vld [vmem:[%s10581_s26 + $0x50] sm:$0xff] }
 0x170   : > { %v2391_v47 = vshll.u32 %v10072_v7, 16 }
 0x171   : > { %v1592_v26 = vpop.f32.mrf.mxu2  ;;  %v657_v38 = vpop.f32.mrf.mxu0  ;;  %v2384_v27 = vrot.slane %v2382_v36, 2  ;;  %v2388_v36 = vshrl.u32 %v10072_v7, 16 }
 0x172   : > { %v2129_v34 = vpop.f32.mrf.mxu3  ;;  %v1636_v62 = vadd.f32 %v1592_v26, %v1217_v5  ;;  %v1175_v63 = vpop.f32.mrf.mxu1  ;;  %v2864_v5 = vsel %vm2851_vm6, %v2861_v25, %v2863_v44 }
 0x173   : > { %v1218_v0 = vadd.f32 %v1175_v63, %v657_v38  ;;  %v11084_v38 = vld [vmem:[%s10581_s26 + $0x48] sm:$0xff] }
 0x174   : > { %v11070_v41 = vadd.f32 %v2129_v34, %v1636_v62  ;;  %v2381_v62 = vrot.slane %v2379_v57, 1  ;;  %v2865_v1 = vrot.slane %v11084_v38, 2  ;;  %v10096_v38 = vld [vmem:[%s10581_s26 + $0x50] sm:$0xff] }
 0x176   : > { %v2385_v20 = vor.u32 %v2384_v27, %v2381_v62  ;;  %v2390_v62 = vrot.slane %v2388_v36, 1  ;;  %v2393_v27 = vrot.slane %v2391_v47, 2  ;;  %v10073_v47 = vld [vmem:[%s10581_s26 + $0x58] sm:$0xff] }
 0x179   : > { %v1594_v56 = vpop.f32.mrf.mxu2  ;;  %v660_v37 = vpop.f32.mrf.mxu0 }
 0x17a   : > { %v2131_v28 = vpop.f32.mrf.mxu3  ;;  %v1637_v60 = vadd.f32 %v1594_v56, %v1218_v0  ;;  %v1178_v3 = vpop.f32.mrf.mxu1 }
 0x17b   : > { %v1219_v8 = vadd.f32 %v1178_v3, %v660_v37 }
 0x17c   : > { %v11081_v35 = vadd.f32 %v2131_v28, %v1637_v60  ;;  %2628 = vmatmul.bf16.gmra.mxu0 %v2377_v4  ;;  %v2386_v4 = vsel %vm1789_vm2, %v2376_v43, %v2385_v20  ;;  %v10226_v43 = vld [vmem:[%s12121_s2 + $0x298] sm:$0xff] }
 0x17d   : > { %3047 = vmatmul.bf16.gmra.mxu1 %v2864_v5  ;;  %v2866_v5 = vsel %vm2851_vm6, %v2863_v44, %v2865_v1  ;;  %v10179_v44 = vld [vmem:[%s12121_s2 + $0x218] sm:$0xff]  ;;  %5311 = vmatpush.bf16.msra.mxu2 %v10226_v43 }
 0x17e   : > { %3584 = vmatmul.bf16.gmra.mxu2 %v3332_v9  ;;  %v3341_v9 = vsel %vm3270_vm7, %v3331_v51, %v3340_v40  ;;  %v10250_v51 = vld [vmem:[%s12121_s2 + $0x2d8] sm:$0xff]  ;;  %4391 = vmatpush.bf16.msra.mxu0 %v10179_v44 }
 0x17f   : > { %4003 = vmatmul.bf16.gmra.mxu3 %v3820_v12  ;;  %v3822_v12 = vsel %vm3807_vm8, %v3819_v53, %v3821_v42  ;;  %v3343_v53 = vshrl.u32 %v10120_v21, 16 }
 0x180   : > { %5837 = vmatpush.bf16.msra.mxu3 %v10250_v51 }
 0x181   : > { %v1597_v25 = vpop.f32.mrf.mxu2  ;;  %v662_v34 = vpop.f32.mrf.mxu0  ;;  %v3345_v13 = vrot.slane %v3343_v53, 2  ;;  %v10121_v53 = vld [vmem:[%s10581_s26 + $0x58] sm:$0xff] }
 0x182   : > { %v2134_v15 = vpop.f32.mrf.mxu3  ;;  %v1638_v26 = vadd.f32 %v1597_v25, %v1219_v8  ;;  %v1180_v48 = vpop.f32.mrf.mxu1 }
 0x183   : > { %v1220_v63 = vadd.f32 %v1180_v48, %v662_v34 }
 0x184   : > { %v11089_v0 = vadd.f32 %v2134_v15, %v1638_v26 }
 0x189   : > { %v1599_v56 = vpop.f32.mrf.mxu2  ;;  %v665_v37 = vpop.f32.mrf.mxu0 }
 0x18a   : > { %v2136_v28 = vpop.f32.mrf.mxu3  ;;  %v1639_v60 = vadd.f32 %v1599_v56, %v1220_v63  ;;  %v1183_v3 = vpop.f32.mrf.mxu1 }
 0x18b   : > { %v1221_v8 = vadd.f32 %v1183_v3, %v665_v37  ;;  %v2867_v37 = vrot.slane %v10096_v38, 2  ;;  %v3349_v3 = vor.u32 %v3348_v18, %v3345_v13  ;;  %v11126_v38 = vld [vmem:[%s10581_s26 + $0x58] sm:$0xff] }
 0x18c   : > { %v11099_v57 = vadd.f32 %v2136_v28, %v1639_v60  ;;  %2633 = vmatmul.bf16.gmra.mxu0 %v2386_v4  ;;  %v10203_v28 = vld [vmem:[%s12121_s2 + $0x258] sm:$0xff]  ;;  %v2394_v60 = vor.u32 %v2393_v27, %v2390_v62  ;;  %v3823_v4 = vrot.slane %v10144_v19, 3 }
 0x18d   : > { %3052 = vmatmul.bf16.gmra.mxu1 %v2866_v5  ;;  %v2868_v36 = vsel %vm2851_vm6, %v2865_v1, %v2867_v37  ;;  %v3350_v44 = vsel %vm3270_vm7, %v3340_v40, %v3349_v3  ;;  %v11129_v19 = vld [vmem:[%s10581_s26 + $0x58] sm:$0xff] }
 0x18e   : > { %3589 = vmatmul.bf16.gmra.mxu2 %v3341_v9  ;;  %4928 = vmatpush.bf16.msra.mxu1 %v10203_v28  ;;  %v2395_v21 = vsel %vm1789_vm2, %v2385_v20, %v2394_v60  ;;  %v3824_v51 = vsel %vm3807_vm8, %v3821_v42, %v3823_v4  ;;  %v3352_v20 = vshrl.u32 %v10121_v53, 16 }
 0x18f   : > { %4008 = vmatmul.bf16.gmra.mxu3 %v3822_v12 }
 0x190   : > { %v3354_v13 = vrot.slane %v3352_v20, 2 }
 0x191   : > { %v1602_v25 = vpop.f32.mrf.mxu2  ;;  %v667_v34 = vpop.f32.mrf.mxu0 }
 0x192   : > { %v2139_v15 = vpop.f32.mrf.mxu3  ;;  %v1640_v26 = vadd.f32 %v1602_v25, %v1221_v8  ;;  %v1185_v48 = vpop.f32.mrf.mxu1  ;;  %v2397_v25 = vshrl.u32 %v10073_v47, 16 }
 0x193   : > { %v1222_v63 = vadd.f32 %v1185_v48, %v667_v34 }
 0x194   : > { %v11112_v56 = vadd.f32 %v2139_v15, %v1640_v26  ;;  %v2400_v15 = vshll.u32 %v10073_v47, 16  ;;  %v3355_v26 = vshll.u32 %v10121_v53, 16  ;;  %v2399_v27 = vrot.slane %v2397_v25, 1  ;;  %v10074_v53 = vld [vmem:[%s10581_s26 + $0x60] sm:$0xff] }
 0x196   : > { %v2402_v42 = vrot.slane %v2400_v15, 2  ;;  %v3357_v18 = vrot.slane %v3355_v26, 3  ;;  %v10122_v26 = vld [vmem:[%s10581_s26 + $0x60] sm:$0xff] }
 0x199   : > { %v1604_v5 = vpop.f32.mrf.mxu2  ;;  %v670_v9 = vpop.f32.mrf.mxu0 }
 0x19a   : > { %v2141_v7 = vpop.f32.mrf.mxu3  ;;  %v1641_v8 = vadd.f32 %v1604_v5, %v1222_v63  ;;  %v1188_v12 = vpop.f32.mrf.mxu1  ;;  %v2403_v5 = vor.u32 %v2402_v42, %v2399_v27 }
 0x19b   : > { %v1223_v43 = vadd.f32 %v1188_v12, %v670_v9  ;;  %v3825_v9 = vrot.slane %v11129_v19, 3  ;;  %v10098_v19 = vld [vmem:[%s10581_s26 + $0x60] sm:$0xff] }
 0x19c   : > { %v11123_v58 = vadd.f32 %v2141_v7, %v1641_v8  ;;  %2638 = vmatmul.bf16.gmra.mxu0 %v2395_v21  ;;  %v2869_v7 = vrot.slane %v11126_v38, 2  ;;  %v3358_v8 = vor.u32 %v3357_v18, %v3354_v13 }
 0x19d   : > { %3057 = vmatmul.bf16.gmra.mxu1 %v2868_v36  ;;  %v3826_v20 = vsel %vm3807_vm8, %v3823_v4, %v3825_v9  ;;  %v3364_v4 = vshll.u32 %v10122_v26, 16 }
 0x19e   : > { %3594 = vmatmul.bf16.gmra.mxu2 %v3350_v44  ;;  %v2404_v44 = vsel %vm1789_vm2, %v2394_v60, %v2403_v5  ;;  %v3359_v15 = vsel %vm3270_vm7, %v3349_v3, %v3358_v8  ;;  %v10225_v60 = vld [vmem:[%s12121_s2 + $0x290] sm:$0xff]  ;;  %v3361_v3 = vshrl.u32 %v10122_v26, 16 }
 0x19f   : > { %4013 = vmatmul.bf16.gmra.mxu3 %v3824_v51  ;;  %v2870_v51 = vsel %vm2851_vm6, %v2867_v37, %v2869_v7  ;;  %v10249_v37 = vld [vmem:[%s12121_s2 + $0x2d0] sm:$0xff]  ;;  %5312 = vmatpush.bf16.msra.mxu2 %v10225_v60 }
 0x1a0   : > { %5838 = vmatpush.bf16.msra.mxu3 %v10249_v37  ;;  %v10075_v37 = vld [vmem:[%s10581_s26 + $0x68] sm:$0xff] }
 0x1a1   : > { %v1607_v1 = vpop.f32.mrf.mxu2  ;;  %v672_v62 = vpop.f32.mrf.mxu0 }
 0x1a2   : > { %v2144_v34 = vpop.f32.mrf.mxu3  ;;  %v1642_v48 = vadd.f32 %v1607_v1, %v1223_v43  ;;  %v1190_v40 = vpop.f32.mrf.mxu1 }
 0x1a3   : > { %v1224_v63 = vadd.f32 %v1190_v40, %v672_v62  ;;  %v2409_v62 = vshll.u32 %v10074_v53, 16 }
 0x1a4   : > { %v11131_v28 = vadd.f32 %v2144_v34, %v1642_v48  ;;  %v2406_v48 = vshrl.u32 %v10074_v53, 16 }
 0x1a5   : > { %v2411_v18 = vrot.slane %v2409_v62, 2 }
 0x1a6   : > { %v2408_v13 = vrot.slane %v2406_v48, 1 }
 0x1a8   : > { %v2412_v53 = vor.u32 %v2411_v18, %v2408_v13 }
 0x1a9   : > { %v1609_v12 = vpop.f32.mrf.mxu2  ;;  %v2604_v47 = vpop.f32.mrf.mxu0 }
 0x1aa   : > { %v2146_v21 = vpop.f32.mrf.mxu3  ;;  %v1643_v36 = vadd.f32 %v1609_v12, %v1224_v63  ;;  %v3023_v43 = vpop.f32.mrf.mxu1  ;;  %v2684_v25 = vadd.f32 %v2604_v47, %v10790_v49  ;;  %v10178_v49 = vld [vmem:[%s12121_s2 + $0x210] sm:$0xff]  ;;  %v10146_v47 = vld [vmem:[%s10581_s26 + $0x60] sm:$0xff]  ;;  %v2413_v60 = vsel %vm1789_vm2, %v2403_v5, %v2412_v53  ;;  %v2415_v5 = vshrl.u32 %v10075_v37, 16 }
 0x1ab   : > { %4392 = vmatpush.bf16.msra.mxu0 %v10178_v49 }
 0x1ac   : > { %v11142_v1 = vadd.f32 %v2146_v21, %v1643_v36  ;;  %v3103_v34 = vadd.f32 %v3023_v43, %v2684_v25  ;;  %2643 = vmatmul.bf16.gmra.mxu0 %v2404_v44  ;;  %v3363_v21 = vrot.slane %v3361_v3, 2  ;;  %v3366_v36 = vrot.slane %v3364_v4, 3  ;;  %v10202_v44 = vld [vmem:[%s12121_s2 + $0x250] sm:$0xff] }
 0x1ad   : > { %3062 = vmatmul.bf16.gmra.mxu1 %v2870_v51  ;;  %v2871_v25 = vrot.slane %v10098_v19, 2 }
 0x1ae   : > { %3599 = vmatmul.bf16.gmra.mxu2 %v3359_v15  ;;  %4929 = vmatpush.bf16.msra.mxu1 %v10202_v44  ;;  %v3367_v15 = vor.u32 %v3366_v36, %v3363_v21  ;;  %v11171_v36 = vld [vmem:[%s10581_s26 + $0x68] sm:$0xff] }
 0x1af   : > { %4018 = vmatmul.bf16.gmra.mxu3 %v3826_v20  ;;  %v3827_v20 = vrot.slane %v10146_v47, 3  ;;  %v2872_v49 = vsel %vm2851_vm6, %v2869_v7, %v2871_v25 }
 0x1b0   : > { %v3368_v4 = vsel %vm3270_vm7, %v3358_v8, %v3367_v15 }
 0x1b1   : > { %v3560_v40 = vpop.f32.mrf.mxu2  ;;  %v2606_v38 = vpop.f32.mrf.mxu0 }
 0x1b2   : > { %v3979_v27 = vpop.f32.mrf.mxu3  ;;  %v3640_v42 = vadd.f32 %v3560_v40, %v3103_v34  ;;  %v3025_v63 = vpop.f32.mrf.mxu1  ;;  %v2685_v12 = vadd.f32 %v2606_v38, %v10800_v2  ;;  %v3828_v40 = vsel %vm3807_vm8, %v3825_v9, %v3827_v20  ;;  %v2417_v9 = vrot.slane %v2415_v5, 1  ;;  %v10076_v5 = vld [vmem:[%s10581_s26 + $0x70] sm:$0xff] }
 0x1b4   : > { %v11156_v43 = vadd.f32 %v3979_v27, %v3640_v42  ;;  %v3104_v51 = vadd.f32 %v3025_v63, %v2685_v12  ;;  %v10123_v27 = vld [vmem:[%s10581_s26 + $0x68] sm:$0xff]  ;;  %v2418_v63 = vshll.u32 %v10075_v37, 16 }
 0x1b5   : > { %v3370_v7 = vshrl.u32 %v10123_v27, 16  ;;  %v3373_v13 = vshll.u32 %v10123_v27, 16 }
 0x1b6   : > { %v2420_v21 = vrot.slane %v2418_v63, 2 }
 0x1b7   : > { %v3372_v44 = vrot.slane %v3370_v7, 2 }
 0x1b9   : > { %v3562_v26 = vpop.f32.mrf.mxu2  ;;  %v2609_v48 = vpop.f32.mrf.mxu0 }
 0x1ba   : > { %v3981_v34 = vpop.f32.mrf.mxu3  ;;  %v3641_v2 = vadd.f32 %v3562_v26, %v3104_v51  ;;  %v3028_v62 = vpop.f32.mrf.mxu1  ;;  %v2686_v3 = vadd.f32 %v2609_v48, %v10804_v17  ;;  %v3375_v51 = vrot.slane %v3373_v13, 3  ;;  %v11175_v26 = vld [vmem:[%s10581_s26 + $0x68] sm:$0xff]  ;;  %v2421_v48 = vor.u32 %v2420_v21, %v2417_v9 }
 0x1bc   : > { %v11168_v42 = vadd.f32 %v3981_v34, %v3641_v2  ;;  %v3105_v38 = vadd.f32 %v3028_v62, %v2686_v3  ;;  %2648 = vmatmul.bf16.gmra.mxu0 %v2413_v60  ;;  %v2873_v62 = vrot.slane %v11171_v36, 2  ;;  %v3376_v60 = vor.u32 %v3375_v51, %v3372_v44 }
 0x1bd   : > { %3067 = vmatmul.bf16.gmra.mxu1 %v2872_v49  ;;  %v3829_v49 = vrot.slane %v11175_v26, 3  ;;  %v2422_v27 = vsel %vm1789_vm2, %v2412_v53, %v2421_v48  ;;  %v10224_v53 = vld [vmem:[%s12121_s2 + $0x288] sm:$0xff] }
 0x1be   : > { %3604 = vmatmul.bf16.gmra.mxu2 %v3368_v4  ;;  %v3377_v7 = vsel %vm3270_vm7, %v3367_v15, %v3376_v60 }
 0x1bf   : > { %4023 = vmatmul.bf16.gmra.mxu3 %v3828_v40  ;;  %v3830_v13 = vsel %vm3807_vm8, %v3827_v20, %v3829_v49  ;;  %5313 = vmatpush.bf16.msra.mxu2 %v10224_v53 }
 0x1c1   : > { %v3565_v18 = vpop.f32.mrf.mxu2  ;;  %v2611_v8 = vpop.f32.mrf.mxu0 }
 0x1c2   : > { %v3984_v17 = vpop.f32.mrf.mxu3  ;;  %v3642_v19 = vadd.f32 %v3565_v18, %v3105_v38  ;;  %v3030_v12 = vpop.f32.mrf.mxu1  ;;  %v2687_v47 = vadd.f32 %v2611_v8, %v10811_v33  ;;  %v2874_v38 = vsel %vm2851_vm6, %v2871_v25, %v2873_v62  ;;  %v10124_v18 = vld [vmem:[%s10581_s26 + $0x70] sm:$0xff]  ;;  %v2424_v8 = vshrl.u32 %v10076_v5, 16  ;;  %v10248_v25 = vld [vmem:[%s12121_s2 + $0x2c8] sm:$0xff] }
 0x1c3   : > { %v3379_v15 = vshrl.u32 %v10124_v18, 16  ;;  %v3382_v20 = vshll.u32 %v10124_v18, 16  ;;  %5839 = vmatpush.bf16.msra.mxu3 %v10248_v25  ;;  %v10077_v25 = vld [vmem:[%s10581_s26 + $0x78] sm:$0xff] }
 0x1c4   : > { %v11177_v34 = vadd.f32 %v3984_v17, %v3642_v19  ;;  %v3106_v2 = vadd.f32 %v3030_v12, %v2687_v47  ;;  %v2427_v12 = vshll.u32 %v10076_v5, 16  ;;  %v2426_v51 = vrot.slane %v2424_v8, 1 }
 0x1c6   : > { %v2429_v26 = vrot.slane %v2427_v12, 2 }
 0x1c8   : > { %v2430_v5 = vor.u32 %v2429_v26, %v2426_v51 }
 0x1c9   : > { %v3567_v37 = vpop.f32.mrf.mxu2  ;;  %v2614_v40 = vpop.f32.mrf.mxu0 }
 0x1ca   : > { %v3986_v3 = vpop.f32.mrf.mxu3  ;;  %v3643_v4 = vadd.f32 %v3567_v37, %v3106_v2  ;;  %v3033_v33 = vpop.f32.mrf.mxu1  ;;  %v2688_v63 = vadd.f32 %v2614_v40, %v10824_v52  ;;  %v10177_v52 = vld [vmem:[%s12121_s2 + $0x208] sm:$0xff]  ;;  %v10100_v2 = vld [vmem:[%s10581_s26 + $0x70] sm:$0xff]  ;;  %v2431_v53 = vsel %vm1789_vm2, %v2421_v48, %v2430_v5  ;;  %v2433_v48 = vshrl.u32 %v10077_v25, 16 }
 0x1cb   : > { %4393 = vmatpush.bf16.msra.mxu0 %v10177_v52  ;;  %v10148_v40 = vld [vmem:[%s10581_s26 + $0x70] sm:$0xff] }
 0x1cc   : > { %v11188_v17 = vadd.f32 %v3986_v3, %v3643_v4  ;;  %v3107_v19 = vadd.f32 %v3033_v33, %v2688_v63  ;;  %2653 = vmatmul.bf16.gmra.mxu0 %v2422_v27  ;;  %v3381_v3 = vrot.slane %v3379_v15, 2  ;;  %v3384_v4 = vrot.slane %v3382_v20, 3  ;;  %v10201_v27 = vld [vmem:[%s12121_s2 + $0x248] sm:$0xff] }
 0x1cd   : > { %3072 = vmatmul.bf16.gmra.mxu1 %v2874_v38  ;;  %v2875_v63 = vrot.slane %v10100_v2, 2 }
 0x1ce   : > { %3609 = vmatmul.bf16.gmra.mxu2 %v3377_v7  ;;  %4930 = vmatpush.bf16.msra.mxu1 %v10201_v27  ;;  %v3385_v7 = vor.u32 %v3384_v4, %v3381_v3  ;;  %v11217_v4 = vld [vmem:[%s10581_s26 + $0x78] sm:$0xff] }
 0x1cf   : > { %4028 = vmatmul.bf16.gmra.mxu3 %v3830_v13  ;;  %v3831_v13 = vrot.slane %v10148_v40, 3  ;;  %v2876_v52 = vsel %vm2851_vm6, %v2873_v62, %v2875_v63 }
 0x1d0   : > { %v3386_v20 = vsel %vm3270_vm7, %v3376_v60, %v3385_v7 }
 0x1d1   : > { %v3570_v9 = vpop.f32.mrf.mxu2  ;;  %v2616_v47 = vpop.f32.mrf.mxu0 }
 0x1d2   : > { %v3989_v21 = vpop.f32.mrf.mxu3  ;;  %v3644_v36 = vadd.f32 %v3570_v9, %v3107_v19  ;;  %v3035_v44 = vpop.f32.mrf.mxu1  ;;  %v2689_v37 = vadd.f32 %v2616_v47, %v10834_v6  ;;  %v3832_v9 = vsel %vm3807_vm8, %v3829_v49, %v3831_v13  ;;  %v2435_v49 = vrot.slane %v2433_v48, 1  ;;  %v10078_v48 = vld [vmem:[%s10886_s30] sm:$0xff] }
 0x1d4   : > { %v11202_v33 = vadd.f32 %v3989_v21, %v3644_v36  ;;  %v3108_v38 = vadd.f32 %v3035_v44, %v2689_v37  ;;  %v10125_v21 = vld [vmem:[%s10581_s26 + $0x78] sm:$0xff]  ;;  %v2436_v44 = vshll.u32 %v10077_v25, 16 }
 0x1d5   : > { %v3388_v62 = vshrl.u32 %v10125_v21, 16  ;;  %v3391_v51 = vshll.u32 %v10125_v21, 16 }
 0x1d6   : > { %v2438_v3 = vrot.slane %v2436_v44, 2 }
 0x1d7   : > { %v3390_v27 = vrot.slane %v3388_v62, 2 }
 0x1d9   : > { %v3572_v18 = vpop.f32.mrf.mxu2  ;;  %v2619_v8 = vpop.f32.mrf.mxu0 }
 0x1da   : > { %v3991_v19 = vpop.f32.mrf.mxu3  ;;  %v3645_v6 = vadd.f32 %v3572_v18, %v3108_v38  ;;  %v3038_v12 = vpop.f32.mrf.mxu1  ;;  %v2690_v15 = vadd.f32 %v2619_v8, %v10840_v22  ;;  %v3393_v38 = vrot.slane %v3391_v51, 3  ;;  %v11221_v18 = vld [vmem:[%s10581_s26 + $0x78] sm:$0xff]  ;;  %v11225_v8 = vor.u32 %v2438_v3, %v2435_v49 }
 0x1dc   : > { %v11214_v36 = vadd.f32 %v3991_v19, %v3645_v6  ;;  %v3109_v47 = vadd.f32 %v3038_v12, %v2690_v15  ;;  %2658 = vmatmul.bf16.gmra.mxu0 %v2431_v53  ;;  %v2877_v12 = vrot.slane %v11217_v4, 2  ;;  %v11228_v53 = vor.u32 %v3393_v38, %v3390_v27 }
 0x1dd   : > { %3077 = vmatmul.bf16.gmra.mxu1 %v2876_v52  ;;  %v3833_v52 = vrot.slane %v11221_v18, 3  ;;  %v2440_v21 = vsel %vm1789_vm2, %v2430_v5, %v11225_v8  ;;  %v2472_v5 = vshll.u32 %v10078_v48, 16 }
 0x1de   : > { %3614 = vmatmul.bf16.gmra.mxu2 %v3386_v20  ;;  %v3395_v62 = vsel %vm3270_vm7, %v3385_v7, %v11228_v53  ;;  %v10247_v7 = vld [vmem:[%s12121_s2 + $0x2c0] sm:$0xff] }
 0x1df   : > { %4033 = vmatmul.bf16.gmra.mxu3 %v3832_v9  ;;  %v3834_v51 = vsel %vm3807_vm8, %v3831_v13, %v3833_v52  ;;  %v2474_v18 = vrot.slane %v2472_v5, 2 }
 0x1e0   : > { %5840 = vmatpush.bf16.msra.mxu3 %v10247_v7 }
 0x1e1   : > { %v3575_v26 = vpop.f32.mrf.mxu2  ;;  %v2621_v60 = vpop.f32.mrf.mxu0 }
 0x1e2   : > { %v3994_v22 = vpop.f32.mrf.mxu3  ;;  %v3646_v2 = vadd.f32 %v3575_v26, %v3109_v47  ;;  %v3040_v37 = vpop.f32.mrf.mxu1  ;;  %v2691_v40 = vadd.f32 %v2621_v60, %v10848_v39  ;;  %v2878_v47 = vsel %vm2851_vm6, %v2875_v63, %v2877_v12  ;;  %v10126_v26 = vld [vmem:[%s10886_s30] sm:$0xff]  ;;  %v2469_v60 = vshrl.u32 %v10078_v48, 16 }
 0x1e3   : > { %v10176_v63 = vld [vmem:[%s12121_s2 + $0x200] sm:$0xff]  ;;  %v3424_v13 = vshrl.u32 %v10126_v26, 16 }
 0x1e4   : > { %v11223_v19 = vadd.f32 %v3994_v22, %v3646_v2  ;;  %v3110_v6 = vadd.f32 %v3040_v37, %v2691_v40  ;;  %v3427_v37 = vshll.u32 %v10126_v26, 16  ;;  %4394 = vmatpush.bf16.msra.mxu0 %v10176_v63  ;;  %v2471_v38 = vrot.slane %v2469_v60, 1 }
 0x1e6   : > { %v2475_v48 = vor.u32 %v2474_v18, %v2471_v38 }
 0x1e8   : > { %v2497_v63 = vsel %vm10936_vm5, %v11225_v8, %v2475_v48 }
 0x1e9   : > { %v3577_v25 = vpop.f32.mrf.mxu2  ;;  %v2624_v20 = vpop.f32.mrf.mxu0 }
 0x1ea   : > { %v3996_v15 = vpop.f32.mrf.mxu3  ;;  %v3647_v39 = vadd.f32 %v3577_v25, %v3110_v6  ;;  %v3043_v9 = vpop.f32.mrf.mxu1  ;;  %v2692_v44 = vadd.f32 %v2624_v20, %v10867_v59  ;;  %v10223_v59 = vld [vmem:[%s12121_s2 + $0x280] sm:$0xff] }
 0x1eb   : > { %5314 = vmatpush.bf16.msra.mxu2 %v10223_v59  ;;  %v11252_v6 = vld [vmem:[%s10886_s30] sm:$0xff] }
 0x1ec   : > { %v11240_v22 = vadd.f32 %v3996_v15, %v3647_v39  ;;  %v3111_v2 = vadd.f32 %v3043_v9, %v2692_v44  ;;  %2663 = vmatmul.bf16.gmra.mxu0 %v2440_v21  ;;  %v3426_v15 = vrot.slane %v3424_v13, 2  ;;  %v3429_v39 = vrot.slane %v3427_v37, 3  ;;  %v11256_v20 = vld [vmem:[%s10886_s30] sm:$0xff]  ;;  %v10079_v13 = vld [vmem:[%s10886_s30 + $0x8] sm:$0xff] }
 0x1ed   : > { %3082 = vmatmul.bf16.gmra.mxu1 %v2878_v47  ;;  %v10200_v21 = vld [vmem:[%s12121_s2 + $0x240] sm:$0xff]  ;;  %v2905_v44 = vrot.slane %v11252_v6, 2  ;;  %v2477_v29 = vshrl.u32 %v10079_v13, 16  ;;  %v2480_v8 = vshll.u32 %v10079_v13, 16 }
 0x1ee   : > { %3619 = vmatmul.bf16.gmra.mxu2 %v3395_v62  ;;  %4931 = vmatpush.bf16.msra.mxu1 %v10200_v21  ;;  %v3430_v62 = vor.u32 %v3429_v39, %v3426_v15  ;;  %v11285_v39 = vld [vmem:[%s10886_s30 + $0x8] sm:$0xff] }
 0x1ef   : > { %4038 = vmatmul.bf16.gmra.mxu3 %v3834_v51  ;;  %v2915_v7 = vsel %vm2851_vm6, %v2877_v12, %v2905_v44  ;;  %v2482_v15 = vrot.slane %v2480_v8, 2  ;;  %v11289_v51 = vld [vmem:[%s10886_s30 + $0x8] sm:$0xff] }
 0x1f1   : > { %v3580_v49 = vpop.f32.mrf.mxu2  ;;  %v2626_v40 = vpop.f32.mrf.mxu0 }
 0x1f2   : > { %v3999_v3 = vpop.f32.mrf.mxu3  ;;  %v3648_v4 = vadd.f32 %v3580_v49, %v3111_v2  ;;  %v3045_v27 = vpop.f32.mrf.mxu1  ;;  %v2693_v25 = vadd.f32 %v2626_v40, %v10878_v14  ;;  %v3861_v14 = vrot.slane %v11256_v20, 3  ;;  %v3453_v49 = vsel %vm11267_vm9, %v11228_v53, %v3430_v62 }
 0x1f4   : > { %v11258_v9 = vadd.f32 %v3999_v3, %v3648_v4  ;;  %v3112_v47 = vadd.f32 %v3045_v27, %v2693_v25  ;;  %v3871_v3 = vsel %vm3807_vm8, %v3833_v52, %v3861_v14  ;;  %v10127_v4 = vld [vmem:[%s10886_s30 + $0x8] sm:$0xff]  ;;  %v2479_v25 = vrot.slane %v2477_v29, 1 }
 0x1f5   : > { %v3435_v12 = vshll.u32 %v10127_v4, 16 }
 0x1f9   : > { %v3582_v26 = vpop.f32.mrf.mxu2  ;;  %v2629_v5 = vpop.f32.mrf.mxu0 }
 0x1fa   : > { %v4001_v2 = vpop.f32.mrf.mxu3  ;;  %v3649_v60 = vadd.f32 %v3582_v26, %v3112_v47  ;;  %v3048_v59 = vpop.f32.mrf.mxu1  ;;  %v2694_v37 = vadd.f32 %v2629_v5, %v10893_v31  ;;  %v3432_v31 = vshrl.u32 %v10127_v4, 16  ;;  %v3437_v47 = vrot.slane %v3435_v12, 3  ;;  %v2245_v26 = vld [vmem:[%s10886_s30 + $0x10] sm:$0x3] }
 0x1fc   : > { %v11282_v40 = vadd.f32 %v4001_v2, %v3649_v60  ;;  %v3113_v27 = vadd.f32 %v3048_v59, %v2694_v37  ;;  %2668 = vmatmul.bf16.gmra.mxu0 %v2497_v63  ;;  %v3434_v21 = vrot.slane %v3432_v31, 2  ;;  %v3199_v60 = vld [vmem:[%s10886_s30 + $0x10] sm:$0x7]  ;;  %v11295_v59 = vor.u32 %v2482_v15, %v2479_v25 }
 0x1fd   : > { %3087 = vmatmul.bf16.gmra.mxu1 %v2915_v7  ;;  %v2906_v63 = vrot.slane %v11285_v39, 2  ;;  %v2464_v7 = vunpack.c.l.b16 %v2245_v26  ;;  %v3862_v37 = vrot.slane %v11289_v51, 3  ;;  %v3736_v15 = vld [vmem:[%s10886_s30 + $0x10] sm:$0x7] }
 0x1fe   : > { %3624 = vmatmul.bf16.gmra.mxu2 %v3453_v49  ;;  %v11298_v13 = vor.u32 %v3437_v47, %v3434_v21  ;;  %v2484_v8 = vsel %vm1789_vm2, %v2475_v48, %v11295_v59  ;;  %v10350_v21 = vld [vmem:[%s12121_s2 + $0x3f8] sm:$0xff] }
 0x1ff   : > { %4043 = vmatmul.bf16.gmra.mxu3 %v3871_v3  ;;  %v2907_v31 = vsel %vm2851_vm6, %v2905_v44, %v2906_v63  ;;  %v2467_v12 = vpack.c.b16 %v2464_v7, %v2464_v7 }
 0x200   : > { %7733 = vmatpush.bf16.msrb.mxu3 %v10350_v21 }
 0x201   : > { %v3585_v38 = vpop.f32.mrf.mxu2  ;;  %v2631_v52 = vpop.f32.mrf.mxu0  ;;  %v2486_v44 = vshrl.u32 %v2467_v12, 16 }
 0x202   : > { %v4004_v53 = vpop.f32.mrf.mxu3  ;;  %v3650_v18 = vadd.f32 %v3585_v38, %v3113_v27  ;;  %v3050_v6 = vpop.f32.mrf.mxu1  ;;  %v2695_v20 = vadd.f32 %v2631_v52, %v10907_v55  ;;  %v3419_v55 = vunpack.c.l.b16 %v3199_v60  ;;  %v2780_v52 = vld [vmem:[%s10886_s30 + $0x10] sm:$0x3]  ;;  %v3857_v60 = vunpack.c.l.b16 %v3736_v15 }
 0x204   : > { %v11292_v2 = vadd.f32 %v4004_v53, %v3650_v18  ;;  %v3114_v5 = vadd.f32 %v3050_v6, %v2695_v20  ;;  %v3439_v53 = vsel %vm3270_vm7, %v3430_v62, %v11298_v13  ;;  %v3863_v18 = vsel %vm3807_vm8, %v3861_v14, %v3862_v37  ;;  %v10326_v62 = vld [vmem:[%s12121_s2 + $0x3b8] sm:$0xff] }
 0x205   : > { %v3422_v6 = vpack.c.b16 %v3419_v55, %v3419_v55  ;;  %v2489_v20 = vshll.u32 %v2467_v12, 16  ;;  %v10278_v14 = vld [vmem:[%s12121_s2 + $0x338] sm:$0xff]  ;;  %7314 = vmatpush.bf16.msrb.mxu2 %v10326_v62  ;;  %v10184_v62 = vld [vmem:[%s10581_s26 + $0x20] sm:$0xf0] }
 0x206   : > { %6358 = vmatpush.bf16.msrb.mxu0 %v10278_v14 }
 0x207   : > { %v3441_v47 = vshrl.u32 %v3422_v6, 16  ;;  %v3444_v26 = vshll.u32 %v3422_v6, 16 }
 0x209   : > { %v3587_v49 = vpop.f32.mrf.mxu2  ;;  %v2634_v27 = vpop.f32.mrf.mxu0  ;;  %v3446_v12 = vrot.slane %v3444_v26, 3 }
 0x20a   : > { %v4006_v3 = vpop.f32.mrf.mxu3  ;;  %v3651_v4 = vadd.f32 %v3587_v49, %v3114_v5  ;;  %v3053_v29 = vpop.f32.mrf.mxu1  ;;  %v2696_v38 = vadd.f32 %v2634_v27, %v10920_v16  ;;  %v2901_v16 = vunpack.c.l.b16 %v2780_v52  ;;  %v2491_v27 = vrot.slane %v2489_v20, 2 }
 0x20c   : > { %v11313_v25 = vadd.f32 %v4006_v3, %v3651_v4  ;;  %v3115_v48 = vadd.f32 %v3053_v29, %v2696_v38  ;;  %2673 = vmatmul.bf16.gmra.mxu0 %v2484_v8  ;;  %v2488_v4 = vrot.slane %v2486_v44, 1  ;;  %v2904_v29 = vpack.c.b16 %v2901_v16, %v2901_v16 }
 0x20d   : > { %3092 = vmatmul.bf16.gmra.mxu1 %v2907_v31  ;;  %v3443_v31 = vrot.slane %v3441_v47, 2  ;;  %v3860_v38 = vpack.c.b16 %v3857_v60, %v3857_v60 }
 0x20e   : > { %3629 = vmatmul.bf16.gmra.mxu2 %v3439_v53  ;;  %v2492_v6 = vor.u32 %v2491_v27, %v2488_v4  ;;  %v2908_v15 = vrot.slane %v2904_v29, 2  ;;  %v10231_v4 = vld [vmem:[%s10581_s26 + $0x24] sm:$0xff] }
 0x20f   : > { %4048 = vmatmul.bf16.gmra.mxu3 %v3863_v18  ;;  %v10302_v18 = vld [vmem:[%s12121_s2 + $0x378] sm:$0xff]  ;;  %v3447_v44 = vor.u32 %v3446_v12, %v3443_v31  ;;  %v3864_v20 = vrot.slane %v3860_v38, 3  ;;  %v5554_v51 = vshll.u32 %v10231_v4, 16 }
 0x210   : > { %6777 = vmatpush.bf16.msrb.mxu1 %v10302_v18  ;;  %v2493_v60 = vsel %vm1789_vm2, %v11295_v59, %v2492_v6 }
 0x211   : > { %v3590_v5 = vpop.f32.mrf.mxu2  ;;  %v2636_v49 = vpop.f32.mrf.mxu0 }
 0x212   : > { %v4009_v7 = vpop.f32.mrf.mxu3  ;;  %v3652_v55 = vadd.f32 %v3590_v5, %v3115_v48  ;;  %v3055_v3 = vpop.f32.mrf.mxu1  ;;  %v2697_v8 = vadd.f32 %v2636_v49, %v10951_v50  ;;  %v9186_v48 = vld [vmem:[%s10581_s26 + $0x20] sm:$0x8]  ;;  %v2909_v5 = vsel %vm2851_vm6, %v2906_v63, %v2908_v15  ;;  %v3448_v49 = vsel %vm3270_vm7, %v11298_v13, %v3447_v44  ;;  %v10160_v63 = vld [vmem:[%s10581_s26 + $0x20] sm:$0xf0]  ;;  %v11351_v13 = vld [vmem:[%s10581_s26 + $0x2c] sm:$0xff] }
 0x213   : > { %v9187_v14 = vor.u32 %v10184_v62, %v9186_v48  ;;  %v11354_v48 = vld [vmem:[%s10581_s26 + $0x28] sm:$0xff] }
 0x214   : > { %v11326_v53 = vadd.f32 %v4009_v7, %v3652_v55  ;;  %v3116_v52 = vadd.f32 %v3055_v3, %v2697_v8  ;;  %v10185_v7 = vld [vmem:[%s10581_s26 + $0x28] sm:$0xff]  ;;  %v3865_v3 = vsel %vm3807_vm8, %v3862_v37, %v3864_v20 }
 0x215   : > { %v4635_v39 = vshrl.u32 %v9187_v14, 16  ;;  %v4638_v29 = vshll.u32 %v9187_v14, 16  ;;  %v4643_v8 = vshrl.u32 %v10185_v7, 16  ;;  %v4646_v31 = vshll.u32 %v10185_v7, 16 }
 0x216   : > { %v5556_v14 = vrot.slane %v5554_v51, 1 }
 0x217   : > { %v4637_v18 = vrot.slane %v4635_v39, 3  ;;  %v4640_v62 = vrot.slane %v4638_v29, 4  ;;  %v4645_v44 = vrot.slane %v4643_v8, 3  ;;  %v4648_v20 = vrot.slane %v4646_v31, 4  ;;  %v10208_v8 = vld [vmem:[%s10581_s26 + $0x24] sm:$0xff]  ;;  %v10186_v31 = vld [vmem:[%s10581_s26 + $0x30] sm:$0xff] }
 0x219   : > { %v3592_v50 = vpop.f32.mrf.mxu2  ;;  %v2639_v47 = vpop.f32.mrf.mxu0  ;;  %v4641_v7 = vor.u32 %v4640_v62, %v4637_v18  ;;  %v4652_v18 = vshrl.u32 %v10186_v31, 16 }
 0x21a   : > { %v4011_v16 = vpop.f32.mrf.mxu3  ;;  %v3653_v21 = vadd.f32 %v3592_v50, %v3116_v52  ;;  %v3058_v26 = vpop.f32.mrf.mxu1  ;;  %v2698_v55 = vadd.f32 %v2639_v47, %v10963_v23  ;;  %v9074_v23 = vld [vmem:[%s10581_s26 + $0x20] sm:$0x8] }
 0x21b   : > { %v9075_v38 = vor.u32 %v10160_v63, %v9074_v23 }
 0x21c   : > { %v11346_v27 = vadd.f32 %v4011_v16, %v3653_v21  ;;  %v3117_v59 = vadd.f32 %v3058_v26, %v2698_v55  ;;  %2678 = vmatmul.bf16.gmra.mxu0 %v2493_v60  ;;  %v5552_v16 = vshrl.u32 %v10231_v4, 16  ;;  %v5559_v21 = vshll.u32 %v11351_v13, 16 }
 0x21d   : > { %3097 = vmatmul.bf16.gmra.mxu1 %v2909_v5  ;;  %v4216_v60 = vrot.slane %v9075_v38, 3  ;;  %v4217_v5 = vrot.slane %v11354_v48, 3  ;;  %v4649_v55 = vor.u32 %v4648_v20, %v4645_v44  ;;  %v10233_v48 = vld [vmem:[%s10581_s26 + $0x34] sm:$0xff] }
 0x21e   : > { %3634 = vmatmul.bf16.gmra.mxu2 %v3448_v49  ;;  %v5557_v49 = vor.u32 %v5556_v14, %v5552_v16  ;;  %v10162_v14 = vld [vmem:[%s10581_s26 + $0x30] sm:$0xff] }
 0x21f   : > { %4053 = vmatmul.bf16.gmra.mxu3 %v3865_v3  ;;  %v5561_v3 = vrot.slane %v5559_v21, 1  ;;  %v4218_v23 = vsel %vm3807_vm8, %v4216_v60, %v4217_v5  ;;  %v4650_v63 = vsel %vm4633_vm10, %v4641_v7, %v4649_v55  ;;  %v4654_v21 = vrot.slane %v4652_v18, 3  ;;  %v10209_v18 = vld [vmem:[%s10581_s26 + $0x2c] sm:$0xff] }
 0x220   : > { %v5563_v7 = vshrl.u32 %v11351_v13, 16 }
 0x221   : > { %v3595_v12 = vpop.f32.mrf.mxu2  ;;  %v2641_v6 = vpop.f32.mrf.mxu0 }
 0x222   : > { %v4014_v37 = vpop.f32.mrf.mxu3  ;;  %v3654_v52 = vadd.f32 %v3595_v12, %v3117_v59  ;;  %v3060_v15 = vpop.f32.mrf.mxu1  ;;  %v2699_v50 = vadd.f32 %v2641_v6, %v10973_v54  ;;  %v5562_v12 = vsel %vm852_vm0, %v5557_v49, %v5561_v3  ;;  %v10325_v6 = vld [vmem:[%s12121_s2 + $0x3b0] sm:$0xff]  ;;  %v5567_v49 = vshll.u32 %v10233_v48, 16 }
 0x223   : > { %7315 = vmatpush.bf16.msrb.mxu2 %v10325_v6 }
 0x224   : > { %v11358_v47 = vadd.f32 %v4014_v37, %v3654_v52  ;;  %v3118_v26 = vadd.f32 %v3060_v15, %v2699_v50  ;;  %v4655_v52 = vshll.u32 %v10186_v31, 16  ;;  %v10349_v15 = vld [vmem:[%s12121_s2 + $0x3f0] sm:$0xff] }
 0x225   : > { %7734 = vmatpush.bf16.msrb.mxu3 %v10349_v15 }
 0x229   : > { %v3597_v59 = vpop.f32.mrf.mxu2  ;;  %v2644_v4 = vpop.f32.mrf.mxu0 }
 0x22a   : > { %v4016_v39 = vpop.f32.mrf.mxu3  ;;  %v3655_v54 = vadd.f32 %v3597_v59, %v3118_v26  ;;  %v3063_v29 = vpop.f32.mrf.mxu1  ;;  %v2700_v51 = vadd.f32 %v2644_v4, %v10986_v11  ;;  %v10277_v11 = vld [vmem:[%s12121_s2 + $0x330] sm:$0xff]  ;;  %v4657_v26 = vrot.slane %v4655_v52, 4  ;;  %v4219_v4 = vrot.slane %v10162_v14, 3  ;;  %v10187_v52 = vld [vmem:[%s10581_s26 + $0x38] sm:$0xff] }
 0x22b   : > { %6359 = vmatpush.bf16.msrb.mxu0 %v10277_v11 }
 0x22c   : > { %v11367_v37 = vadd.f32 %v4016_v39, %v3655_v54  ;;  %v3119_v38 = vadd.f32 %v3063_v29, %v2700_v51  ;;  %4395 = vmatmul.bf16.vlgmr.msra.gmra.mxu0 %v4218_v23  ;;  %v10301_v39 = vld [vmem:[%s12121_s2 + $0x370] sm:$0xff]  ;;  %v4658_v29 = vor.u32 %v4657_v26, %v4654_v21  ;;  %v5565_v23 = vor.u32 %v5563_v7, %v5561_v3  ;;  %v11397_v21 = vld [vmem:[%s10581_s26 + $0x38] sm:$0xff] }
 0x22d   : > { %4932 = vmatmul.bf16.vlgmr.msra.gmra.mxu1 %v4650_v63  ;;  %v5569_v63 = vrot.slane %v5567_v49, 1  ;;  %v5571_v7 = vshrl.u32 %v10233_v48, 16  ;;  %v10210_v48 = vld [vmem:[%s10581_s26 + $0x34] sm:$0xff] }
 0x22e   : > { %5315 = vmatmul.bf16.vlgmr.msra.gmra.mxu2 %v10208_v8  ;;  %6778 = vmatpush.bf16.msrb.mxu1 %v10301_v39 }
 0x22f   : > { %5841 = vmatmul.bf16.vlgmr.msra.gmra.mxu3 %v5562_v12  ;;  %v4220_v12 = vsel %vm3807_vm8, %v4217_v5, %v4219_v4  ;;  %v5570_v11 = vsel %vm852_vm0, %v5565_v23, %v5569_v63  ;;  %v4221_v23 = vrot.slane %v11397_v21, 3 }
 0x231   : > { %v3600_v62 = vpop.f32.mrf.mxu2  ;;  %v2646_v50 = vpop.f32.mrf.mxu0 }
 0x232   : > { %v4019_v44 = vpop.f32.mrf.mxu3  ;;  %v3656_v20 = vadd.f32 %v3600_v62, %v3119_v38  ;;  %v3065_v16 = vpop.f32.mrf.mxu1  ;;  %v2701_v60 = vadd.f32 %v2646_v50, %v10997_v45  ;;  %v4659_v38 = vsel %vm4633_vm10, %v4649_v55, %v4658_v29  ;;  %v4661_v62 = vshrl.u32 %v10187_v52, 16 }
 0x234   : > { %v11382_v59 = vadd.f32 %v4019_v44, %v3656_v20  ;;  %v3120_v54 = vadd.f32 %v3065_v16, %v2701_v60  ;;  %v4664_v44 = vshll.u32 %v10187_v52, 16  ;;  %v10234_v20 = vld [vmem:[%s10581_s26 + $0x3c] sm:$0xff]  ;;  %v4222_v52 = vsel %vm3807_vm8, %v4219_v4, %v4221_v23  ;;  %v10324_v4 = vld [vmem:[%s12121_s2 + $0x3a8] sm:$0xff] }
 0x235   : > { %v5575_v49 = vshll.u32 %v10234_v20, 16  ;;  %7316 = vmatpush.bf16.msrb.mxu2 %v10324_v4 }
 0x236   : > { %v4666_v26 = vrot.slane %v4664_v44, 4 }
 0x239   : > { %v3602_v8 = vpop.f32.mrf.mxu2  ;;  %v2649_v51 = vpop.f32.mrf.mxu0 }
 0x23a   : > { %v4021_v31 = vpop.f32.mrf.mxu3  ;;  %v3657_v45 = vadd.f32 %v3602_v8, %v3120_v54  ;;  %v3068_v13 = vpop.f32.mrf.mxu1  ;;  %v2702_v6 = vadd.f32 %v2649_v51, %v11005_v61  ;;  %v4663_v61 = vrot.slane %v4661_v62, 3 }
 0x23c   : > { %v11393_v15 = vadd.f32 %v4021_v31, %v3657_v45  ;;  %v3121_v3 = vadd.f32 %v3068_v13, %v2702_v6  ;;  %4400 = vmatmul.bf16.gmra.mxu0 %v4220_v12  ;;  %v4667_v8 = vor.u32 %v4666_v26, %v4663_v61  ;;  %v5573_v31 = vor.u32 %v5571_v7, %v5569_v63  ;;  %v10188_v6 = vld [vmem:[%s10581_s26 + $0x40] sm:$0xff] }
 0x23d   : > { %4937 = vmatmul.bf16.gmra.mxu1 %v4659_v38  ;;  %v5577_v45 = vrot.slane %v5575_v49, 1  ;;  %v4670_v44 = vshrl.u32 %v10188_v6, 16  ;;  %v10164_v26 = vld [vmem:[%s10581_s26 + $0x40] sm:$0xff] }
 0x23e   : > { %5320 = vmatmul.bf16.gmra.mxu2 %v10209_v18 }
 0x23f   : > { %5846 = vmatmul.bf16.gmra.mxu3 %v5570_v11 }
 0x241   : > { %v3605_v5 = vpop.f32.mrf.mxu2  ;;  %v2651_v16 = vpop.f32.mrf.mxu0 }
 0x242   : > { %v4024_v50 = vpop.f32.mrf.mxu3  ;;  %v3658_v55 = vadd.f32 %v3605_v5, %v3121_v3  ;;  %v3070_v14 = vpop.f32.mrf.mxu1  ;;  %v2703_v60 = vadd.f32 %v2651_v16, %v11015_v30  ;;  %v4668_v30 = vsel %vm4633_vm10, %v4658_v29, %v4667_v8  ;;  %v5578_v3 = vsel %vm852_vm0, %v5573_v31, %v5577_v45  ;;  %v10348_v29 = vld [vmem:[%s12121_s2 + $0x3e8] sm:$0xff] }
 0x243   : > { %v4673_v5 = vshll.u32 %v10188_v6, 16  ;;  %7735 = vmatpush.bf16.msrb.mxu3 %v10348_v29 }
 0x244   : > { %v11400_v39 = vadd.f32 %v4024_v50, %v3658_v55  ;;  %v3122_v54 = vadd.f32 %v3070_v14, %v2703_v60  ;;  %v10235_v50 = vld [vmem:[%s10581_s26 + $0x44] sm:$0xff]  ;;  %v4672_v60 = vrot.slane %v4670_v44, 3  ;;  %v10211_v44 = vld [vmem:[%s10581_s26 + $0x3c] sm:$0xff] }
 0x245   : > { %v4675_v7 = vrot.slane %v4673_v5, 4  ;;  %v5583_v31 = vshll.u32 %v10235_v50, 16  ;;  %v10189_v5 = vld [vmem:[%s10581_s26 + $0x48] sm:$0xff] }
 0x249   : > { %v3607_v51 = vpop.f32.mrf.mxu2  ;;  %v2654_v38 = vpop.f32.mrf.mxu0 }
 0x24a   : > { %v4026_v13 = vpop.f32.mrf.mxu3  ;;  %v3659_v12 = vadd.f32 %v3607_v51, %v3122_v54  ;;  %v3073_v18 = vpop.f32.mrf.mxu1  ;;  %v2704_v11 = vadd.f32 %v2654_v38, %v11028_v32  ;;  %v10276_v32 = vld [vmem:[%s12121_s2 + $0x328] sm:$0xff]  ;;  %v5579_v54 = vshrl.u32 %v10234_v20, 16  ;;  %v4223_v38 = vrot.slane %v10164_v26, 3 }
 0x24b   : > { %6360 = vmatpush.bf16.msrb.mxu0 %v10276_v32 }
 0x24c   : > { %v11409_v62 = vadd.f32 %v4026_v13, %v3659_v12  ;;  %v3123_v63 = vadd.f32 %v3073_v18, %v2704_v11  ;;  %4405 = vmatmul.bf16.gmra.mxu0 %v4222_v52  ;;  %v10300_v13 = vld [vmem:[%s12121_s2 + $0x368] sm:$0xff]  ;;  %v4676_v18 = vor.u32 %v4675_v7, %v4672_v60  ;;  %v5581_v52 = vor.u32 %v5579_v54, %v5577_v45 }
 0x24d   : > { %4942 = vmatmul.bf16.gmra.mxu1 %v4668_v30  ;;  %v5585_v30 = vrot.slane %v5583_v31, 1  ;;  %v11438_v60 = vld [vmem:[%s10581_s26 + $0x48] sm:$0xff]  ;;  %v5587_v54 = vshrl.u32 %v10235_v50, 16 }
 0x24e   : > { %5325 = vmatmul.bf16.gmra.mxu2 %v10210_v48  ;;  %6779 = vmatpush.bf16.msrb.mxu1 %v10300_v13  ;;  %v10212_v50 = vld [vmem:[%s10581_s26 + $0x44] sm:$0xff] }
 0x24f   : > { %5851 = vmatmul.bf16.gmra.mxu3 %v5578_v3  ;;  %v4224_v3 = vsel %vm3807_vm8, %v4221_v23, %v4223_v38  ;;  %v5586_v32 = vsel %vm852_vm0, %v5581_v52, %v5585_v30  ;;  %v4225_v52 = vrot.slane %v11438_v60, 3 }
 0x251   : > { %v3610_v55 = vpop.f32.mrf.mxu2  ;;  %v2656_v21 = vpop.f32.mrf.mxu0 }
 0x252   : > { %v4029_v16 = vpop.f32.mrf.mxu3  ;;  %v3660_v14 = vadd.f32 %v3610_v55, %v3123_v63  ;;  %v3075_v61 = vpop.f32.mrf.mxu1  ;;  %v2705_v49 = vadd.f32 %v2656_v21, %v11039_v24  ;;  %v4677_v63 = vsel %vm4633_vm10, %v4667_v8, %v4676_v18  ;;  %v4679_v55 = vshrl.u32 %v10189_v5, 16 }
 0x254   : > { %v11423_v51 = vadd.f32 %v4029_v16, %v3660_v14  ;;  %v3124_v12 = vadd.f32 %v3075_v61, %v2705_v49  ;;  %v4682_v16 = vshll.u32 %v10189_v5, 16  ;;  %v10236_v14 = vld [vmem:[%s10581_s26 + $0x4c] sm:$0xff]  ;;  %v4226_v5 = vsel %vm3807_vm8, %v4223_v38, %v4225_v52  ;;  %v10323_v38 = vld [vmem:[%s12121_s2 + $0x3a0] sm:$0xff] }
 0x255   : > { %v5591_v31 = vshll.u32 %v10236_v14, 16  ;;  %7317 = vmatpush.bf16.msrb.mxu2 %v10323_v38 }
 0x256   : > { %v4684_v7 = vrot.slane %v4682_v16, 4 }
 0x259   : > { %v3612_v48 = vpop.f32.mrf.mxu2  ;;  %v2659_v24 = vpop.f32.mrf.mxu0 }
 0x25a   : > { %v4031_v6 = vpop.f32.mrf.mxu3  ;;  %v3661_v11 = vadd.f32 %v3612_v48, %v3124_v12  ;;  %v3078_v20 = vpop.f32.mrf.mxu1  ;;  %v2706_v4 = vadd.f32 %v2659_v24, %v11047_v46  ;;  %v4681_v46 = vrot.slane %v4679_v55, 3 }
 0x25c   : > { %v11434_v29 = vadd.f32 %v4031_v6, %v3661_v11  ;;  %v3125_v45 = vadd.f32 %v3078_v20, %v2706_v4  ;;  %4410 = vmatmul.bf16.gmra.mxu0 %v4224_v3  ;;  %v4685_v48 = vor.u32 %v4684_v7, %v4681_v46  ;;  %v5589_v6 = vor.u32 %v5587_v54, %v5585_v30  ;;  %v10190_v4 = vld [vmem:[%s10581_s26 + $0x50] sm:$0xff] }
 0x25d   : > { %4947 = vmatmul.bf16.gmra.mxu1 %v4677_v63  ;;  %v5593_v11 = vrot.slane %v5591_v31, 1  ;;  %v4688_v16 = vshrl.u32 %v10190_v4, 16  ;;  %v10166_v7 = vld [vmem:[%s10581_s26 + $0x50] sm:$0xff] }
 0x25e   : > { %5330 = vmatmul.bf16.gmra.mxu2 %v10211_v44 }
 0x25f   : > { %5856 = vmatmul.bf16.gmra.mxu3 %v5586_v32 }
 0x261   : > { %v3615_v23 = vpop.f32.mrf.mxu2  ;;  %v2661_v61 = vpop.f32.mrf.mxu0 }
 0x262   : > { %v4034_v21 = vpop.f32.mrf.mxu3  ;;  %v3662_v8 = vadd.f32 %v3615_v23, %v3125_v45  ;;  %v3080_v26 = vpop.f32.mrf.mxu1  ;;  %v2707_v49 = vadd.f32 %v2661_v61, %v11057_v10  ;;  %v4686_v10 = vsel %vm4633_vm10, %v4676_v18, %v4685_v48  ;;  %v5594_v45 = vsel %vm852_vm0, %v5589_v6, %v5593_v11  ;;  %v10347_v18 = vld [vmem:[%s12121_s2 + $0x3e0] sm:$0xff] }
 0x263   : > { %v4691_v23 = vshll.u32 %v10190_v4, 16  ;;  %7736 = vmatpush.bf16.msrb.mxu3 %v10347_v18 }
 0x264   : > { %v11441_v13 = vadd.f32 %v4034_v21, %v3662_v8  ;;  %v3126_v12 = vadd.f32 %v3080_v26, %v2707_v49  ;;  %v10237_v21 = vld [vmem:[%s10581_s26 + $0x54] sm:$0xff]  ;;  %v4690_v49 = vrot.slane %v4688_v16, 3  ;;  %v10213_v16 = vld [vmem:[%s10581_s26 + $0x4c] sm:$0xff] }
 0x265   : > { %v4693_v54 = vrot.slane %v4691_v23, 4  ;;  %v5599_v6 = vshll.u32 %v10237_v21, 16  ;;  %v10191_v23 = vld [vmem:[%s10581_s26 + $0x58] sm:$0xff] }
 0x269   : > { %v3617_v24 = vpop.f32.mrf.mxu2  ;;  %v2664_v63 = vpop.f32.mrf.mxu0 }
 0x26a   : > { %v4036_v20 = vpop.f32.mrf.mxu3  ;;  %v3663_v3 = vadd.f32 %v3617_v24, %v3126_v12  ;;  %v3083_v44 = vpop.f32.mrf.mxu1  ;;  %v2708_v32 = vadd.f32 %v2664_v63, %v11070_v41  ;;  %v10275_v41 = vld [vmem:[%s12121_s2 + $0x320] sm:$0xff]  ;;  %v5595_v12 = vshrl.u32 %v10236_v14, 16  ;;  %v4227_v63 = vrot.slane %v10166_v7, 3 }
 0x26b   : > { %6361 = vmatpush.bf16.msrb.mxu0 %v10275_v41 }
 0x26c   : > { %v11450_v55 = vadd.f32 %v4036_v20, %v3663_v3  ;;  %v3127_v30 = vadd.f32 %v3083_v44, %v2708_v32  ;;  %4415 = vmatmul.bf16.gmra.mxu0 %v4226_v5  ;;  %v10299_v20 = vld [vmem:[%s12121_s2 + $0x360] sm:$0xff]  ;;  %v4694_v44 = vor.u32 %v4693_v54, %v4690_v49  ;;  %v5597_v5 = vor.u32 %v5595_v12, %v5593_v11  ;;  %v11479_v49 = vld [vmem:[%s10581_s26 + $0x58] sm:$0xff] }
 0x26d   : > { %4952 = vmatmul.bf16.gmra.mxu1 %v4686_v10  ;;  %v5601_v10 = vrot.slane %v5599_v6, 1  ;;  %v5603_v12 = vshrl.u32 %v10237_v21, 16  ;;  %v10214_v21 = vld [vmem:[%s10581_s26 + $0x54] sm:$0xff] }
 0x26e   : > { %5335 = vmatmul.bf16.gmra.mxu2 %v10212_v50  ;;  %6780 = vmatpush.bf16.msrb.mxu1 %v10299_v20 }
 0x26f   : > { %5861 = vmatmul.bf16.gmra.mxu3 %v5594_v45  ;;  %v4228_v45 = vsel %vm3807_vm8, %v4225_v52, %v4227_v63  ;;  %v5602_v41 = vsel %vm852_vm0, %v5597_v5, %v5601_v10  ;;  %v4229_v5 = vrot.slane %v11479_v49, 3 }
 0x271   : > { %v3620_v8 = vpop.f32.mrf.mxu2  ;;  %v2666_v60 = vpop.f32.mrf.mxu0 }
 0x272   : > { %v4039_v61 = vpop.f32.mrf.mxu3  ;;  %v3664_v26 = vadd.f32 %v3620_v8, %v3127_v30  ;;  %v3085_v46 = vpop.f32.mrf.mxu1  ;;  %v2709_v31 = vadd.f32 %v2666_v60, %v11081_v35  ;;  %v4695_v30 = vsel %vm4633_vm10, %v4685_v48, %v4694_v44  ;;  %v4697_v8 = vshrl.u32 %v10191_v23, 16 }
 0x274   : > { %v11464_v24 = vadd.f32 %v4039_v61, %v3664_v26  ;;  %v3128_v3 = vadd.f32 %v3085_v46, %v2709_v31  ;;  %v4700_v61 = vshll.u32 %v10191_v23, 16  ;;  %v10238_v26 = vld [vmem:[%s10581_s26 + $0x5c] sm:$0xff]  ;;  %v4230_v23 = vsel %vm3807_vm8, %v4227_v63, %v4229_v5 }
 0x275   : > { %v5607_v6 = vshll.u32 %v10238_v26, 16  ;;  %v10322_v63 = vld [vmem:[%s12121_s2 + $0x398] sm:$0xff] }
 0x276   : > { %v4702_v54 = vrot.slane %v4700_v61, 4  ;;  %7318 = vmatpush.bf16.msrb.mxu2 %v10322_v63 }
 0x279   : > { %v3622_v50 = vpop.f32.mrf.mxu2  ;;  %v2669_v35 = vpop.f32.mrf.mxu0 }
 0x27a   : > { %v4041_v4 = vpop.f32.mrf.mxu3  ;;  %v3665_v32 = vadd.f32 %v3622_v50, %v3128_v3  ;;  %v3088_v14 = vpop.f32.mrf.mxu1  ;;  %v2710_v38 = vadd.f32 %v2669_v35, %v11089_v0  ;;  %v4699_v0 = vrot.slane %v4697_v8, 3 }
 0x27c   : > { %v11475_v18 = vadd.f32 %v4041_v4, %v3665_v32  ;;  %v3129_v11 = vadd.f32 %v3088_v14, %v2710_v38  ;;  %4420 = vmatmul.bf16.gmra.mxu0 %v4228_v45  ;;  %v4703_v50 = vor.u32 %v4702_v54, %v4699_v0  ;;  %v5605_v4 = vor.u32 %v5603_v12, %v5601_v10  ;;  %v10192_v38 = vld [vmem:[%s10581_s26 + $0x60] sm:$0xff] }
 0x27d   : > { %4957 = vmatmul.bf16.gmra.mxu1 %v4695_v30  ;;  %v5609_v32 = vrot.slane %v5607_v6, 1  ;;  %v4706_v61 = vshrl.u32 %v10192_v38, 16  ;;  %v10168_v54 = vld [vmem:[%s10581_s26 + $0x60] sm:$0xff] }
 0x27e   : > { %5340 = vmatmul.bf16.gmra.mxu2 %v10213_v16 }
 0x27f   : > { %5866 = vmatmul.bf16.gmra.mxu3 %v5602_v41 }
 0x281   : > { %v3625_v52 = vpop.f32.mrf.mxu2  ;;  %v2671_v46 = vpop.f32.mrf.mxu0 }
 0x282   : > { %v4044_v60 = vpop.f32.mrf.mxu3  ;;  %v3666_v48 = vadd.f32 %v3625_v52, %v3129_v11  ;;  %v3090_v7 = vpop.f32.mrf.mxu1  ;;  %v2711_v31 = vadd.f32 %v2671_v46, %v11099_v57  ;;  %v4704_v57 = vsel %vm4633_vm10, %v4694_v44, %v4703_v50  ;;  %v5610_v11 = vsel %vm852_vm0, %v5605_v4, %v5609_v32  ;;  %v10346_v44 = vld [vmem:[%s12121_s2 + $0x3d8] sm:$0xff] }
 0x283   : > { %v4709_v52 = vshll.u32 %v10192_v38, 16  ;;  %7737 = vmatpush.bf16.msrb.mxu3 %v10346_v44 }
 0x284   : > { %v11482_v20 = vadd.f32 %v4044_v60, %v3666_v48  ;;  %v3130_v3 = vadd.f32 %v3090_v7, %v2711_v31  ;;  %v10239_v60 = vld [vmem:[%s10581_s26 + $0x64] sm:$0xff]  ;;  %v4708_v31 = vrot.slane %v4706_v61, 3  ;;  %v10215_v61 = vld [vmem:[%s10581_s26 + $0x5c] sm:$0xff] }
 0x285   : > { %v4711_v12 = vrot.slane %v4709_v52, 4  ;;  %v5615_v4 = vshll.u32 %v10239_v60, 16  ;;  %v10193_v52 = vld [vmem:[%s10581_s26 + $0x68] sm:$0xff] }
 0x289   : > { %v3627_v35 = vpop.f32.mrf.mxu2  ;;  %v2674_v30 = vpop.f32.mrf.mxu0 }
 0x28a   : > { %v4046_v14 = vpop.f32.mrf.mxu3  ;;  %v3667_v45 = vadd.f32 %v3627_v35, %v3130_v3  ;;  %v3093_v16 = vpop.f32.mrf.mxu1  ;;  %v2712_v41 = vadd.f32 %v2674_v30, %v11112_v56  ;;  %v10274_v56 = vld [vmem:[%s12121_s2 + $0x318] sm:$0xff]  ;;  %v5611_v3 = vshrl.u32 %v10238_v26, 16  ;;  %v4231_v30 = vrot.slane %v10168_v54, 3 }
 0x28b   : > { %6362 = vmatpush.bf16.msrb.mxu0 %v10274_v56 }
 0x28c   : > { %v11491_v8 = vadd.f32 %v4046_v14, %v3667_v45  ;;  %v3131_v10 = vadd.f32 %v3093_v16, %v2712_v41  ;;  %4425 = vmatmul.bf16.gmra.mxu0 %v4230_v23  ;;  %v10298_v14 = vld [vmem:[%s12121_s2 + $0x358] sm:$0xff]  ;;  %v4712_v16 = vor.u32 %v4711_v12, %v4708_v31  ;;  %v5613_v23 = vor.u32 %v5611_v3, %v5609_v32  ;;  %v11520_v31 = vld [vmem:[%s10581_s26 + $0x68] sm:$0xff] }
 0x28d   : > { %4962 = vmatmul.bf16.gmra.mxu1 %v4704_v57  ;;  %v5617_v57 = vrot.slane %v5615_v4, 1  ;;  %v5619_v3 = vshrl.u32 %v10239_v60, 16  ;;  %v10216_v60 = vld [vmem:[%s10581_s26 + $0x64] sm:$0xff] }
 0x28e   : > { %5345 = vmatmul.bf16.gmra.mxu2 %v10214_v21  ;;  %6781 = vmatpush.bf16.msrb.mxu1 %v10298_v14 }
 0x28f   : > { %5871 = vmatmul.bf16.gmra.mxu3 %v5610_v11  ;;  %v4232_v11 = vsel %vm3807_vm8, %v4229_v5, %v4231_v30  ;;  %v5618_v56 = vsel %vm852_vm0, %v5613_v23, %v5617_v57  ;;  %v4233_v23 = vrot.slane %v11520_v31, 3 }
 0x291   : > { %v3630_v48 = vpop.f32.mrf.mxu2  ;;  %v2676_v49 = vpop.f32.mrf.mxu0 }
 0x292   : > { %v4049_v46 = vpop.f32.mrf.mxu3  ;;  %v3668_v7 = vadd.f32 %v3630_v48, %v3131_v10  ;;  %v3095_v0 = vpop.f32.mrf.mxu1  ;;  %v2713_v6 = vadd.f32 %v2676_v49, %v11123_v58  ;;  %v4713_v10 = vsel %vm4633_vm10, %v4703_v50, %v4712_v16  ;;  %v4715_v48 = vshrl.u32 %v10193_v52, 16 }
 0x294   : > { %v11505_v35 = vadd.f32 %v4049_v46, %v3668_v7  ;;  %v3132_v45 = vadd.f32 %v3095_v0, %v2713_v6  ;;  %v4718_v46 = vshll.u32 %v10193_v52, 16  ;;  %v10240_v7 = vld [vmem:[%s10581_s26 + $0x6c] sm:$0xff]  ;;  %v4234_v52 = vsel %vm3807_vm8, %v4231_v30, %v4233_v23 }
 0x295   : > { %v5623_v4 = vshll.u32 %v10240_v7, 16  ;;  %v10321_v30 = vld [vmem:[%s12121_s2 + $0x390] sm:$0xff] }
 0x296   : > { %v4720_v12 = vrot.slane %v4718_v46, 4  ;;  %7319 = vmatpush.bf16.msrb.mxu2 %v10321_v30  ;;  %v10195_v30 = vld [vmem:[%s10581_s26 + $0x78] sm:$0xff] }
 0x299   : > { %v3632_v21 = vpop.f32.mrf.mxu2  ;;  %v2679_v58 = vpop.f32.mrf.mxu0 }
 0x29a   : > { %v4051_v38 = vpop.f32.mrf.mxu3  ;;  %v3669_v41 = vadd.f32 %v3632_v21, %v3132_v45  ;;  %v3098_v26 = vpop.f32.mrf.mxu1  ;;  %v2714_v63 = vadd.f32 %v2679_v58, %v11131_v28  ;;  %v4717_v28 = vrot.slane %v4715_v48, 3 }
 0x29c   : > { %v11516_v44 = vadd.f32 %v4051_v38, %v3669_v41  ;;  %v3133_v32 = vadd.f32 %v3098_v26, %v2714_v63  ;;  %4430 = vmatmul.bf16.gmra.mxu0 %v4232_v11  ;;  %v4721_v21 = vor.u32 %v4720_v12, %v4717_v28  ;;  %v5621_v38 = vor.u32 %v5619_v3, %v5617_v57  ;;  %v10194_v63 = vld [vmem:[%s10581_s26 + $0x70] sm:$0xff] }
 0x29d   : > { %4967 = vmatmul.bf16.gmra.mxu1 %v4713_v10  ;;  %v5625_v41 = vrot.slane %v5623_v4, 1  ;;  %v4724_v46 = vshrl.u32 %v10194_v63, 16  ;;  %v10170_v12 = vld [vmem:[%s10581_s26 + $0x70] sm:$0xff] }
 0x29e   : > { %5350 = vmatmul.bf16.gmra.mxu2 %v10215_v61 }
 0x29f   : > { %5876 = vmatmul.bf16.gmra.mxu3 %v5618_v56 }
 0x2a1   : > { %v3635_v5 = vpop.f32.mrf.mxu2  ;;  %v2681_v0 = vpop.f32.mrf.mxu0 }
 0x2a2   : > { %v4054_v49 = vpop.f32.mrf.mxu3  ;;  %v3670_v50 = vadd.f32 %v3635_v5, %v3133_v32  ;;  %v3100_v54 = vpop.f32.mrf.mxu1  ;;  %v2715_v6 = vadd.f32 %v2681_v0, %v11142_v1  ;;  %v4722_v1 = vsel %vm4633_vm10, %v4712_v16, %v4721_v21  ;;  %v5626_v32 = vsel %vm852_vm0, %v5621_v38, %v5625_v41  ;;  %v10345_v16 = vld [vmem:[%s12121_s2 + $0x3d0] sm:$0xff] }
 0x2a3   : > { %v4727_v5 = vshll.u32 %v10194_v63, 16  ;;  %7738 = vmatpush.bf16.msrb.mxu3 %v10345_v16 }
 0x2a4   : > { %v11523_v14 = vadd.f32 %v4054_v49, %v3670_v50  ;;  %v3134_v45 = vadd.f32 %v3100_v54, %v2715_v6  ;;  %v10241_v49 = vld [vmem:[%s10581_s26 + $0x74] sm:$0xff]  ;;  %v4726_v6 = vrot.slane %v4724_v46, 3 }
 0x2a5   : > { %v4729_v3 = vrot.slane %v4727_v5, 4  ;;  %v5631_v38 = vshll.u32 %v10241_v49, 16  ;;  %v10217_v5 = vld [vmem:[%s10581_s26 + $0x6c] sm:$0xff] }
 0x2a9   : > { %v3637_v58 = vpop.f32.mrf.mxu2  ;;  %v4396_v10 = vpop.f32.mrf.mxu0 }
 0x2aa   : > { %v4056_v26 = vpop.f32.mrf.mxu3  ;;  %v3671_v11 = vadd.f32 %v3637_v58, %v3134_v45  ;;  %v4933_v61 = vpop.f32.mrf.mxu1  ;;  %v4476_v56 = vadd.f32 %v4396_v10, %v11156_v43  ;;  %v10273_v43 = vld [vmem:[%s12121_s2 + $0x310] sm:$0xff]  ;;  %v5627_v45 = vshrl.u32 %v10240_v7, 16  ;;  %v4235_v10 = vrot.slane %v10170_v12, 3 }
 0x2ab   : > { %6363 = vmatpush.bf16.msrb.mxu0 %v10273_v43 }
 0x2ac   : > { %v11532_v48 = vadd.f32 %v4056_v26, %v3671_v11  ;;  %v5013_v57 = vadd.f32 %v4933_v61, %v4476_v56  ;;  %4435 = vmatmul.bf16.gmra.mxu0 %v4234_v52  ;;  %v10297_v26 = vld [vmem:[%s12121_s2 + $0x350] sm:$0xff]  ;;  %v4730_v61 = vor.u32 %v4729_v3, %v4726_v6  ;;  %v5629_v52 = vor.u32 %v5627_v45, %v5625_v41  ;;  %v11563_v3 = vld [vmem:[%s10581_s26 + $0x78] sm:$0xff] }
 0x2ad   : > { %4972 = vmatmul.bf16.gmra.mxu1 %v4722_v1  ;;  %v5633_v1 = vrot.slane %v5631_v38, 1 }
 0x2ae   : > { %5355 = vmatmul.bf16.gmra.mxu2 %v10216_v60  ;;  %6782 = vmatpush.bf16.msrb.mxu1 %v10297_v26  ;;  %v5482_v60 = vld [vmem:[%s10581_s26 + $0x7c] sm:$0xf]  ;;  %v4731_v46 = vsel %vm4633_vm10, %v4721_v21, %v4730_v61  ;;  %v5635_v26 = vshrl.u32 %v10241_v49, 16 }
 0x2af   : > { %5881 = vmatmul.bf16.gmra.mxu3 %v5626_v32  ;;  %v5634_v16 = vsel %vm852_vm0, %v5629_v52, %v5633_v1 }
 0x2b1   : > { %v5316_v50 = vpop.f32.mrf.mxu2  ;;  %v4398_v31 = vpop.f32.mrf.mxu0 }
 0x2b2   : > { %v5842_v0 = vpop.f32.mrf.mxu3  ;;  %v5396_v54 = vadd.f32 %v5316_v50, %v5013_v57  ;;  %v4935_v28 = vpop.f32.mrf.mxu1  ;;  %v4477_v4 = vadd.f32 %v4398_v31, %v11168_v42  ;;  %v4236_v57 = vsel %vm3807_vm8, %v4233_v23, %v4235_v10  ;;  %v5538_v50 = vunpack.c.l.b16 %v5482_v60 }
 0x2b3   : > { %v4736_v31 = vshll.u32 %v10195_v30, 16 }
 0x2b4   : > { %v11546_v58 = vadd.f32 %v5842_v0, %v5396_v54  ;;  %v5014_v11 = vadd.f32 %v4935_v28, %v4477_v4  ;;  %v4733_v54 = vshrl.u32 %v10195_v30, 16  ;;  %v11560_v23 = vpack.c.b16 %v5538_v50, %v5538_v50 }
 0x2b5   : > { %v4738_v45 = vrot.slane %v4736_v31, 4 }
 0x2b6   : > { %v4735_v4 = vrot.slane %v4733_v54, 3 }
 0x2b9   : > { %v5318_v63 = vpop.f32.mrf.mxu2  ;;  %v4401_v7 = vpop.f32.mrf.mxu0 }
 0x2ba   : > { %v5844_v56 = vpop.f32.mrf.mxu3  ;;  %v5397_v42 = vadd.f32 %v5318_v63, %v5014_v11  ;;  %v4938_v32 = vpop.f32.mrf.mxu1  ;;  %v4478_v43 = vadd.f32 %v4401_v7, %v11177_v34  ;;  %v5639_v11 = vshll.u32 %v11560_v23, 16  ;;  %v4237_v63 = vrot.slane %v11563_v3, 3 }
 0x2bc   : > { %v11558_v41 = vadd.f32 %v5844_v56, %v5397_v42  ;;  %v5015_v0 = vadd.f32 %v4938_v32, %v4478_v43  ;;  %4440 = vmatmul.bf16.gmra.mxu0 %v4236_v57  ;;  %v11570_v56 = vor.u32 %v4738_v45, %v4735_v4  ;;  %v5637_v42 = vor.u32 %v5635_v26, %v5633_v1 }
 0x2bd   : > { %4977 = vmatmul.bf16.gmra.mxu1 %v4731_v46  ;;  %v5641_v7 = vrot.slane %v5639_v11, 1  ;;  %v10196_v46 = vld [vmem:[%s10886_s30] sm:$0xff]  ;;  %v4238_v49 = vsel %vm3807_vm8, %v4235_v10, %v4237_v63 }
 0x2be   : > { %5360 = vmatmul.bf16.gmra.mxu2 %v10217_v5  ;;  %v4740_v43 = vsel %vm4633_vm10, %v4730_v61, %v11570_v56  ;;  %v4780_v10 = vshll.u32 %v10196_v46, 16  ;;  %v10320_v61 = vld [vmem:[%s12121_s2 + $0x388] sm:$0xff] }
 0x2bf   : > { %5886 = vmatmul.bf16.gmra.mxu3 %v5634_v16  ;;  %v10218_v16 = vld [vmem:[%s10581_s26 + $0x74] sm:$0xff]  ;;  %v5642_v1 = vsel %vm852_vm0, %v5637_v42, %v5641_v7  ;;  %7320 = vmatpush.bf16.msrb.mxu2 %v10320_v61 }
 0x2c1   : > { %v5321_v21 = vpop.f32.mrf.mxu2  ;;  %v4403_v6 = vpop.f32.mrf.mxu0 }
 0x2c2   : > { %v5847_v28 = vpop.f32.mrf.mxu3  ;;  %v5398_v12 = vadd.f32 %v5321_v21, %v5015_v0  ;;  %v4940_v34 = vpop.f32.mrf.mxu1  ;;  %v4479_v38 = vadd.f32 %v4403_v6, %v11188_v17  ;;  %v10242_v0 = vld [vmem:[%s10886_s30] sm:$0xff]  ;;  %v4777_v21 = vshrl.u32 %v10196_v46, 16 }
 0x2c3   : > { %v5100_v6 = vld [vmem:[%s10886_s30] sm:$0xf]  ;;  %v5688_v4 = vshll.u32 %v10242_v0, 16 }
 0x2c4   : > { %v11567_v52 = vadd.f32 %v5847_v28, %v5398_v12  ;;  %v5016_v60 = vadd.f32 %v4940_v34, %v4479_v38  ;;  %v10344_v28 = vld [vmem:[%s12121_s2 + $0x3c8] sm:$0xff]  ;;  %v5099_v12 = vld [vmem:[%s10581_s26 + $0x7c] sm:$0xf]  ;;  %v5685_v34 = vshrl.u32 %v10242_v0, 16  ;;  %v4779_v26 = vrot.slane %v4777_v21, 3 }
 0x2c5   : > { %7739 = vmatpush.bf16.msrb.mxu3 %v10344_v28  ;;  %v5154_v46 = vunpack.c.l.b16 %v5099_v12 }
 0x2c9   : > { %v5323_v32 = vpop.f32.mrf.mxu2  ;;  %v4406_v30 = vpop.f32.mrf.mxu0 }
 0x2ca   : > { %v5849_v57 = vpop.f32.mrf.mxu3  ;;  %v5399_v5 = vadd.f32 %v5323_v32, %v5016_v60  ;;  %v4943_v17 = vpop.f32.mrf.mxu1  ;;  %v4480_v50 = vadd.f32 %v4406_v30, %v11202_v33  ;;  %v10272_v33 = vld [vmem:[%s12121_s2 + $0x308] sm:$0xff]  ;;  %v11596_v32 = vld [vmem:[%s10886_s30] sm:$0xff] }
 0x2cb   : > { %6364 = vmatpush.bf16.msrb.mxu0 %v10272_v33  ;;  %v4273_v0 = vrot.slane %v11596_v32, 3 }
 0x2cc   : > { %v11582_v54 = vadd.f32 %v5849_v57, %v5399_v5  ;;  %v5017_v31 = vadd.f32 %v4943_v17, %v4480_v50  ;;  %4445 = vmatmul.bf16.gmra.mxu0 %v4238_v49  ;;  %v4782_v57 = vrot.slane %v4780_v10, 4  ;;  %v5187_v5 = vunpack.c.l.b16 %v5100_v6  ;;  %v10296_v50 = vld [vmem:[%s12121_s2 + $0x348] sm:$0xff] }
 0x2cd   : > { %4982 = vmatmul.bf16.gmra.mxu1 %v4740_v43  ;;  %v5643_v17 = vshrl.u32 %v11560_v23, 16  ;;  %v5687_v49 = vrot.slane %v5685_v34, 4  ;;  %v5690_v43 = vrot.slane %v5688_v4, 5  ;;  %v5166_v23 = vpack.c.b16 %v5154_v46, %v5154_v46 }
 0x2ce   : > { %5365 = vmatmul.bf16.gmra.mxu2 %v10218_v16  ;;  %6783 = vmatpush.bf16.msrb.mxu1 %v10296_v50  ;;  %v5196_v21 = vpack.c.b16 %v5187_v5, %v5187_v5 }
 0x2cf   : > { %5891 = vmatmul.bf16.gmra.mxu3 %v5642_v1  ;;  %v5645_v10 = vor.u32 %v5643_v17, %v5641_v7  ;;  %v5691_v61 = vor.u32 %v5690_v43, %v5687_v49  ;;  %v11633_v43 = vld [vmem:[%s10886_s30 + $0x8] sm:$0xff] }
 0x2d1   : > { %v5326_v45 = vpop.f32.mrf.mxu2  ;;  %v4408_v60 = vpop.f32.mrf.mxu0 }
 0x2d2   : > { %v5852_v38 = vpop.f32.mrf.mxu3  ;;  %v5400_v11 = vadd.f32 %v5326_v45, %v5017_v31  ;;  %v4945_v42 = vpop.f32.mrf.mxu1  ;;  %v4481_v30 = vadd.f32 %v4408_v60, %v11214_v36  ;;  %v4783_v31 = vor.u32 %v4782_v57, %v4779_v26  ;;  %v4288_v45 = vsel %vm3807_vm8, %v4237_v63, %v4273_v0 }
 0x2d3   : > { %v5735_v60 = vsel %vm11614_vm14, %v5645_v10, %v5691_v61 }
 0x2d4   : > { %v11600_v16 = vadd.f32 %v5852_v38, %v5400_v11  ;;  %v5018_v1 = vadd.f32 %v4945_v42, %v4481_v30  ;;  %v4826_v7 = vsel %vm11608_vm13, %v11570_v56, %v4783_v31  ;;  %v10197_v38 = vld [vmem:[%s10886_s30 + $0x8] sm:$0xff]  ;;  %v5208_v11 = vsel %vm5205_vm11, %v5166_v23, %v5196_v21 }
 0x2d5   : > { %v10243_v42 = vld [vmem:[%s10886_s30 + $0x8] sm:$0xff]  ;;  %v4785_v3 = vshrl.u32 %v10197_v38, 16  ;;  %v4788_v63 = vshll.u32 %v10197_v38, 16 }
 0x2d6   : > { %v5693_v56 = vshrl.u32 %v10243_v42, 16  ;;  %v5696_v46 = vshll.u32 %v10243_v42, 16  ;;  %v10198_v42 = vld [vmem:[%s10886_s30 + $0x10] sm:$0xff] }
 0x2d7   : > { %v4787_v50 = vrot.slane %v4785_v3, 3 }
 0x2d8   : > { %v5695_v23 = vrot.slane %v5693_v56, 4  ;;  %v5698_v21 = vrot.slane %v5696_v46, 5 }
 0x2d9   : > { %v5328_v28 = vpop.f32.mrf.mxu2  ;;  %v4411_v34 = vpop.f32.mrf.mxu0 }
 0x2da   : > { %v5854_v12 = vpop.f32.mrf.mxu3  ;;  %v5401_v6 = vadd.f32 %v5328_v28, %v5018_v1  ;;  %v4948_v4 = vpop.f32.mrf.mxu1  ;;  %v4482_v26 = vadd.f32 %v4411_v34, %v11223_v19  ;;  %v4790_v1 = vrot.slane %v4788_v63, 4  ;;  %v5699_v34 = vor.u32 %v5698_v21, %v5695_v23  ;;  %v10244_v63 = vld [vmem:[%s10886_s30 + $0x10] sm:$0xff] }
 0x2dc   : > { %v11630_v32 = vadd.f32 %v5854_v12, %v5401_v6  ;;  %v5019_v57 = vadd.f32 %v4948_v4, %v4482_v26  ;;  %4450 = vmatmul.bf16.gmra.mxu0 %v4288_v45  ;;  %v4274_v12 = vrot.slane %v11633_v43, 3  ;;  %v4791_v6 = vor.u32 %v4790_v1, %v4787_v50 }
 0x2dd   : > { %4987 = vmatmul.bf16.gmra.mxu1 %v4826_v7  ;;  %v5700_v3 = vsel %vm5683_vm12, %v5691_v61, %v5699_v34  ;;  %v5702_v61 = vshrl.u32 %v10244_v63, 16 }
 0x2de   : > { %5370 = vmatmul.bf16.gmra.mxu2 %v5208_v11  ;;  %v4275_v11 = vsel %vm3807_vm8, %v4273_v0, %v4274_v12  ;;  %v10319_v0 = vld [vmem:[%s12121_s2 + $0x380] sm:$0xff] }
 0x2df   : > { %5896 = vmatmul.bf16.gmra.mxu3 %v5735_v60  ;;  %v10219_v60 = vld [vmem:[%s10886_s30 + $0x4] sm:$0xff]  ;;  %7321 = vmatpush.bf16.msrb.mxu2 %v10319_v0  ;;  %v10199_v0 = vld [vmem:[%s10886_s30 + $0x18] sm:$0xff] }
 0x2e1   : > { %v5331_v5 = vpop.f32.mrf.mxu2  ;;  %v4413_v17 = vpop.f32.mrf.mxu0 }
 0x2e2   : > { %v5857_v19 = vpop.f32.mrf.mxu3  ;;  %v5402_v30 = vadd.f32 %v5331_v5, %v5019_v57  ;;  %v4950_v49 = vpop.f32.mrf.mxu1  ;;  %v4483_v36 = vadd.f32 %v4413_v17, %v11240_v22  ;;  %v4792_v22 = vsel %vm4633_vm10, %v4783_v31, %v4791_v6  ;;  %v4794_v5 = vshrl.u32 %v10198_v42, 16  ;;  %v10343_v31 = vld [vmem:[%s12121_s2 + $0x3c0] sm:$0xff] }
 0x2e3   : > { %7740 = vmatpush.bf16.msrb.mxu3 %v10343_v31 }
 0x2e4   : > { %v11636_v10 = vadd.f32 %v5857_v19, %v5402_v30  ;;  %v5020_v28 = vadd.f32 %v4950_v49, %v4483_v36  ;;  %v4797_v19 = vshll.u32 %v10198_v42, 16  ;;  %v5705_v30 = vshll.u32 %v10244_v63, 16  ;;  %v10174_v36 = vld [vmem:[%s10886_s30 + $0x10] sm:$0xff] }
 0x2e5   : > { %v4796_v23 = vrot.slane %v4794_v5, 3 }
 0x2e6   : > { %v4799_v21 = vrot.slane %v4797_v19, 4  ;;  %v10220_v19 = vld [vmem:[%s10886_s30 + $0xc] sm:$0xff] }
 0x2e9   : > { %v5333_v4 = vpop.f32.mrf.mxu2  ;;  %v4416_v38 = vpop.f32.mrf.mxu0 }
 0x2ea   : > { %v5859_v45 = vpop.f32.mrf.mxu3  ;;  %v5403_v7 = vadd.f32 %v5333_v4, %v5020_v28  ;;  %v4953_v26 = vpop.f32.mrf.mxu1  ;;  %v4484_v57 = vadd.f32 %v4416_v38, %v11258_v9  ;;  %v10271_v9 = vld [vmem:[%s12121_s2 + $0x300] sm:$0xff]  ;;  %v5704_v4 = vrot.slane %v5702_v61, 4  ;;  %v10245_v61 = vld [vmem:[%s10886_s30 + $0x18] sm:$0xff] }
 0x2eb   : > { %6365 = vmatpush.bf16.msrb.mxu0 %v10271_v9  ;;  %v10295_v38 = vld [vmem:[%s12121_s2 + $0x340] sm:$0xff] }
 0x2ec   : > { %v11646_v56 = vadd.f32 %v5859_v45, %v5403_v7  ;;  %v5021_v46 = vadd.f32 %v4953_v26, %v4484_v57  ;;  %4455 = vmatmul.bf16.gmra.mxu0 %v4275_v11  ;;  %v5707_v45 = vrot.slane %v5705_v30, 5  ;;  %v4276_v11 = vrot.slane %v10174_v36, 3  ;;  %6784 = vmatpush.bf16.msrb.mxu1 %v10295_v38 }
 0x2ed   : > { %4992 = vmatmul.bf16.gmra.mxu1 %v4792_v22  ;;  %v4800_v22 = vor.u32 %v4799_v21, %v4796_v23  ;;  %v11674_v23 = vld [vmem:[%s10886_s30 + $0x18] sm:$0xff] }
 0x2ee   : > { %5375 = vmatmul.bf16.gmra.mxu2 %v10219_v60  ;;  %v5708_v60 = vor.u32 %v5707_v45, %v5704_v4 }
 0x2ef   : > { %5901 = vmatmul.bf16.gmra.mxu3 %v5700_v3  ;;  %v4801_v5 = vsel %vm4633_vm10, %v4791_v6, %v4800_v22  ;;  %v5714_v6 = vshll.u32 %v10245_v61, 16 }
 0x2f0   : > { %v5709_v31 = vsel %vm5683_vm12, %v5699_v34, %v5708_v60 }
 0x2f1   : > { %v5336_v17 = vpop.f32.mrf.mxu2  ;;  %v4418_v50 = vpop.f32.mrf.mxu0  ;;  %v5716_v38 = vrot.slane %v5714_v6, 5 }
 0x2f2   : > { %v5862_v49 = vpop.f32.mrf.mxu3  ;;  %v5404_v43 = vadd.f32 %v5336_v17, %v5021_v46  ;;  %v4955_v1 = vpop.f32.mrf.mxu1  ;;  %v4485_v28 = vadd.f32 %v4418_v50, %v11282_v40  ;;  %v4277_v46 = vsel %vm3807_vm8, %v4274_v12, %v4276_v11  ;;  %v4806_v12 = vshll.u32 %v10199_v0, 16 }
 0x2f4   : > { %v11659_v7 = vadd.f32 %v5862_v49, %v5404_v43  ;;  %v5022_v26 = vadd.f32 %v4955_v1, %v4485_v28  ;;  %v4803_v49 = vshrl.u32 %v10199_v0, 16  ;;  %v5711_v43 = vshrl.u32 %v10245_v61, 16 }
 0x2f5   : > { %v4808_v28 = vrot.slane %v4806_v12, 4  ;;  %v10221_v12 = vld [vmem:[%s10886_s30 + $0x14] sm:$0xff] }
 0x2f6   : > { %v4805_v21 = vrot.slane %v4803_v49, 3  ;;  %v5713_v45 = vrot.slane %v5711_v43, 4 }
 0x2f9   : > { %v5338_v42 = vpop.f32.mrf.mxu2  ;;  %v4421_v40 = vpop.f32.mrf.mxu0 }
 0x2fa   : > { %v5864_v57 = vpop.f32.mrf.mxu3  ;;  %v5405_v3 = vadd.f32 %v5338_v42, %v5022_v26  ;;  %v4958_v63 = vpop.f32.mrf.mxu1  ;;  %v4486_v9 = vadd.f32 %v4421_v40, %v11292_v2  ;;  %v4572_v26 = vld [vmem:[%s10886_s30 + $0x20] sm:$0xf]  ;;  %v4809_v40 = vor.u32 %v4808_v28, %v4805_v21 }
 0x2fc   : > { %v11671_v30 = vadd.f32 %v5864_v57, %v5405_v3  ;;  %v5023_v17 = vadd.f32 %v4958_v63, %v4486_v9  ;;  %4460 = vmatmul.bf16.gmra.mxu0 %v4277_v46  ;;  %v4278_v3 = vrot.slane %v11674_v23, 3  ;;  %v4770_v63 = vunpack.c.l.b16 %v4572_v26 }
 0x2fd   : > { %4997 = vmatmul.bf16.gmra.mxu1 %v4801_v5  ;;  %v5717_v46 = vor.u32 %v5716_v38, %v5713_v45  ;;  %v9466_v5 = vld [vmem:[%s10886_s30 + $0x20] sm:$0xf]  ;;  %v4810_v49 = vsel %vm4633_vm10, %v4800_v22, %v4809_v40 }
 0x2fe   : > { %5380 = vmatmul.bf16.gmra.mxu2 %v10220_v19  ;;  %v10246_v19 = vld [vmem:[%s10886_s30 + $0x20] sm:$0x10]  ;;  %v4775_v43 = vpack.c.b16 %v4770_v63, %v4770_v63 }
 0x2ff   : > { %5906 = vmatmul.bf16.gmra.mxu3 %v5709_v31 }
 0x300   : > { %v4812_v21 = vshrl.u32 %v4775_v43, 16 }
 0x301   : > { %v5341_v50 = vpop.f32.mrf.mxu2  ;;  %v4423_v2 = vpop.f32.mrf.mxu0 }
 0x302   : > { %v5867_v1 = vpop.f32.mrf.mxu3  ;;  %v5406_v36 = vadd.f32 %v5341_v50, %v5023_v17  ;;  %v4960_v34 = vpop.f32.mrf.mxu1  ;;  %v4487_v4 = vadd.f32 %v4423_v2, %v11313_v25  ;;  %v4279_v17 = vsel %vm3807_vm8, %v4276_v11, %v4278_v3  ;;  %v5718_v50 = vsel %vm5683_vm12, %v5708_v60, %v5717_v46 }
 0x303   : > { %v4815_v11 = vshll.u32 %v4775_v43, 16 }
 0x304   : > { %v11678_v42 = vadd.f32 %v5867_v1, %v5406_v36  ;;  %v5024_v57 = vadd.f32 %v4960_v34, %v4487_v4  ;;  %v4155_v1 = vld [vmem:[%s10886_s30 + $0x20] sm:$0x7]  ;;  %v9467_v36 = vor.u32 %v10246_v19, %v9466_v5 }
 0x305   : > { %v4267_v23 = vunpack.c.l.b16 %v4155_v1  ;;  %v4817_v63 = vrot.slane %v4815_v11, 4 }
 0x306   : > { %v5720_v28 = vshrl.u32 %v9467_v36, 16  ;;  %v5723_v22 = vshll.u32 %v9467_v36, 16 }
 0x307   : > { %v4272_v26 = vpack.c.b16 %v4267_v23, %v4267_v23 }
 0x308   : > { %v5722_v19 = vrot.slane %v5720_v28, 4 }
 0x309   : > { %v5343_v0 = vpop.f32.mrf.mxu2  ;;  %v4426_v61 = vpop.f32.mrf.mxu0 }
 0x30a   : > { %v5869_v9 = vpop.f32.mrf.mxu3  ;;  %v5407_v31 = vadd.f32 %v5343_v0, %v5024_v57  ;;  %v4963_v25 = vpop.f32.mrf.mxu1  ;;  %v4488_v6 = vadd.f32 %v4426_v61, %v11326_v53  ;;  %v4814_v57 = vrot.slane %v4812_v21, 3  ;;  %v5725_v0 = vrot.slane %v5723_v22, 5  ;;  %v10222_v21 = vld [vmem:[%s10886_s30 + $0x1c] sm:$0xff] }
 0x30b   : > { %v4280_v61 = vrot.slane %v4272_v26, 3  ;;  %v9630_v26 = vld [vmem:[%s10581_s26 + $0x34] sm:$0xe] }
 0x30c   : > { %v11689_v2 = vadd.f32 %v5869_v9, %v5407_v31  ;;  %v5025_v34 = vadd.f32 %v4963_v25, %v4488_v6  ;;  %4465 = vmatmul.bf16.gmra.mxu0 %v4279_v17  ;;  %v4818_v25 = vor.u32 %v4817_v63, %v4814_v57  ;;  %v5726_v17 = vor.u32 %v5725_v0, %v5722_v19  ;;  %v9854_v63 = vld [vmem:[%s10581_s26 + $0x34] sm:$0xc] }
 0x30d   : > { %5002 = vmatmul.bf16.gmra.mxu1 %v4810_v49  ;;  %v9742_v49 = vld [vmem:[%s10581_s26 + $0x34] sm:$0xe] }
 0x30e   : > { %5385 = vmatmul.bf16.gmra.mxu2 %v10221_v12  ;;  %v10303_v12 = vld [vmem:[%s10581_s26 + $0x34] sm:$0xf0]  ;;  %v4819_v23 = vsel %vm4633_vm10, %v4809_v40, %v4818_v25  ;;  %v5727_v22 = vsel %vm5683_vm12, %v5717_v46, %v5726_v17 }
 0x30f   : > { %5911 = vmatmul.bf16.gmra.mxu3 %v5718_v50  ;;  %v10255_v50 = vld [vmem:[%s10581_s26 + $0x34] sm:$0xff]  ;;  %v9743_v11 = vor.u32 %v10303_v12, %v9742_v49 }
 0x311   : > { %v5346_v4 = vpop.f32.mrf.mxu2  ;;  %v4428_v60 = vpop.f32.mrf.mxu0  ;;  %v7012_v40 = vshrl.u32 %v9743_v11, 16 }
 0x312   : > { %v5872_v45 = vpop.f32.mrf.mxu3  ;;  %v5408_v53 = vadd.f32 %v5346_v4, %v5025_v34  ;;  %v4965_v38 = vpop.f32.mrf.mxu1  ;;  %v4489_v5 = vadd.f32 %v4428_v60, %v11346_v27  ;;  %v4281_v27 = vsel %vm3807_vm8, %v4278_v3, %v4280_v61  ;;  %v10304_v4 = vld [vmem:[%s10581_s26 + $0x3c] sm:$0xff]  ;;  %v6070_v3 = vshll.u32 %v10255_v50, 16 }
 0x313   : > { %v11706_v60 = vld [vmem:[%s10581_s26 + $0x3c] sm:$0xff]  ;;  %v7020_v57 = vshrl.u32 %v10304_v4, 16  ;;  %v7023_v46 = vshll.u32 %v10304_v4, 16 }
 0x314   : > { %v11692_v9 = vadd.f32 %v5872_v45, %v5408_v53  ;;  %v5026_v31 = vadd.f32 %v4965_v38, %v4489_v5  ;;  %v7015_v38 = vshll.u32 %v9743_v11, 16  ;;  %v10327_v5 = vld [vmem:[%s10581_s26 + $0x34] sm:$0xf0]  ;;  %v6072_v61 = vrot.slane %v6070_v3, 1 }
 0x315   : > { %v6075_v25 = vshll.u32 %v11706_v60, 16  ;;  %v9855_v11 = vor.u32 %v10327_v5, %v9854_v63 }
 0x317   : > { %v6077_v4 = vrot.slane %v6075_v25, 1  ;;  %v10305_v25 = vld [vmem:[%s10581_s26 + $0x44] sm:$0xff] }
 0x319   : > { %v5348_v43 = vpop.f32.mrf.mxu2  ;;  %v4431_v36 = vpop.f32.mrf.mxu0 }
 0x31a   : > { %v5874_v6 = vpop.f32.mrf.mxu3  ;;  %v5409_v1 = vadd.f32 %v5348_v43, %v5026_v31  ;;  %v4968_v34 = vpop.f32.mrf.mxu1  ;;  %v4490_v28 = vadd.f32 %v4431_v36, %v11358_v47  ;;  %v10279_v47 = vld [vmem:[%s10581_s26 + $0x34] sm:$0xf0]  ;;  %v6068_v31 = vshrl.u32 %v10255_v50, 16  ;;  %v11714_v43 = vld [vmem:[%s10581_s26 + $0x3c] sm:$0xff]  ;;  %v7017_v36 = vrot.slane %v7015_v38, 2 }
 0x31c   : > { %v11703_v45 = vadd.f32 %v5874_v6, %v5409_v1  ;;  %v5027_v53 = vadd.f32 %v4968_v34, %v4490_v28  ;;  %4470 = vmatmul.bf16.gmra.mxu0 %v4281_v27  ;;  %v9631_v6 = vor.u32 %v10279_v47, %v9630_v26  ;;  %v7014_v1 = vrot.slane %v7012_v40, 1 }
 0x31d   : > { %5007 = vmatmul.bf16.gmra.mxu1 %v4819_v23  ;;  %v7022_v27 = vrot.slane %v7020_v57, 1  ;;  %v7025_v23 = vrot.slane %v7023_v46, 2  ;;  %v7548_v26 = vrot.slane %v9855_v11, 2  ;;  %v10281_v11 = vld [vmem:[%s10581_s26 + $0x44] sm:$0xff] }
 0x31e   : > { %12134 = vst [vmem:[#allocation3_spill] sm:$0xff] %v11703_v45  ;;  %5390 = vmatmul.bf16.gmra.mxu2 %v10222_v21  ;;  %v10328_v21 = vld [vmem:[%s10581_s26 + $0x3c] sm:$0xff]  ;;  %v6592_v3 = vrot.slane %v9631_v6, 1  ;;  %v7032_v6 = vshll.u32 %v10305_v25, 16 }
 0x31f   : > { %5916 = vmatmul.bf16.gmra.mxu3 %v5727_v22  ;;  %v6073_v22 = vor.u32 %v6072_v61, %v6068_v31  ;;  %v7026_v45 = vor.u32 %v7025_v23, %v7022_v27  ;;  %v7549_v40 = vrot.slane %v10328_v21, 2  ;;  %v6079_v23 = vshrl.u32 %v11706_v60, 16 }
 0x321   : > { %v5351_v19 = vpop.f32.mrf.mxu2  ;;  %v4433_v49 = vpop.f32.mrf.mxu0  ;;  %v6078_v63 = vsel %vm852_vm0, %v6073_v22, %v6077_v4  ;;  %v7550_v61 = vsel %vm2851_vm6, %v7548_v26, %v7549_v40 }
 0x322   : > { %v5877_v0 = vpop.f32.mrf.mxu3  ;;  %v5410_v17 = vadd.f32 %v5351_v19, %v5027_v53  ;;  %v4970_v12 = vpop.f32.mrf.mxu1  ;;  %v4491_v34 = vadd.f32 %v4433_v49, %v11367_v37  ;;  %v6593_v53 = vrot.slane %v11714_v43, 1  ;;  %v7018_v19 = vor.u32 %v7017_v36, %v7014_v1 }
 0x323   : > { %v7029_v43 = vshrl.u32 %v10305_v25, 16 }
 0x324   : > { %v11718_v28 = vadd.f32 %v5877_v0, %v5410_v17  ;;  %v5028_v50 = vadd.f32 %v4970_v12, %v4491_v34  ;;  %v6594_v5 = vsel %vm1370_vm1, %v6592_v3, %v6593_v53  ;;  %v7027_v31 = vsel %vm1789_vm2, %v7018_v19, %v7026_v45  ;;  %v10257_v12 = vld [vmem:[%s10581_s26 + $0x44] sm:$0xff] }
 0x325   : > { %v6083_v21 = vshll.u32 %v10257_v12, 16  ;;  %v7031_v22 = vrot.slane %v7029_v43, 1  ;;  %v7034_v3 = vrot.slane %v7032_v6, 2  ;;  %v10329_v19 = vld [vmem:[%s10581_s26 + $0x44] sm:$0xff]  ;;  %v10306_v6 = vld [vmem:[%s10581_s26 + $0x4c] sm:$0xff] }
 0x329   : > { %v5353_v38 = vpop.f32.mrf.mxu2  ;;  %v4436_v57 = vpop.f32.mrf.mxu0 }
 0x32a   : > { %v5879_v47 = vpop.f32.mrf.mxu3  ;;  %v5411_v37 = vadd.f32 %v5353_v38, %v5028_v50  ;;  %v4973_v46 = vpop.f32.mrf.mxu1  ;;  %v4492_v0 = vadd.f32 %v4436_v57, %v11382_v59  ;;  %v6595_v57 = vrot.slane %v10281_v11, 1  ;;  %v6087_v11 = vshrl.u32 %v10257_v12, 16 }
 0x32c   : > { %v11727_v17 = vadd.f32 %v5879_v47, %v5411_v37  ;;  %v5029_v49 = vadd.f32 %v4973_v46, %v4492_v0  ;;  %6366 = vmatmul.bf16.vlgmr.msrb.gmra.mxu0 %v6078_v63  ;;  %v6081_v47 = vor.u32 %v6079_v23, %v6077_v4  ;;  %v6085_v37 = vrot.slane %v6083_v21, 1 }
 0x32d   : > { %6785 = vmatmul.bf16.vlgmr.msrb.gmra.mxu1 %v6594_v5  ;;  %v7035_v46 = vor.u32 %v7034_v3, %v7031_v22  ;;  %v7551_v63 = vrot.slane %v10329_v19, 2  ;;  %v6596_v25 = vsel %vm1370_vm1, %v6593_v53, %v6595_v57 }
 0x32e   : > { %7322 = vmatmul.bf16.vlgmr.msrb.gmra.mxu2 %v7027_v31 }
 0x32f   : > { %7741 = vmatmul.bf16.vlgmr.msrb.gmra.mxu3 %v7550_v61  ;;  %v7036_v43 = vsel %vm1789_vm2, %v7026_v45, %v7035_v46  ;;  %v7552_v4 = vsel %vm2851_vm6, %v7549_v40, %v7551_v63 }
 0x331   : > { %v5356_v1 = vpop.f32.mrf.mxu2  ;;  %v4438_v34 = vpop.f32.mrf.mxu0 }
 0x332   : > { %v5882_v36 = vpop.f32.mrf.mxu3  ;;  %v5412_v59 = vadd.f32 %v5356_v1, %v5029_v49  ;;  %v4975_v27 = vpop.f32.mrf.mxu1  ;;  %v4493_v50 = vadd.f32 %v4438_v34, %v11393_v15  ;;  %v6086_v15 = vsel %vm852_vm0, %v6081_v47, %v6085_v37  ;;  %v7038_v34 = vshrl.u32 %v10306_v6, 16 }
 0x334   : > { %v11734_v26 = vadd.f32 %v5882_v36, %v5412_v59  ;;  %v5030_v38 = vadd.f32 %v4975_v27, %v4493_v50  ;;  %v10258_v59 = vld [vmem:[%s10581_s26 + $0x4c] sm:$0xff]  ;;  %v7041_v27 = vshll.u32 %v10306_v6, 16  ;;  %v7040_v3 = vrot.slane %v7038_v34, 1 }
 0x335   : > { %v6091_v40 = vshll.u32 %v10258_v59, 16  ;;  %v10282_v50 = vld [vmem:[%s10581_s26 + $0x4c] sm:$0xff] }
 0x336   : > { %v7043_v19 = vrot.slane %v7041_v27, 2  ;;  %v10307_v27 = vld [vmem:[%s10581_s26 + $0x54] sm:$0xff] }
 0x339   : > { %v5358_v5 = vpop.f32.mrf.mxu2  ;;  %v4441_v31 = vpop.f32.mrf.mxu0 }
 0x33a   : > { %v5884_v0 = vpop.f32.mrf.mxu3  ;;  %v5413_v60 = vadd.f32 %v5358_v5, %v5030_v38  ;;  %v4978_v61 = vpop.f32.mrf.mxu1  ;;  %v4494_v49 = vadd.f32 %v4441_v31, %v11400_v39  ;;  %v10330_v38 = vld [vmem:[%s10581_s26 + $0x4c] sm:$0xff]  ;;  %v6597_v31 = vrot.slane %v10282_v50, 1  ;;  %v6095_v50 = vshrl.u32 %v10258_v59, 16 }
 0x33c   : > { %v11742_v1 = vadd.f32 %v5884_v0, %v5413_v60  ;;  %v5031_v36 = vadd.f32 %v4978_v61, %v4494_v49  ;;  %6371 = vmatmul.bf16.gmra.mxu0 %v6086_v15  ;;  %v6089_v0 = vor.u32 %v6087_v11, %v6085_v37  ;;  %v6093_v60 = vrot.slane %v6091_v40, 1 }
 0x33d   : > { %6790 = vmatmul.bf16.gmra.mxu1 %v6596_v25  ;;  %v7044_v61 = vor.u32 %v7043_v19, %v7040_v3  ;;  %v7553_v15 = vrot.slane %v10330_v38, 2  ;;  %v6598_v6 = vsel %vm1370_vm1, %v6595_v57, %v6597_v31 }
 0x33e   : > { %7327 = vmatmul.bf16.gmra.mxu2 %v7036_v43 }
 0x33f   : > { %7746 = vmatmul.bf16.gmra.mxu3 %v7552_v4  ;;  %v7045_v34 = vsel %vm1789_vm2, %v7035_v46, %v7044_v61  ;;  %v7554_v37 = vsel %vm2851_vm6, %v7551_v63, %v7553_v15 }
 0x341   : > { %v5361_v53 = vpop.f32.mrf.mxu2  ;;  %v4443_v21 = vpop.f32.mrf.mxu0 }
 0x342   : > { %v5887_v23 = vpop.f32.mrf.mxu3  ;;  %v5414_v39 = vadd.f32 %v5361_v53, %v5031_v36  ;;  %v4980_v45 = vpop.f32.mrf.mxu1  ;;  %v4495_v22 = vadd.f32 %v4443_v21, %v11409_v62  ;;  %v6094_v62 = vsel %vm852_vm0, %v6089_v0, %v6093_v60  ;;  %v7047_v21 = vshrl.u32 %v10307_v27, 16 }
 0x344   : > { %v11748_v47 = vadd.f32 %v5887_v23, %v5414_v39  ;;  %v5032_v5 = vadd.f32 %v4980_v45, %v4495_v22  ;;  %v10259_v39 = vld [vmem:[%s10581_s26 + $0x54] sm:$0xff]  ;;  %v7050_v45 = vshll.u32 %v10307_v27, 16  ;;  %v7049_v19 = vrot.slane %v7047_v21, 1 }
 0x345   : > { %v6099_v63 = vshll.u32 %v10259_v39, 16  ;;  %v10283_v22 = vld [vmem:[%s10581_s26 + $0x54] sm:$0xff] }
 0x346   : > { %v7052_v38 = vrot.slane %v7050_v45, 2  ;;  %v10308_v45 = vld [vmem:[%s10581_s26 + $0x5c] sm:$0xff] }
 0x349   : > { %v5363_v25 = vpop.f32.mrf.mxu2  ;;  %v4446_v43 = vpop.f32.mrf.mxu0 }
 0x34a   : > { %v5889_v49 = vpop.f32.mrf.mxu3  ;;  %v5415_v12 = vadd.f32 %v5363_v25, %v5032_v5  ;;  %v4983_v4 = vpop.f32.mrf.mxu1  ;;  %v4496_v36 = vadd.f32 %v4446_v43, %v11423_v51  ;;  %v10331_v5 = vld [vmem:[%s10581_s26 + $0x54] sm:$0xff]  ;;  %v6599_v43 = vrot.slane %v10283_v22, 1  ;;  %v6103_v22 = vshrl.u32 %v10259_v39, 16 }
 0x34c   : > { %v11756_v53 = vadd.f32 %v5889_v49, %v5415_v12  ;;  %v5033_v23 = vadd.f32 %v4983_v4, %v4496_v36  ;;  %6376 = vmatmul.bf16.gmra.mxu0 %v6094_v62  ;;  %v6097_v49 = vor.u32 %v6095_v50, %v6093_v60  ;;  %v6101_v12 = vrot.slane %v6099_v63, 1 }
 0x34d   : > { %6795 = vmatmul.bf16.gmra.mxu1 %v6598_v6  ;;  %v7053_v4 = vor.u32 %v7052_v38, %v7049_v19  ;;  %v7555_v62 = vrot.slane %v10331_v5, 2  ;;  %v6600_v27 = vsel %vm1370_vm1, %v6597_v31, %v6599_v43 }
 0x34e   : > { %7332 = vmatmul.bf16.gmra.mxu2 %v7045_v34 }
 0x34f   : > { %7751 = vmatmul.bf16.gmra.mxu3 %v7554_v37  ;;  %v7054_v21 = vsel %vm1789_vm2, %v7044_v61, %v7053_v4  ;;  %v7556_v60 = vsel %vm2851_vm6, %v7553_v15, %v7555_v62 }
 0x351   : > { %v5366_v57 = vpop.f32.mrf.mxu2  ;;  %v4448_v40 = vpop.f32.mrf.mxu0 }
 0x352   : > { %v5892_v11 = vpop.f32.mrf.mxu3  ;;  %v5416_v51 = vadd.f32 %v5366_v57, %v5033_v23  ;;  %v4985_v46 = vpop.f32.mrf.mxu1  ;;  %v4497_v3 = vadd.f32 %v4448_v40, %v11434_v29  ;;  %v6102_v29 = vsel %vm852_vm0, %v6097_v49, %v6101_v12  ;;  %v7056_v40 = vshrl.u32 %v10308_v45, 16 }
 0x354   : > { %v11762_v0 = vadd.f32 %v5892_v11, %v5416_v51  ;;  %v5034_v25 = vadd.f32 %v4985_v46, %v4497_v3  ;;  %v10260_v51 = vld [vmem:[%s10581_s26 + $0x5c] sm:$0xff]  ;;  %v7059_v46 = vshll.u32 %v10308_v45, 16  ;;  %v7058_v38 = vrot.slane %v7056_v40, 1 }
 0x355   : > { %v6107_v15 = vshll.u32 %v10260_v51, 16  ;;  %v10284_v3 = vld [vmem:[%s10581_s26 + $0x5c] sm:$0xff] }
 0x356   : > { %v7061_v5 = vrot.slane %v7059_v46, 2  ;;  %v10309_v46 = vld [vmem:[%s10581_s26 + $0x64] sm:$0xff] }
 0x359   : > { %v5368_v6 = vpop.f32.mrf.mxu2  ;;  %v4451_v34 = vpop.f32.mrf.mxu0 }
 0x35a   : > { %v5894_v36 = vpop.f32.mrf.mxu3  ;;  %v5417_v59 = vadd.f32 %v5368_v6, %v5034_v25  ;;  %v4988_v37 = vpop.f32.mrf.mxu1  ;;  %v4498_v23 = vadd.f32 %v4451_v34, %v11441_v13  ;;  %v10332_v25 = vld [vmem:[%s10581_s26 + $0x5c] sm:$0xff]  ;;  %v6601_v34 = vrot.slane %v10284_v3, 1  ;;  %v6111_v3 = vshrl.u32 %v10260_v51, 16 }
 0x35c   : > { %v11770_v57 = vadd.f32 %v5894_v36, %v5417_v59  ;;  %v5035_v11 = vadd.f32 %v4988_v37, %v4498_v23  ;;  %6381 = vmatmul.bf16.gmra.mxu0 %v6102_v29  ;;  %v6105_v36 = vor.u32 %v6103_v22, %v6101_v12  ;;  %v6109_v59 = vrot.slane %v6107_v15, 1 }
 0x35d   : > { %6800 = vmatmul.bf16.gmra.mxu1 %v6600_v27  ;;  %v7062_v37 = vor.u32 %v7061_v5, %v7058_v38  ;;  %v7557_v29 = vrot.slane %v10332_v25, 2  ;;  %v6602_v45 = vsel %vm1370_vm1, %v6599_v43, %v6601_v34 }
 0x35e   : > { %7337 = vmatmul.bf16.gmra.mxu2 %v7054_v21 }
 0x35f   : > { %7756 = vmatmul.bf16.gmra.mxu3 %v7556_v60  ;;  %v7063_v40 = vsel %vm1789_vm2, %v7053_v4, %v7062_v37  ;;  %v7558_v12 = vsel %vm2851_vm6, %v7555_v62, %v7557_v29 }
 0x361   : > { %v5371_v31 = vpop.f32.mrf.mxu2  ;;  %v4453_v63 = vpop.f32.mrf.mxu0 }
 0x362   : > { %v5897_v50 = vpop.f32.mrf.mxu3  ;;  %v5418_v13 = vadd.f32 %v5371_v31, %v5035_v11  ;;  %v4990_v61 = vpop.f32.mrf.mxu1  ;;  %v4499_v19 = vadd.f32 %v4453_v63, %v11450_v55  ;;  %v6110_v55 = vsel %vm852_vm0, %v6105_v36, %v6109_v59  ;;  %v7065_v63 = vshrl.u32 %v10309_v46, 16 }
 0x364   : > { %v11776_v49 = vadd.f32 %v5897_v50, %v5418_v13  ;;  %v5036_v6 = vadd.f32 %v4990_v61, %v4499_v19  ;;  %v10261_v13 = vld [vmem:[%s10581_s26 + $0x64] sm:$0xff]  ;;  %v7068_v61 = vshll.u32 %v10309_v46, 16  ;;  %v7067_v5 = vrot.slane %v7065_v63, 1 }
 0x365   : > { %v6115_v62 = vshll.u32 %v10261_v13, 16  ;;  %v10285_v19 = vld [vmem:[%s10581_s26 + $0x64] sm:$0xff] }
 0x366   : > { %v7070_v25 = vrot.slane %v7068_v61, 2  ;;  %v10310_v61 = vld [vmem:[%s10581_s26 + $0x6c] sm:$0xff] }
 0x369   : > { %v5373_v27 = vpop.f32.mrf.mxu2  ;;  %v4456_v21 = vpop.f32.mrf.mxu0 }
 0x36a   : > { %v5899_v23 = vpop.f32.mrf.mxu3  ;;  %v5419_v39 = vadd.f32 %v5373_v27, %v5036_v6  ;;  %v4993_v60 = vpop.f32.mrf.mxu1  ;;  %v4500_v11 = vadd.f32 %v4456_v21, %v11464_v24  ;;  %v10333_v6 = vld [vmem:[%s10581_s26 + $0x64] sm:$0xff]  ;;  %v6603_v21 = vrot.slane %v10285_v19, 1  ;;  %v6119_v19 = vshrl.u32 %v10261_v13, 16 }
 0x36c   : > { %v11784_v31 = vadd.f32 %v5899_v23, %v5419_v39  ;;  %v5037_v50 = vadd.f32 %v4993_v60, %v4500_v11  ;;  %6386 = vmatmul.bf16.gmra.mxu0 %v6110_v55  ;;  %v6113_v23 = vor.u32 %v6111_v3, %v6109_v59  ;;  %v6117_v39 = vrot.slane %v6115_v62, 1 }
 0x36d   : > { %6805 = vmatmul.bf16.gmra.mxu1 %v6602_v45  ;;  %v7071_v60 = vor.u32 %v7070_v25, %v7067_v5  ;;  %v7559_v55 = vrot.slane %v10333_v6, 2  ;;  %v6604_v46 = vsel %vm1370_vm1, %v6601_v34, %v6603_v21 }
 0x36e   : > { %7342 = vmatmul.bf16.gmra.mxu2 %v7063_v40 }
 0x36f   : > { %7761 = vmatmul.bf16.gmra.mxu3 %v7558_v12  ;;  %v7072_v63 = vsel %vm1789_vm2, %v7062_v37, %v7071_v60  ;;  %v7560_v59 = vsel %vm2851_vm6, %v7557_v29, %v7559_v55 }
 0x371   : > { %v5376_v43 = vpop.f32.mrf.mxu2  ;;  %v4458_v15 = vpop.f32.mrf.mxu0 }
 0x372   : > { %v5902_v22 = vpop.f32.mrf.mxu3  ;;  %v5420_v24 = vadd.f32 %v5376_v43, %v5037_v50  ;;  %v4995_v4 = vpop.f32.mrf.mxu1  ;;  %v4501_v38 = vadd.f32 %v4458_v15, %v11475_v18  ;;  %v6118_v18 = vsel %vm852_vm0, %v6113_v23, %v6117_v39  ;;  %v7074_v15 = vshrl.u32 %v10310_v61, 16 }
 0x374   : > { %v11790_v36 = vadd.f32 %v5902_v22, %v5420_v24  ;;  %v5038_v27 = vadd.f32 %v4995_v4, %v4501_v38  ;;  %v10262_v24 = vld [vmem:[%s10581_s26 + $0x6c] sm:$0xff]  ;;  %v7077_v4 = vshll.u32 %v10310_v61, 16  ;;  %v7076_v25 = vrot.slane %v7074_v15, 1 }
 0x375   : > { %v6123_v29 = vshll.u32 %v10262_v24, 16  ;;  %v10286_v38 = vld [vmem:[%s10581_s26 + $0x6c] sm:$0xff] }
 0x376   : > { %v7079_v6 = vrot.slane %v7077_v4, 2  ;;  %v10311_v4 = vld [vmem:[%s10581_s26 + $0x74] sm:$0xff] }
 0x379   : > { %v5378_v45 = vpop.f32.mrf.mxu2  ;;  %v4461_v40 = vpop.f32.mrf.mxu0 }
 0x37a   : > { %v5904_v11 = vpop.f32.mrf.mxu3  ;;  %v5421_v51 = vadd.f32 %v5378_v45, %v5038_v27  ;;  %v4998_v12 = vpop.f32.mrf.mxu1  ;;  %v4502_v50 = vadd.f32 %v4461_v40, %v11482_v20  ;;  %v10334_v27 = vld [vmem:[%s10581_s26 + $0x6c] sm:$0xff]  ;;  %v6605_v40 = vrot.slane %v10286_v38, 1 }
 0x37c   : > { %v11798_v43 = vadd.f32 %v5904_v11, %v5421_v51  ;;  %v5039_v22 = vadd.f32 %v4998_v12, %v4502_v50  ;;  %6391 = vmatmul.bf16.gmra.mxu0 %v6118_v18  ;;  %v6121_v11 = vor.u32 %v6119_v19, %v6117_v39  ;;  %v6125_v51 = vrot.slane %v6123_v29, 1 }
 0x37d   : > { %6810 = vmatmul.bf16.gmra.mxu1 %v6604_v46  ;;  %v7080_v12 = vor.u32 %v7079_v6, %v7076_v25  ;;  %v7561_v18 = vrot.slane %v10334_v27, 2  ;;  %v6606_v61 = vsel %vm1370_vm1, %v6603_v21, %v6605_v40  ;;  %v7083_v21 = vshrl.u32 %v10311_v4, 16 }
 0x37e   : > { %7347 = vmatmul.bf16.gmra.mxu2 %v7072_v63  ;;  %v6127_v29 = vshrl.u32 %v10262_v24, 16 }
 0x37f   : > { %7766 = vmatmul.bf16.gmra.mxu3 %v7560_v59  ;;  %v7081_v15 = vsel %vm1789_vm2, %v7071_v60, %v7080_v12  ;;  %v7562_v39 = vsel %vm2851_vm6, %v7559_v55, %v7561_v18  ;;  %v7085_v6 = vrot.slane %v7083_v21, 1 }
 0x381   : > { %v5381_v34 = vpop.f32.mrf.mxu2  ;;  %v4463_v62 = vpop.f32.mrf.mxu0 }
 0x382   : > { %v5907_v3 = vpop.f32.mrf.mxu3  ;;  %v5422_v20 = vadd.f32 %v5381_v34, %v5039_v22  ;;  %v5000_v37 = vpop.f32.mrf.mxu1  ;;  %v4503_v5 = vadd.f32 %v4463_v62, %v11491_v8  ;;  %v6126_v8 = vsel %vm852_vm0, %v6121_v11, %v6125_v51  ;;  %v7086_v62 = vshll.u32 %v10311_v4, 16 }
 0x384   : > { %v11804_v23 = vadd.f32 %v5907_v3, %v5422_v20  ;;  %v5040_v45 = vadd.f32 %v5000_v37, %v4503_v5  ;;  %v11815_v20 = vld [vmem:[%s10581_s26 + $0x74] sm:$0xff]  ;;  %v7088_v27 = vrot.slane %v7086_v62, 2 }
 0x385   : > { %v6131_v38 = vshll.u32 %v11815_v20, 16  ;;  %v11819_v5 = vld [vmem:[%s10581_s26 + $0x74] sm:$0xff] }
 0x386   : > { %v7089_v24 = vor.u32 %v7088_v27, %v7085_v6 }
 0x389   : > { %v5383_v46 = vpop.f32.mrf.mxu2  ;;  %v4466_v63 = vpop.f32.mrf.mxu0 }
 0x38a   : > { %v5909_v50 = vpop.f32.mrf.mxu3  ;;  %v5423_v13 = vadd.f32 %v5383_v46, %v5040_v45  ;;  %v5003_v59 = vpop.f32.mrf.mxu1  ;;  %v4504_v22 = vadd.f32 %v4466_v63, %v11505_v35  ;;  %v11823_v45 = vld [vmem:[%s10581_s26 + $0x74] sm:$0xff]  ;;  %v6948_v46 = vld [vmem:[%s10581_s26 + $0x7c] sm:$0xf]  ;;  %v6133_v63 = vrot.slane %v6131_v38, 1 }
 0x38b   : > { %v7485_v38 = vld [vmem:[%s10581_s26 + $0x7c] sm:$0xf] }
 0x38c   : > { %v11812_v34 = vadd.f32 %v5909_v50, %v5423_v13  ;;  %v5041_v3 = vadd.f32 %v5003_v59, %v4504_v22  ;;  %6396 = vmatmul.bf16.gmra.mxu0 %v6126_v8  ;;  %v6129_v13 = vor.u32 %v6127_v29, %v6125_v51  ;;  %v6607_v59 = vrot.slane %v11819_v5, 1 }
 0x38d   : > { %6815 = vmatmul.bf16.gmra.mxu1 %v6606_v61  ;;  %v7563_v8 = vrot.slane %v11823_v45, 2  ;;  %v6004_v61 = vld [vmem:[%s10581_s26 + $0x7c] sm:$0xf]  ;;  %v7000_v22 = vunpack.c.l.b16 %v6948_v46 }
 0x38e   : > { %7352 = vmatmul.bf16.gmra.mxu2 %v7081_v15  ;;  %v6134_v21 = vsel %vm852_vm0, %v6129_v13, %v6133_v63  ;;  %v6608_v62 = vsel %vm1370_vm1, %v6605_v40, %v6607_v59  ;;  %v6056_v51 = vunpack.c.l.b16 %v6004_v61  ;;  %v6135_v13 = vshrl.u32 %v11815_v20, 16 }
 0x38f   : > { %7771 = vmatmul.bf16.gmra.mxu3 %v7562_v39 }
 0x391   : > { %v5386_v35 = vpop.f32.mrf.mxu2  ;;  %v4468_v19 = vpop.f32.mrf.mxu0 }
 0x392   : > { %v5912_v37 = vpop.f32.mrf.mxu3  ;;  %v5424_v60 = vadd.f32 %v5386_v35, %v5041_v3  ;;  %v5005_v55 = vpop.f32.mrf.mxu1  ;;  %v4505_v25 = vadd.f32 %v4468_v19, %v11516_v44  ;;  %v6529_v19 = vld [vmem:[%s10581_s26 + $0x7c] sm:$0xf] }
 0x393   : > { %v6581_v40 = vunpack.c.l.b16 %v6529_v19 }
 0x394   : > { %v11825_v11 = vadd.f32 %v5912_v37, %v5424_v60  ;;  %v5042_v50 = vadd.f32 %v5005_v55, %v4505_v25  ;;  %v7090_v37 = vsel %vm1789_vm2, %v7080_v12, %v7089_v24  ;;  %v7564_v60 = vsel %vm2851_vm6, %v7561_v18, %v7563_v8 }
 0x395   : > { %v7010_v55 = vpack.c.b16 %v7000_v22, %v7000_v22  ;;  %v11840_v25 = vpack.c.b16 %v6056_v51, %v6056_v51  ;;  %v11844_v22 = vpack.c.b16 %v6581_v40, %v6581_v40 }
 0x397   : > { %v7092_v6 = vshrl.u32 %v7010_v55, 16  ;;  %v7095_v27 = vshll.u32 %v7010_v55, 16  ;;  %v6139_v61 = vshll.u32 %v11840_v25, 16 }
 0x399   : > { %v5388_v44 = vpop.f32.mrf.mxu2  ;;  %v4471_v4 = vpop.f32.mrf.mxu0  ;;  %v6141_v51 = vrot.slane %v6139_v61, 1 }
 0x39a   : > { %v5914_v15 = vpop.f32.mrf.mxu3  ;;  %v5425_v39 = vadd.f32 %v5388_v44, %v5042_v50  ;;  %v5008_v3 = vpop.f32.mrf.mxu1  ;;  %v4506_v35 = vadd.f32 %v4471_v4, %v11523_v14  ;;  %v7537_v14 = vunpack.c.l.b16 %v7485_v38 }
 0x39c   : > { %v11837_v29 = vadd.f32 %v5914_v15, %v5425_v39  ;;  %v5043_v5 = vadd.f32 %v5008_v3, %v4506_v35  ;;  %6401 = vmatmul.bf16.gmra.mxu0 %v6134_v21  ;;  %v7094_v15 = vrot.slane %v7092_v6, 1  ;;  %v7097_v39 = vrot.slane %v7095_v27, 2  ;;  %v10264_v6 = vld [vmem:[%s10886_s30] sm:$0xff] }
 0x39d   : > { %6820 = vmatmul.bf16.gmra.mxu1 %v6608_v62  ;;  %v11847_v4 = vpack.c.b16 %v7537_v14, %v7537_v14  ;;  %v6137_v62 = vor.u32 %v6135_v13, %v6133_v63  ;;  %v6609_v35 = vrot.slane %v11844_v22, 1  ;;  %v10312_v14 = vld [vmem:[%s10886_s30] sm:$0xff] }
 0x39e   : > { %7357 = vmatmul.bf16.gmra.mxu2 %v7090_v37  ;;  %v11852_v20 = vor.u32 %v7097_v39, %v7094_v15 }
 0x39f   : > { %7776 = vmatmul.bf16.gmra.mxu3 %v7564_v60  ;;  %v7565_v37 = vrot.slane %v11847_v4, 2  ;;  %v6610_v40 = vsel %vm1370_vm1, %v6607_v59, %v6609_v35  ;;  %v7147_v59 = vshrl.u32 %v10312_v14, 16  ;;  %v11867_v4 = vld [vmem:[%s10886_s30] sm:$0xff] }
 0x3a0   : > { %v7099_v63 = vsel %vm1789_vm2, %v7089_v24, %v11852_v20  ;;  %vm7611_vm2 = vcmask 1041408  }
 0x3a1   : > { %v5391_v45 = vpop.f32.mrf.mxu2  ;;  %v4473_v18 = vpop.f32.mrf.mxu0  ;;  %v7566_v27 = vsel %vm2851_vm6, %v7563_v8, %v7565_v37 }
 0x3a2   : > { %v5917_v12 = vpop.f32.mrf.mxu3  ;;  %v5426_v46 = vadd.f32 %v5391_v45, %v5043_v5  ;;  %v5010_v50 = vpop.f32.mrf.mxu1  ;;  %v4507_v44 = vadd.f32 %v4473_v18, %v11532_v48  ;;  %v6142_v5 = vsel %vm852_vm0, %v6137_v62, %v6141_v51  ;;  %v6195_v18 = vshll.u32 %v10264_v6, 16  ;;  %v11870_v62 = vld [vmem:[%s10886_s30] sm:$0xff] }
 0x3a3   : > { %vm7145_vm0 = vsmask.f32 2304 }
 0x3a4   : > { %v11849_v3 = vadd.f32 %v5917_v12, %v5426_v46  ;;  %v5044_v21 = vadd.f32 %v5010_v50, %v4507_v44  ;;  %v6192_v46 = vshrl.u32 %v10264_v6, 16  ;;  %v7150_v50 = vshll.u32 %v10312_v14, 16  ;;  %vm11887_vm1 = vmand %vm6655_vm15, %vm7145_vm0 }
 0x3a5   : > { %v6143_v44 = vshrl.u32 %v11840_v25, 16  ;;  %v6197_v39 = vrot.slane %v6195_v18, 5  ;;  %v6656_v25 = vrot.slane %v11867_v4, 5 }
 0x3a6   : > { %v6194_v15 = vrot.slane %v6192_v46, 4 }
 0x3a9   : > { %v5393_v60 = vpop.f32.mrf.mxu2  ;;  %v6367_v55 = vpop.f32.mrf.mxu0 }
 0x3aa   : > { %v5919_v19 = vpop.f32.mrf.mxu3  ;;  %v5427_v48 = vadd.f32 %v5393_v60, %v5044_v21  ;;  %v6786_v38 = vpop.f32.mrf.mxu1  ;;  %v6447_v12 = vadd.f32 %v6367_v55, %v11546_v58  ;;  %v7149_v58 = vrot.slane %v7147_v59, 5  ;;  %v7152_v21 = vrot.slane %v7150_v50, 6  ;;  %v10265_v50 = vld [vmem:[%s10886_s30 + $0x8] sm:$0xff] }
 0x3ab   : > { %v11874_v55 = vor.u32 %v6197_v39, %v6194_v15  ;;  %v6678_v59 = vsel %vm6655_vm15, %v6609_v35, %v6656_v25 }
 0x3ac   : > { %v11862_v45 = vadd.f32 %v5919_v19, %v5427_v48  ;;  %6406 = vmatmul.bf16.gmra.mxu0 %v6142_v5  ;;  %v6866_v61 = vadd.f32 %v6786_v38, %v6447_v12  ;;  %v6145_v48 = vor.u32 %v6143_v44, %v6141_v51  ;;  %v11877_v38 = vor.u32 %v7152_v21, %v7149_v58 }
 0x3ad   : > { %6825 = vmatmul.bf16.gmra.mxu1 %v6610_v40  ;;  %v7612_v5 = vrot.slane %v11870_v62, 6  ;;  %v6200_v44 = vshrl.u32 %v10265_v50, 16 }
 0x3ae   : > { %7362 = vmatmul.bf16.gmra.mxu2 %v7099_v63  ;;  %v6260_v18 = vsel %vm11614_vm14, %v6145_v48, %v11874_v55 }
 0x3af   : > { %7781 = vmatmul.bf16.gmra.mxu3 %v7566_v27 }
 0x3b1   : > { %v7323_v13 = vpop.f32.mrf.mxu2  ;;  %v6369_v8 = vpop.f32.mrf.mxu0 }
 0x3b2   : > { %v7742_v24 = vpop.f32.mrf.mxu3  ;;  %v6788_v22 = vpop.f32.mrf.mxu1  ;;  %v7403_v60 = vadd.f32 %v7323_v13, %v6866_v61  ;;  %v6448_v19 = vadd.f32 %v6369_v8, %v11558_v41  ;;  %v11883_v41 = vld [vmem:[%s12122_s3] ss:$0 sm:$0xff]  ;;  %v7216_v13 = vsel %vm11887_vm1, %v11852_v20, %v11877_v38  ;;  %v10313_v61 = vld [vmem:[%s10886_s30 + $0x8] sm:$0xff]  ;;  %v6203_v20 = vshll.u32 %v10265_v50, 16 }
 0x3b3   : > { %v7155_v15 = vshrl.u32 %v10313_v61, 16  ;;  %v7158_v39 = vshll.u32 %v10313_v61, 16 }
 0x3b4   : > { %v7822_v40 = vadd.f32 %v7742_v24, %v7403_v60  ;;  %v6867_v6 = vadd.f32 %v6788_v22, %v6448_v19  ;;  %v7634_v24 = vsel %vm7611_vm2, %v7565_v37, %v7612_v5  ;;  %v6205_v51 = vrot.slane %v6203_v20, 5 }
 0x3b6   : > { %v7925_v8 = vadd.f32 %v11883_v41, %v7822_v40 }
 0x3b8   : > { %v7957_v37 = vmax.f32 %v7925_v8, 0.0 }
 0x3b9   : > { %v7325_v63 = vpop.f32.mrf.mxu2  ;;  %v6372_v12 = vpop.f32.mrf.mxu0 }
 0x3ba   : > { %v7744_v27 = vpop.f32.mrf.mxu3  ;;  %v7404_v14 = vadd.f32 %v7325_v63, %v6867_v6  ;;  %v6791_v46 = vpop.f32.mrf.mxu1  ;;  %v6449_v35 = vadd.f32 %v6372_v12, %v11567_v52  ;;  %v6202_v6 = vrot.slane %v6200_v44, 4  ;;  %v11918_v63 = vld [vmem:[%s10886_s30 + $0x8] sm:$0xff] }
 0x3bb   : > { %v11921_v12 = vld [vmem:[%s10886_s30 + $0x8] sm:$0xff] }
 0x3bc   : > { %v7823_v22 = vadd.f32 %v7744_v27, %v7404_v14  ;;  %6411 = vmatmul.bf16.gmra.mxu0 %v6260_v18  ;;  %v6868_v52 = vadd.f32 %v6791_v46, %v6449_v35  ;;  %v7157_v27 = vrot.slane %v7155_v15, 5  ;;  %v7160_v14 = vrot.slane %v7158_v39, 6  ;;  %v10266_v39 = vld [vmem:[%s10886_s30 + $0x10] sm:$0xff] }
 0x3bd   : > { %6830 = vmatmul.bf16.gmra.mxu1 %v6678_v59  ;;  %v6206_v50 = vor.u32 %v6205_v51, %v6202_v6 }
 0x3be   : > { %v7926_v33 = vadd.f32 %v11883_v41, %v7823_v22  ;;  %7367 = vmatmul.bf16.gmra.mxu2 %v7216_v13  ;;  %v6657_v13 = vrot.slane %v11918_v63, 5  ;;  %v7161_v46 = vor.u32 %v7160_v14, %v7157_v27 }
 0x3bf   : > { %7786 = vmatmul.bf16.gmra.mxu3 %v7634_v24  ;;  %v7613_v24 = vrot.slane %v11921_v12, 6  ;;  %v6207_v15 = vsel %vm5683_vm12, %v11874_v55, %v6206_v50 }
 0x3c0   : > { %v7958_v58 = vmax.f32 %v7926_v33, 0.0 }
 0x3c1   : > { %v7328_v21 = vpop.f32.mrf.mxu2  ;;  %v6374_v48 = vpop.f32.mrf.mxu0 }
 0x3c2   : > { %v7747_v60 = vpop.f32.mrf.mxu3  ;;  %v10354_v19 = vpack.c.bf16 %v7958_v58, %v7957_v37  ;;  %v6793_v40 = vpop.f32.mrf.mxu1  ;;  %v7405_v18 = vadd.f32 %v7328_v21, %v6868_v52  ;;  %v6450_v59 = vadd.f32 %v6374_v48, %v11582_v54  ;;  %v6658_v54 = vsel %vm6655_vm15, %v6656_v25, %v6657_v13  ;;  %v10314_v21 = vld [vmem:[%s10886_s30 + $0x10] sm:$0xff] }
 0x3c3   : > { %v7162_v37 = vsel %vm7145_vm0, %v11877_v38, %v7161_v46  ;;  %v7614_v58 = vsel %vm7611_vm2, %v7612_v5, %v7613_v24  ;;  %v6209_v25 = vshrl.u32 %v10266_v39, 16  ;;  %v6212_v52 = vshll.u32 %v10266_v39, 16 }
 0x3c4   : > { %10355 = vst [vmem:[%s11915_s20] sm:$0xff] %v10354_v19   ;;  %v7824_v61 = vadd.f32 %v7747_v60, %v7405_v18  ;;  %v6869_v8 = vadd.f32 %v6793_v40, %v6450_v59  ;;  %v7164_v38 = vshrl.u32 %v10314_v21, 16  ;;  %v7167_v62 = vshll.u32 %v10314_v21, 16 }
 0x3c5   : > { %v6211_v12 = vrot.slane %v6209_v25, 4  ;;  %v6214_v18 = vrot.slane %v6212_v52, 5  ;;  %v10267_v25 = vld [vmem:[%s10886_s30 + $0x18] sm:$0xff] }
 0x3c6   : > { %v7927_v60 = vadd.f32 %v11883_v41, %v7824_v61  ;;  %v7166_v59 = vrot.slane %v7164_v38, 5  ;;  %v7169_v61 = vrot.slane %v7167_v62, 6  ;;  %v10315_v38 = vld [vmem:[%s10886_s30 + $0x18] sm:$0xff] }
 0x3c8   : > { %v7959_v5 = vmax.f32 %v7927_v60, 0.0 }
 0x3c9   : > { %v7330_v22 = vpop.f32.mrf.mxu2  ;;  %v6377_v44 = vpop.f32.mrf.mxu0 }
 0x3ca   : > { %v7749_v33 = vpop.f32.mrf.mxu3  ;;  %v7406_v35 = vadd.f32 %v7330_v22, %v6869_v8  ;;  %v6796_v20 = vpop.f32.mrf.mxu1  ;;  %v6451_v4 = vadd.f32 %v6377_v44, %v11600_v16  ;;  %v11943_v16 = vld [vmem:[%s10886_s30 + $0x10] sm:$0xff] }
 0x3cb   : > { %v11946_v8 = vld [vmem:[%s10886_s30 + $0x10] sm:$0xff]  ;;  %v6659_v44 = vrot.slane %v11943_v16, 5 }
 0x3cc   : > { %v7825_v19 = vadd.f32 %v7749_v33, %v7406_v35  ;;  %6416 = vmatmul.bf16.gmra.mxu0 %v6207_v15  ;;  %v6870_v63 = vadd.f32 %v6796_v20, %v6451_v4  ;;  %v6215_v35 = vor.u32 %v6214_v18, %v6211_v12  ;;  %v7170_v20 = vor.u32 %v7169_v61, %v7166_v59 }
 0x3cd   : > { %6835 = vmatmul.bf16.gmra.mxu1 %v6658_v54  ;;  %v7615_v15 = vrot.slane %v11946_v8, 6  ;;  %v6660_v4 = vsel %vm6655_vm15, %v6657_v13, %v6659_v44  ;;  %v6221_v13 = vshll.u32 %v10267_v25, 16 }
 0x3ce   : > { %v7928_v55 = vadd.f32 %v11883_v41, %v7825_v19  ;;  %7372 = vmatmul.bf16.gmra.mxu2 %v7162_v37 }
 0x3cf   : > { %7791 = vmatmul.bf16.gmra.mxu3 %v7614_v58  ;;  %v7616_v52 = vsel %vm7611_vm2, %v7613_v24, %v7615_v15  ;;  %v6223_v61 = vrot.slane %v6221_v13, 5 }
 0x3d0   : > { %v7960_v48 = vmax.f32 %v7928_v55, 0.0  ;;  %v6216_v55 = vsel %vm5683_vm12, %v6206_v50, %v6215_v35  ;;  %v6218_v50 = vshrl.u32 %v10267_v25, 16 }
 0x3d1   : > { %v7333_v40 = vpop.f32.mrf.mxu2  ;;  %v6379_v27 = vpop.f32.mrf.mxu0 }
 0x3d2   : > { %v7752_v6 = vpop.f32.mrf.mxu3  ;;  %v10359_v51 = vpack.c.bf16 %v7960_v48, %v7959_v5  ;;  %v6798_v14 = vpop.f32.mrf.mxu1  ;;  %v7407_v22 = vadd.f32 %v7333_v40, %v6870_v63  ;;  %v6452_v33 = vadd.f32 %v6379_v27, %v11630_v32  ;;  %v7171_v32 = vsel %vm7145_vm0, %v7161_v46, %v7170_v20 }
 0x3d3   : > { %v7176_v46 = vshll.u32 %v10315_v38, 16  ;;  %v6220_v59 = vrot.slane %v6218_v50, 4  ;;  %v10316_v50 = vld [vmem:[%s10886_s30 + $0x20] sm:$0xff] }
 0x3d4   : > { %10431 = vst [vmem:[%s11915_s20 + $0x8] sm:$0xff] %v10359_v51   ;;  %v7826_v54 = vadd.f32 %v7752_v6, %v7407_v22  ;;  %v6871_v39 = vadd.f32 %v6798_v14, %v6452_v33  ;;  %v7173_v6 = vshrl.u32 %v10315_v38, 16  ;;  %v11965_v33 = vld [vmem:[%s10886_s30 + $0x18] sm:$0xff] }
 0x3d5   : > { %v7178_v22 = vrot.slane %v7176_v46, 6 }
 0x3d6   : > { %v7929_v62 = vadd.f32 %v11883_v41, %v7826_v54  ;;  %v7175_v8 = vrot.slane %v7173_v6, 5 }
 0x3d8   : > { %v7961_v24 = vmax.f32 %v7929_v62, 0.0 }
 0x3d9   : > { %v7335_v37 = vpop.f32.mrf.mxu2  ;;  %v6382_v60 = vpop.f32.mrf.mxu0 }
 0x3da   : > { %v7754_v58 = vpop.f32.mrf.mxu3  ;;  %v7408_v21 = vadd.f32 %v7335_v37, %v6871_v39  ;;  %v6801_v19 = vpop.f32.mrf.mxu1  ;;  %v6453_v40 = vadd.f32 %v6382_v60, %v11636_v10  ;;  %v11962_v10 = vld [vmem:[%s10886_s30 + $0x18] sm:$0xff]  ;;  %v6224_v37 = vor.u32 %v6223_v61, %v6220_v59  ;;  %v7617_v60 = vrot.slane %v11965_v33, 6  ;;  %v11984_v33 = vld [vmem:[%s10886_s30 + $0x20] sm:$0xff] }
 0x3dc   : > { %v7827_v5 = vadd.f32 %v7754_v58, %v7408_v21  ;;  %6421 = vmatmul.bf16.gmra.mxu0 %v6216_v55  ;;  %v6872_v12 = vadd.f32 %v6801_v19, %v6453_v40  ;;  %v6661_v58 = vrot.slane %v11962_v10, 5  ;;  %v7179_v21 = vor.u32 %v7178_v22, %v7175_v8 }
 0x3dd   : > { %6840 = vmatmul.bf16.gmra.mxu1 %v6660_v4  ;;  %v6225_v62 = vsel %vm5683_vm12, %v6215_v35, %v6224_v37  ;;  %v7618_v40 = vsel %vm7611_vm2, %v7615_v15, %v7617_v60 }
 0x3de   : > { %v7930_v48 = vadd.f32 %v11883_v41, %v7827_v5  ;;  %7377 = vmatmul.bf16.gmra.mxu2 %v7171_v32  ;;  %v6662_v5 = vsel %vm6655_vm15, %v6659_v44, %v6661_v58 }
 0x3df   : > { %7796 = vmatmul.bf16.gmra.mxu3 %v7616_v52 }
 0x3e0   : > { %v7962_v51 = vmax.f32 %v7930_v48, 0.0  ;;  %v10268_v48 = vld [vmem:[%s10886_s30 + $0x20] sm:$0xff] }
 0x3e1   : > { %v7338_v63 = vpop.f32.mrf.mxu2  ;;  %v6384_v18 = vpop.f32.mrf.mxu0  ;;  %v6227_v35 = vshrl.u32 %v10268_v48, 16  ;;  %v6230_v44 = vshll.u32 %v10268_v48, 16 }
 0x3e2   : > { %v7757_v27 = vpop.f32.mrf.mxu3  ;;  %v10364_v14 = vpack.c.bf16 %v7962_v51, %v7961_v24  ;;  %v6803_v16 = vpop.f32.mrf.mxu1  ;;  %v7409_v54 = vadd.f32 %v7338_v63, %v6872_v12  ;;  %v6454_v39 = vadd.f32 %v6384_v18, %v11646_v56  ;;  %v7180_v56 = vsel %vm7145_vm0, %v7170_v20, %v7179_v21 }
 0x3e3   : > { %v7182_v51 = vshrl.u32 %v10316_v50, 16  ;;  %v7185_v20 = vshll.u32 %v10316_v50, 16  ;;  %v6229_v61 = vrot.slane %v6227_v35, 4  ;;  %v6232_v10 = vrot.slane %v6230_v44, 5  ;;  %v10269_v50 = vld [vmem:[%s10886_s30 + $0x28] sm:$0xff] }
 0x3e4   : > { %10432 = vst [vmem:[%s11915_s20 + $0x10] sm:$0xff] %v10364_v14   ;;  %v7828_v19 = vadd.f32 %v7757_v27, %v7409_v54  ;;  %v6873_v55 = vadd.f32 %v6803_v16, %v6454_v39 }
 0x3e5   : > { %v7184_v8 = vrot.slane %v7182_v51, 5  ;;  %v7187_v22 = vrot.slane %v7185_v20, 6  ;;  %v6239_v51 = vshll.u32 %v10269_v50, 16 }
 0x3e6   : > { %v7931_v13 = vadd.f32 %v11883_v41, %v7828_v19  ;;  %v11988_v19 = vor.u32 %v6232_v10, %v6229_v61  ;;  %v12010_v61 = vld [vmem:[%s10886_s30 + $0x28] sm:$0xff] }
 0x3e8   : > { %v7963_v15 = vmax.f32 %v7931_v13, 0.0 }
 0x3e9   : > { %v7340_v4 = vpop.f32.mrf.mxu2  ;;  %v6387_v52 = vpop.f32.mrf.mxu0 }
 0x3ea   : > { %v7759_v25 = vpop.f32.mrf.mxu3  ;;  %v7410_v32 = vadd.f32 %v7340_v4, %v6873_v55  ;;  %v6806_v38 = vpop.f32.mrf.mxu1  ;;  %v6455_v24 = vadd.f32 %v6387_v52, %v11659_v7  ;;  %v11981_v7 = vld [vmem:[%s10886_s30 + $0x20] sm:$0xff]  ;;  %v11991_v4 = vor.u32 %v7187_v22, %v7184_v8  ;;  %v12013_v22 = vld [vmem:[%s10886_s30 + $0x28] sm:$0xff] }
 0x3eb   : > { %v6663_v55 = vrot.slane %v11981_v7, 5 }
 0x3ec   : > { %v7829_v6 = vadd.f32 %v7759_v25, %v7410_v32  ;;  %6426 = vmatmul.bf16.gmra.mxu0 %v6225_v62  ;;  %v6874_v18 = vadd.f32 %v6806_v38, %v6455_v24  ;;  %v7619_v25 = vrot.slane %v11984_v33, 6  ;;  %v7189_v13 = vsel %vm7145_vm0, %v7179_v21, %v11991_v4  ;;  %v10294_v33 = vld [vmem:[%s10886_s30 + $0x30] sm:$0x10] }
 0x3ed   : > { %6845 = vmatmul.bf16.gmra.mxu1 %v6662_v5 }
 0x3ee   : > { %v7932_v46 = vadd.f32 %v11883_v41, %v7829_v6  ;;  %7382 = vmatmul.bf16.gmra.mxu2 %v7180_v56  ;;  %v7620_v6 = vsel %vm7611_vm2, %v7617_v60, %v7619_v25 }
 0x3ef   : > { %7801 = vmatmul.bf16.gmra.mxu3 %v7618_v40  ;;  %v6234_v40 = vsel %vm5683_vm12, %v6224_v37, %v11988_v19 }
 0x3f0   : > { %v7964_v63 = vmax.f32 %v7932_v46, 0.0  ;;  %v10317_v46 = vld [vmem:[%s10886_s30 + $0x28] sm:$0xff] }
 0x3f1   : > { %v7343_v27 = vpop.f32.mrf.mxu2  ;;  %v6389_v16 = vpop.f32.mrf.mxu0  ;;  %v7191_v21 = vshrl.u32 %v10317_v46, 16  ;;  %v7194_v20 = vshll.u32 %v10317_v46, 16 }
 0x3f2   : > { %v7762_v14 = vpop.f32.mrf.mxu3  ;;  %v10369_v12 = vpack.c.bf16 %v7964_v63, %v7963_v15  ;;  %v6808_v59 = vpop.f32.mrf.mxu1  ;;  %v7411_v54 = vadd.f32 %v7343_v27, %v6874_v18  ;;  %v6456_v39 = vadd.f32 %v6389_v16, %v11671_v30  ;;  %v6664_v30 = vsel %vm6655_vm15, %v6661_v58, %v6663_v55 }
 0x3f3   : > { %v6236_v58 = vshrl.u32 %v10269_v50, 16  ;;  %v7193_v10 = vrot.slane %v7191_v21, 5  ;;  %v7196_v8 = vrot.slane %v7194_v20, 6  ;;  %v10318_v50 = vld [vmem:[%s10886_s30 + $0x30] sm:$0x30] }
 0x3f4   : > { %10433 = vst [vmem:[%s11915_s20 + $0x18] sm:$0xff] %v10369_v12   ;;  %v7830_v32 = vadd.f32 %v7762_v14, %v7411_v54  ;;  %v6875_v52 = vadd.f32 %v6808_v59, %v6456_v39  ;;  %v6241_v59 = vrot.slane %v6239_v51, 5 }
 0x3f6   : > { %v7933_v24 = vadd.f32 %v11883_v41, %v7830_v32 }
 0x3f8   : > { %v7965_v60 = vmax.f32 %v7933_v24, 0.0 }
 0x3f9   : > { %v7345_v38 = vpop.f32.mrf.mxu2  ;;  %v6392_v48 = vpop.f32.mrf.mxu0 }
 0x3fa   : > { %v7764_v62 = vpop.f32.mrf.mxu3  ;;  %v7412_v5 = vadd.f32 %v7345_v38, %v6875_v52  ;;  %v6811_v56 = vpop.f32.mrf.mxu1  ;;  %v6457_v44 = vadd.f32 %v6392_v48, %v11678_v42  ;;  %v6238_v42 = vrot.slane %v6236_v58, 4  ;;  %v6665_v52 = vrot.slane %v12010_v61, 5  ;;  %v9578_v38 = vld [vmem:[%s10886_s30 + $0x30] sm:$0xf] }
 0x3fb   : > { %v7621_v48 = vrot.slane %v12013_v22, 6 }
 0x3fc   : > { %v7831_v35 = vadd.f32 %v7764_v62, %v7412_v5  ;;  %6431 = vmatmul.bf16.gmra.mxu0 %v6234_v40  ;;  %v6876_v12 = vadd.f32 %v6811_v56, %v6457_v44  ;;  %v12017_v32 = vor.u32 %v6241_v59, %v6238_v42  ;;  %v10270_v62 = vld [vmem:[%s10886_s30 + $0x30] sm:$0x10]  ;;  %v12022_v5 = vor.u32 %v7196_v8, %v7193_v10 }
 0x3fd   : > { %6850 = vmatmul.bf16.gmra.mxu1 %v6664_v30  ;;  %v9802_v30 = vld [vmem:[%s10886_s30 + $0x30] sm:$0xf]  ;;  %v9579_v46 = vor.u32 %v10270_v62, %v9578_v38  ;;  %v6666_v44 = vsel %vm6655_vm15, %v6663_v55, %v6665_v52  ;;  %v7622_v51 = vsel %vm7611_vm2, %v7619_v25, %v7621_v48 }
 0x3fe   : > { %v7934_v37 = vadd.f32 %v11883_v41, %v7831_v35  ;;  %7387 = vmatmul.bf16.gmra.mxu2 %v7189_v13  ;;  %v7198_v58 = vsel %vm7145_vm0, %v11991_v4, %v12022_v5  ;;  %v9803_v21 = vor.u32 %v10318_v50, %v9802_v30  ;;  %v12137_v50 = vld [vmem:[#allocation3_spill] sm:$0xff] }
 0x3ff   : > { %7806 = vmatmul.bf16.gmra.mxu3 %v7620_v6  ;;  %v6245_v7 = vshrl.u32 %v9579_v46, 16  ;;  %v6248_v4 = vshll.u32 %v9579_v46, 16 }
 0x400   : > { %v7966_v15 = vmax.f32 %v7934_v37, 0.0  ;;  %v6243_v37 = vsel %vm5683_vm12, %v11988_v19, %v12017_v32  ;;  %v7203_v25 = vshll.u32 %v9803_v21, 16 }
 0x401   : > { %v7348_v63 = vpop.f32.mrf.mxu2  ;;  %v6394_v18 = vpop.f32.mrf.mxu0  ;;  %v6247_v59 = vrot.slane %v6245_v7, 4 }
 0x402   : > { %v7767_v27 = vpop.f32.mrf.mxu3  ;;  %v10374_v14 = vpack.c.bf16 %v7966_v15, %v7965_v60  ;;  %v6813_v16 = vpop.f32.mrf.mxu1  ;;  %v7413_v54 = vadd.f32 %v7348_v63, %v6876_v12  ;;  %v6458_v39 = vadd.f32 %v6394_v18, %v11689_v2  ;;  %v9690_v15 = vld [vmem:[%s10886_s30 + $0x30] sm:$0xf]  ;;  %v7200_v63 = vshrl.u32 %v9803_v21, 16  ;;  %v10342_v18 = vld [vmem:[%s10886_s30 + $0x30] sm:$0x30] }
 0x403   : > { %v9914_v12 = vld [vmem:[%s10886_s30 + $0x30] sm:$0xf]  ;;  %v9691_v38 = vor.u32 %v10294_v33, %v9690_v15 }
 0x404   : > { %10434 = vst [vmem:[%s11915_s20 + $0x20] sm:$0xff] %v10374_v14   ;;  %v7832_v56 = vadd.f32 %v7767_v27, %v7413_v54  ;;  %v6877_v40 = vadd.f32 %v6813_v16, %v6458_v39  ;;  %v7202_v62 = vrot.slane %v7200_v63, 5 }
 0x405   : > { %v6667_v46 = vrot.slane %v9691_v38, 5 }
 0x406   : > { %v7935_v19 = vadd.f32 %v11883_v41, %v7832_v56  ;;  %v7205_v56 = vrot.slane %v7203_v25, 6 }
 0x407   : > { %v6668_v7 = vsel %vm6655_vm15, %v6665_v52, %v6667_v46 }
 0x408   : > { %v7967_v27 = vmax.f32 %v7935_v19, 0.0 }
 0x409   : > { %v7350_v13 = vpop.f32.mrf.mxu2  ;;  %v6397_v35 = vpop.f32.mrf.mxu0 }
 0x40a   : > { %v7769_v6 = vpop.f32.mrf.mxu3  ;;  %v7414_v24 = vadd.f32 %v7350_v13, %v6877_v40  ;;  %v6816_v2 = vpop.f32.mrf.mxu1  ;;  %v6459_v60 = vadd.f32 %v6397_v35, %v11692_v9  ;;  %v6250_v9 = vrot.slane %v6248_v4, 5  ;;  %v9915_v40 = vor.u32 %v10342_v18, %v9914_v12 }
 0x40c   : > { %v7833_v20 = vadd.f32 %v7769_v6, %v7414_v24  ;;  %6436 = vmatmul.bf16.gmra.mxu0 %v6243_v37  ;;  %v6878_v8 = vadd.f32 %v6816_v2, %v6459_v60  ;;  %v6251_v6 = vor.u32 %v6250_v9, %v6247_v59  ;;  %v7206_v24 = vor.u32 %v7205_v56, %v7202_v62 }
 0x40d   : > { %6855 = vmatmul.bf16.gmra.mxu1 %v6666_v44  ;;  %v7623_v35 = vrot.slane %v9915_v40, 6 }
 0x40e   : > { %v7936_v55 = vadd.f32 %v11883_v41, %v7833_v20  ;;  %7392 = vmatmul.bf16.gmra.mxu2 %v7198_v58  ;;  %v6252_v20 = vsel %vm5683_vm12, %v12017_v32, %v6251_v6 }
 0x40f   : > { %7811 = vmatmul.bf16.gmra.mxu3 %v7622_v51  ;;  %v7624_v60 = vsel %vm7611_vm2, %v7621_v48, %v7623_v35 }
 0x410   : > { %v7968_v14 = vmax.f32 %v7936_v55, 0.0  ;;  %v7207_v55 = vsel %vm7145_vm0, %v12022_v5, %v7206_v24 }
 0x411   : > { %v7353_v16 = vpop.f32.mrf.mxu2  ;;  %v6399_v54 = vpop.f32.mrf.mxu0 }
 0x412   : > { %v7772_v42 = vpop.f32.mrf.mxu3  ;;  %v10379_v10 = vpack.c.bf16 %v7968_v14, %v7967_v27  ;;  %v6818_v39 = vpop.f32.mrf.mxu1  ;;  %v7415_v30 = vadd.f32 %v7353_v16, %v6878_v8  ;;  %v6460_v13 = vadd.f32 %v6399_v54, %v12137_v50 }
 0x414   : > { %10435 = vst [vmem:[%s11915_s20 + $0x28] sm:$0xff] %v10379_v10   ;;  %v7834_v37 = vadd.f32 %v7772_v42, %v7415_v30  ;;  %v6879_v44 = vadd.f32 %v6818_v39, %v6460_v13 }
 0x416   : > { %v7937_v4 = vadd.f32 %v11883_v41, %v7834_v37 }
 0x418   : > { %v7969_v61 = vmax.f32 %v7937_v4, 0.0 }
 0x419   : > { %v7355_v58 = vpop.f32.mrf.mxu2  ;;  %v6402_v21 = vpop.f32.mrf.mxu0 }
 0x41a   : > { %v7774_v51 = vpop.f32.mrf.mxu3  ;;  %v7416_v2 = vadd.f32 %v7355_v58, %v6879_v44  ;;  %v6821_v19 = vpop.f32.mrf.mxu1  ;;  %v6461_v32 = vadd.f32 %v6402_v21, %v11718_v28 }
 0x41c   : > { %v7835_v15 = vadd.f32 %v7774_v51, %v7416_v2  ;;  %6441 = vmatmul.bf16.gmra.mxu0 %v6252_v20  ;;  %v6880_v22 = vadd.f32 %v6821_v19, %v6461_v32 }
 0x41d   : > { %6860 = vmatmul.bf16.gmra.mxu1 %v6668_v7 }
 0x41e   : > { %v7938_v33 = vadd.f32 %v11883_v41, %v7835_v15  ;;  %7397 = vmatmul.bf16.gmra.mxu2 %v7207_v55 }
 0x41f   : > { %7816 = vmatmul.bf16.gmra.mxu3 %v7624_v60 }
 0x420   : > { %v7970_v52 = vmax.f32 %v7938_v33, 0.0 }
 0x421   : > { %v7358_v63 = vpop.f32.mrf.mxu2  ;;  %v6404_v27 = vpop.f32.mrf.mxu0 }
 0x422   : > { %v7777_v5 = vpop.f32.mrf.mxu3  ;;  %v10384_v25 = vpack.c.bf16 %v7970_v52, %v7969_v61  ;;  %v6823_v48 = vpop.f32.mrf.mxu1  ;;  %v7417_v14 = vadd.f32 %v7358_v63, %v6880_v22  ;;  %v6462_v12 = vadd.f32 %v6404_v27, %v11727_v17 }
 0x424   : > { %10436 = vst [vmem:[%s11915_s20 + $0x30] sm:$0xff] %v10384_v25   ;;  %v7836_v18 = vadd.f32 %v7777_v5, %v7417_v14  ;;  %v6881_v16 = vadd.f32 %v6823_v48, %v6462_v12 }
 0x426   : > { %v7939_v54 = vadd.f32 %v11883_v41, %v7836_v18 }
 0x428   : > { %v7971_v62 = vmax.f32 %v7939_v54, 0.0 }
 0x429   : > { %v7360_v42 = vpop.f32.mrf.mxu2  ;;  %v6407_v10 = vpop.f32.mrf.mxu0 }
 0x42a   : > { %v7779_v59 = vpop.f32.mrf.mxu3  ;;  %v7418_v28 = vadd.f32 %v7360_v42, %v6881_v16  ;;  %v6826_v8 = vpop.f32.mrf.mxu1  ;;  %v6463_v38 = vadd.f32 %v6407_v10, %v11734_v26 }
 0x42c   : > { %v7837_v39 = vadd.f32 %v7779_v59, %v7418_v28  ;;  %v6882_v50 = vadd.f32 %v6826_v8, %v6463_v38 }
 0x42e   : > { %v7940_v9 = vadd.f32 %v11883_v41, %v7837_v39 }
 0x430   : > { %v7972_v56 = vmax.f32 %v7940_v9, 0.0 }
 0x431   : > { %v7363_v40 = vpop.f32.mrf.mxu2  ;;  %v6409_v13 = vpop.f32.mrf.mxu0 }
 0x432   : > { %v7782_v30 = vpop.f32.mrf.mxu3  ;;  %v10389_v17 = vpack.c.bf16 %v7972_v56, %v7971_v62  ;;  %v6828_v6 = vpop.f32.mrf.mxu1  ;;  %v7419_v46 = vadd.f32 %v7363_v40, %v6882_v50  ;;  %v6464_v24 = vadd.f32 %v6409_v13, %v11742_v1 }
 0x434   : > { %10437 = vst [vmem:[%s11915_s20 + $0x38] sm:$0xff] %v10389_v17   ;;  %v7838_v35 = vadd.f32 %v7782_v30, %v7419_v46  ;;  %v6883_v37 = vadd.f32 %v6828_v6, %v6464_v24 }
 0x436   : > { %v7941_v21 = vadd.f32 %v11883_v41, %v7838_v35 }
 0x438   : > { %v7973_v55 = vmax.f32 %v7941_v21, 0.0 }
 0x439   : > { %v7365_v44 = vpop.f32.mrf.mxu2  ;;  %v6412_v2 = vpop.f32.mrf.mxu0 }
 0x43a   : > { %v7784_v58 = vpop.f32.mrf.mxu3  ;;  %v7420_v51 = vadd.f32 %v7365_v44, %v6883_v37  ;;  %v6831_v26 = vpop.f32.mrf.mxu1  ;;  %v6465_v7 = vadd.f32 %v6412_v2, %v11748_v47 }
 0x43c   : > { %v7839_v19 = vadd.f32 %v7784_v58, %v7420_v51  ;;  %v6884_v33 = vadd.f32 %v6831_v26, %v6465_v7 }
 0x43e   : > { %v7942_v20 = vadd.f32 %v11883_v41, %v7839_v19 }
 0x440   : > { %v7974_v60 = vmax.f32 %v7942_v20, 0.0 }
 0x441   : > { %v7368_v4 = vpop.f32.mrf.mxu2  ;;  %v6414_v32 = vpop.f32.mrf.mxu0 }
 0x442   : > { %v7787_v15 = vpop.f32.mrf.mxu3  ;;  %v10394_v1 = vpack.c.bf16 %v7974_v60, %v7973_v55  ;;  %v6833_v61 = vpop.f32.mrf.mxu1  ;;  %v7421_v52 = vadd.f32 %v7368_v4, %v6884_v33  ;;  %v6466_v63 = vadd.f32 %v6414_v32, %v11756_v53 }
 0x444   : > { %10438 = vst [vmem:[%s11915_s20 + $0x40] sm:$0xff] %v10394_v1   ;;  %v7840_v5 = vadd.f32 %v7787_v15, %v7421_v52  ;;  %v6885_v25 = vadd.f32 %v6833_v61, %v6466_v63 }
 0x446   : > { %v7943_v12 = vadd.f32 %v11883_v41, %v7840_v5 }
 0x448   : > { %v7975_v59 = vmax.f32 %v7943_v12, 0.0 }
 0x449   : > { %v7370_v22 = vpop.f32.mrf.mxu2  ;;  %v6417_v14 = vpop.f32.mrf.mxu0 }
 0x44a   : > { %v7789_v27 = vpop.f32.mrf.mxu3  ;;  %v7422_v48 = vadd.f32 %v7370_v22, %v6885_v25  ;;  %v6836_v47 = vpop.f32.mrf.mxu1  ;;  %v6467_v42 = vadd.f32 %v6417_v14, %v11762_v0 }
 0x44c   : > { %v7841_v18 = vadd.f32 %v7789_v27, %v7422_v48  ;;  %v6886_v54 = vadd.f32 %v6836_v47, %v6467_v42 }
 0x44e   : > { %v7944_v16 = vadd.f32 %v11883_v41, %v7841_v18 }
 0x450   : > { %v7976_v28 = vmax.f32 %v7944_v16, 0.0 }
 0x451   : > { %v7373_v10 = vpop.f32.mrf.mxu2  ;;  %v6419_v39 = vpop.f32.mrf.mxu0 }
 0x452   : > { %v7792_v8 = vpop.f32.mrf.mxu3  ;;  %v10399_v53 = vpack.c.bf16 %v7976_v28, %v7975_v59  ;;  %v6838_v9 = vpop.f32.mrf.mxu1  ;;  %v7423_v38 = vadd.f32 %v7373_v10, %v6886_v54  ;;  %v6468_v62 = vadd.f32 %v6419_v39, %v11770_v57 }
 0x454   : > { %10439 = vst [vmem:[%s11915_s20 + $0x48] sm:$0xff] %v10399_v53   ;;  %v7842_v56 = vadd.f32 %v7792_v8, %v7423_v38  ;;  %v6887_v40 = vadd.f32 %v6838_v9, %v6468_v62 }
 0x456   : > { %v7945_v6 = vadd.f32 %v11883_v41, %v7842_v56 }
 0x458   : > { %v7977_v37 = vmax.f32 %v7945_v6, 0.0 }
 0x459   : > { %v7375_v30 = vpop.f32.mrf.mxu2  ;;  %v6422_v13 = vpop.f32.mrf.mxu0 }
 0x45a   : > { %v7794_v17 = vpop.f32.mrf.mxu3  ;;  %v7424_v50 = vadd.f32 %v7375_v30, %v6887_v40  ;;  %v6841_v0 = vpop.f32.mrf.mxu1  ;;  %v6469_v35 = vadd.f32 %v6422_v13, %v11776_v49 }
 0x45c   : > { %v7843_v46 = vadd.f32 %v7794_v17, %v7424_v50  ;;  %v6888_v2 = vadd.f32 %v6841_v0, %v6469_v35 }
 0x45e   : > { %v7946_v24 = vadd.f32 %v11883_v41, %v7843_v46 }
 0x460   : > { %v7978_v44 = vmax.f32 %v7946_v24, 0.0 }
 0x461   : > { %v7378_v58 = vpop.f32.mrf.mxu2  ;;  %v6424_v26 = vpop.f32.mrf.mxu0 }
 0x462   : > { %v7797_v51 = vpop.f32.mrf.mxu3  ;;  %v10404_v57 = vpack.c.bf16 %v7978_v44, %v7977_v37  ;;  %v6843_v21 = vpop.f32.mrf.mxu1  ;;  %v7425_v19 = vadd.f32 %v7378_v58, %v6888_v2  ;;  %v6470_v20 = vadd.f32 %v6424_v26, %v11784_v31 }
 0x464   : > { %10440 = vst [vmem:[%s11915_s20 + $0x50] sm:$0xff] %v10404_v57   ;;  %v7844_v7 = vadd.f32 %v7797_v51, %v7425_v19  ;;  %v6889_v55 = vadd.f32 %v6843_v21, %v6470_v20 }
 0x466   : > { %v7947_v33 = vadd.f32 %v11883_v41, %v7844_v7 }
 0x468   : > { %v7979_v63 = vmax.f32 %v7947_v33, 0.0 }
 0x469   : > { %v7380_v60 = vpop.f32.mrf.mxu2  ;;  %v6427_v1 = vpop.f32.mrf.mxu0 }
 0x46a   : > { %v7799_v4 = vpop.f32.mrf.mxu3  ;;  %v7426_v15 = vadd.f32 %v7380_v60, %v6889_v55  ;;  %v6846_v49 = vpop.f32.mrf.mxu1  ;;  %v6471_v52 = vadd.f32 %v6427_v1, %v11790_v36 }
 0x46c   : > { %v7845_v32 = vadd.f32 %v7799_v4, %v7426_v15  ;;  %v6890_v27 = vadd.f32 %v6846_v49, %v6471_v52 }
 0x46e   : > { %v7948_v61 = vadd.f32 %v11883_v41, %v7845_v32 }
 0x470   : > { %v7980_v5 = vmax.f32 %v7948_v61, 0.0 }
 0x471   : > { %v7383_v25 = vpop.f32.mrf.mxu2  ;;  %v6429_v48 = vpop.f32.mrf.mxu0 }
 0x472   : > { %v7802_v22 = vpop.f32.mrf.mxu3  ;;  %v10409_v31 = vpack.c.bf16 %v7980_v5, %v7979_v63  ;;  %v6848_v14 = vpop.f32.mrf.mxu1  ;;  %v7427_v47 = vadd.f32 %v7383_v25, %v6890_v27  ;;  %v6472_v12 = vadd.f32 %v6429_v48, %v11798_v43 }
 0x474   : > { %10441 = vst [vmem:[%s11915_s20 + $0x58] sm:$0xff] %v10409_v31   ;;  %v7846_v18 = vadd.f32 %v7802_v22, %v7427_v47  ;;  %v6891_v16 = vadd.f32 %v6848_v14, %v6472_v12 }
 0x476   : > { %v7949_v8 = vadd.f32 %v11883_v41, %v7846_v18 }
 0x478   : > { %v7981_v9 = vmax.f32 %v7949_v8, 0.0 }
 0x479   : > { %v7385_v42 = vpop.f32.mrf.mxu2  ;;  %v6432_v10 = vpop.f32.mrf.mxu0 }
 0x47a   : > { %v7804_v59 = vpop.f32.mrf.mxu3  ;;  %v7428_v28 = vadd.f32 %v7385_v42, %v6891_v16  ;;  %v6851_v36 = vpop.f32.mrf.mxu1  ;;  %v6473_v39 = vadd.f32 %v6432_v10, %v11804_v23 }
 0x47c   : > { %v7847_v53 = vadd.f32 %v7804_v59, %v7428_v28  ;;  %v6892_v40 = vadd.f32 %v6851_v36, %v6473_v39 }
 0x47e   : > { %v7950_v54 = vadd.f32 %v11883_v41, %v7847_v53 }
 0x480   : > { %v7982_v38 = vmax.f32 %v7950_v54, 0.0 }
 0x481   : > { %v7388_v62 = vpop.f32.mrf.mxu2  ;;  %v6434_v30 = vpop.f32.mrf.mxu0 }
 0x482   : > { %v7807_v56 = vpop.f32.mrf.mxu3  ;;  %v10414_v43 = vpack.c.bf16 %v7982_v38, %v7981_v9  ;;  %v6853_v17 = vpop.f32.mrf.mxu1  ;;  %v7429_v50 = vadd.f32 %v7388_v62, %v6892_v40  ;;  %v6474_v13 = vadd.f32 %v6434_v30, %v11812_v34 }
 0x484   : > { %10442 = vst [vmem:[%s11915_s20 + $0x60] sm:$0xff] %v10414_v43   ;;  %v7848_v0 = vadd.f32 %v7807_v56, %v7429_v50  ;;  %v6893_v6 = vadd.f32 %v6853_v17, %v6474_v13 }
 0x486   : > { %v7951_v44 = vadd.f32 %v11883_v41, %v7848_v0 }
 0x488   : > { %v7983_v2 = vmax.f32 %v7951_v44, 0.0 }
 0x489   : > { %v7390_v46 = vpop.f32.mrf.mxu2  ;;  %v6437_v37 = vpop.f32.mrf.mxu0 }
 0x48a   : > { %v7809_v24 = vpop.f32.mrf.mxu3  ;;  %v7430_v35 = vadd.f32 %v7390_v46, %v6893_v6  ;;  %v6856_v23 = vpop.f32.mrf.mxu1  ;;  %v6475_v57 = vadd.f32 %v6437_v37, %v11825_v11 }
 0x48c   : > { %v7849_v58 = vadd.f32 %v7809_v24, %v7430_v35  ;;  %v6894_v20 = vadd.f32 %v6856_v23, %v6475_v57 }
 0x48e   : > { %v7952_v51 = vadd.f32 %v11883_v41, %v7849_v58 }
 0x490   : > { %v7984_v26 = vmax.f32 %v7952_v51, 0.0 }
 0x491   : > { %v7393_v21 = vpop.f32.mrf.mxu2  ;;  %v6439_v7 = vpop.f32.mrf.mxu0 }
 0x492   : > { %v7812_v19 = vpop.f32.mrf.mxu3  ;;  %v10419_v34 = vpack.c.bf16 %v7984_v26, %v7983_v2  ;;  %v6858_v55 = vpop.f32.mrf.mxu1  ;;  %v7431_v60 = vadd.f32 %v7393_v21, %v6894_v20  ;;  %v6476_v4 = vadd.f32 %v6439_v7, %v11837_v29 }
 0x494   : > { %10443 = vst [vmem:[%s11915_s20 + $0x68] sm:$0xff] %v10419_v34   ;;  %v7850_v15 = vadd.f32 %v7812_v19, %v7431_v60  ;;  %v6895_v1 = vadd.f32 %v6858_v55, %v6476_v4 }
 0x496   : > { %v7953_v11 = vadd.f32 %v11883_v41, %v7850_v15 }
 0x498   : > { %v7985_v22 = vmax.f32 %v7953_v11, 0.0 }
 0x499   : > { %v7395_v49 = vpop.f32.mrf.mxu2  ;;  %v6442_v61 = vpop.f32.mrf.mxu0 }
 0x49a   : > { %v7814_v33 = vpop.f32.mrf.mxu3  ;;  %v7432_v32 = vadd.f32 %v7395_v49, %v6895_v1  ;;  %v6861_v63 = vpop.f32.mrf.mxu1  ;;  %v6477_v25 = vadd.f32 %v6442_v61, %v11849_v3 }
 0x49c   : > { %v7851_v52 = vadd.f32 %v7814_v33, %v7432_v32  ;;  %v6896_v14 = vadd.f32 %v6861_v63, %v6477_v25 }
 0x49e   : > { %v7954_v5 = vadd.f32 %v11883_v41, %v7851_v52 }
 0x4a0   : > { %v7986_v31 = vmax.f32 %v7954_v5, 0.0 }
 0x4a1   : > { %v7398_v27 = vpop.f32.mrf.mxu2  ;;  %v6444_v47 = vpop.f32.mrf.mxu0 }
 0x4a2   : > { %v7817_v48 = vpop.f32.mrf.mxu3  ;;  %v10424_v29 = vpack.c.bf16 %v7986_v31, %v7985_v22  ;;  %v7433_v12 = vadd.f32 %v7398_v27, %v6896_v14  ;;  %v6478_v18 = vadd.f32 %v6444_v47, %v11862_v45  ;;  %v6863_v16 = vpop.f32.mrf.mxu1 }
 0x4a4   : > { %10444 = vst [vmem:[%s11915_s20 + $0x70] sm:$0xff] %v10424_v29   ;;  %v7852_v42 = vadd.f32 %v7817_v48, %v7433_v12  ;;  %v6897_v59 = vadd.f32 %v6863_v16, %v6478_v18 }
 0x4a6   : > { %v7955_v3 = vadd.f32 %v11883_v41, %v7852_v42 }
 0x4a8   : > { %v7987_v54 = vmax.f32 %v7955_v3, 0.0 }
 0x4a9   : > { %v7400_v28 = vpop.f32.mrf.mxu2 }
 0x4aa   : > { %v7434_v10 = vadd.f32 %v7400_v28, %v6897_v59  ;;  %v7819_v36 = vpop.f32.mrf.mxu3 }
 0x4ac   : > { %v7853_v8 = vadd.f32 %v7819_v36, %v7434_v10 }
 0x4ae   : > { %v7956_v53 = vadd.f32 %v11883_v41, %v7853_v8 }
 0x4b0   : > { %v7988_v39 = vmax.f32 %v7956_v53, 0.0 }
 0x4b2   : > { %v10429_v9 = vpack.c.bf16 %v7988_v39, %v7987_v54 }
 0x4b4   : > { %10445 = vst [vmem:[%s11915_s20 + $0x78] sm:$0xff] %v10429_v9  }
 0x4b5 PF: > { %s14_s17 = sadd.s32 1, %s10493_s17   ;;  %s12138_s15 = smov %s10489_s16 }
 0x4b6   : > { %p11_p7 = scmp.ge.s32.totalorder %s14_s17, 12   ;;  %s12139_s16 = smov %s12141_s18 }
 0x4b8   :  { %13 = sbr.rel (!%p11_p7) target bundleno = 2 (0x2), region = 98 }

</bundles_post_ra>
